<compile_context>
chip_gen: v7x
topology: tpu7x:2x2x1
jax: 0.10.0
libtpu: 0.0.40
codegen_flags: <defaults>
</compile_context>

<pallas_src>
import jax
import jax.numpy as jnp
import numpy as np
from jax import lax
from jax.experimental import pallas as pl
from jax.experimental.pallas import tpu as pltpu


def _bigru_kernel(x_ref, len_ref, wih_ref, whh_f_ref, whh_b_ref,
                  bgi_ref, bhhn_f_ref, bhhn_b_ref, out_ref, gi_ref):
    """Bidirectional single-layer GRU over a length-masked sequence.

    x_ref     : (T, Bp, D)   bf16   time-major input, batch padded to 8
    len_ref   : (Bp, 1)      int32  valid lengths (0 on padded rows)
    wih_ref   : (D, 6H)      bf16   [W_ih_fwd | W_ih_bwd], gate order (r, z, n)
    whh_f/b   : (H, 3H)      bf16   recurrent weights per direction
    bgi_ref   : (1, 6H)      f32    bih (+ bhh folded for r,z gates)
    bhhn_f/b  : (1, H)       f32    bhh of the n gate (stays inside r*(...))
    out_ref   : (Bp, 2H)     f32    [h_fwd | h_bwd]
    gi_ref    : (T, Bp, 6H)  f32    VMEM scratch for the hoisted projection
    """
    T, Bp, D = x_ref.shape
    H = whh_f_ref.shape[0]
    G = 3 * H

    # ---- Hoisted input projection: one big MXU matmul, not 2*T tiny ones. ----
    x2d = x_ref[...].reshape(T * Bp, D)
    gi = jnp.dot(x2d, wih_ref[...], preferred_element_type=jnp.float32)
    gi = gi + bgi_ref[...]
    gi_ref[...] = gi.reshape(T, Bp, 2 * G)

    whh_f = whh_f_ref[...]
    whh_b = whh_b_ref[...]
    lens = len_ref[...]                                   # (Bp, 1) int32
    # Hoist bias broadcasts out of the loop (broadcast_in_dim is not CSE'd).
    bhhn_f = jnp.broadcast_to(bhhn_f_ref[...], (Bp, H))
    bhhn_b = jnp.broadcast_to(bhhn_b_ref[...], (Bp, H))

    def cell(h_prev, gi_t, whh, bhhn, valid):
        gh = jnp.dot(h_prev.astype(whh.dtype), whh,
                     preferred_element_type=jnp.float32)   # (Bp, 3H)
        r = jax.nn.sigmoid(gi_t[:, 0:H] + gh[:, 0:H])
        z = jax.nn.sigmoid(gi_t[:, H:2 * H] + gh[:, H:2 * H])
        n = jnp.tanh(gi_t[:, 2 * H:3 * H] + r * (gh[:, 2 * H:3 * H] + bhhn))
        h_new = (1.0 - z) * n + z * h_prev
        # masked update == pack_padded_sequence (padded steps are skipped)
        return jnp.where(valid, h_new, h_prev)

    h0 = jnp.zeros((Bp, H), dtype=jnp.float32)

    def body(t, carry):
        h_f, h_b = carry
        tb = T - 1 - t
        gi_fwd = gi_ref[t]                                # (Bp, 6H)
        gi_bwd = gi_ref[tb]
        h_f = cell(h_f, gi_fwd[:, 0:G], whh_f, bhhn_f, t < lens)
        h_b = cell(h_b, gi_bwd[:, G:2 * G], whh_b, bhhn_b, tb < lens)
        return h_f, h_b

    # Fused fwd/bwd recurrence, fully unrolled (T is small and static).
    h_f, h_b = lax.fori_loop(0, T, body, (h0, h0), unroll=True)

    # Lane-dense single full-width store.
    out_ref[...] = jnp.concatenate([h_f, h_b], axis=-1)


def rnn_encoder_forward(x, lengths, params):
    """x: (T, B, D) float32 time-major; lengths: (B,) int32 sorted descending
    (pack_padded_sequence's default enforce_sorted=True).  Returns (B, 2H) f32."""
    T, B, D = x.shape
    H = params["whh_f"].shape[0]
    Bp = -(-B // 8) * 8                                   # sublane multiple of 8

    # Pad batch to 8 rows; padded rows get length 0 and never update h.
    x_p = jnp.zeros((T, Bp, D), jnp.bfloat16).at[:, :B, :].set(
        x.astype(jnp.bfloat16))
    len_p = jnp.zeros((Bp, 1), jnp.int32).at[:B, 0].set(lengths.astype(jnp.int32))

    # Pack weights for the kernel: bf16 for MXU throughput, f32 accumulation.
    wih_cat = jnp.concatenate([params["wih_f"], params["wih_b"]],
                              axis=1).astype(jnp.bfloat16)      # (D, 6H)
    whh_f = params["whh_f"].astype(jnp.bfloat16)
    whh_b = params["whh_b"].astype(jnp.bfloat16)

    def fold_bias(bih, bhh):
        # bhh folded into bih for the r, z gates; n gate's bhh stays per-step.
        b = bih.astype(jnp.float32)
        return b.at[:, 0:2 * H].add(bhh[:, 0:2 * H].astype(jnp.float32))

    bgi = jnp.concatenate([fold_bias(params["bih_f"], params["bhh_f"]),
                           fold_bias(params["bih_b"], params["bhh_b"])],
                          axis=1)                               # (1, 6H) f32
    bhhn_f = params["bhh_f"][:, 2 * H:3 * H].astype(jnp.float32)
    bhhn_b = params["bhh_b"][:, 2 * H:3 * H].astype(jnp.float32)

    vmem = pl.BlockSpec(memory_space=pltpu.MemorySpace.VMEM)
    out = pl.pallas_call(
        _bigru_kernel,
        out_shape=jax.ShapeDtypeStruct((Bp, 2 * H), jnp.float32),
        in_specs=[vmem] * 8,
        out_specs=vmem,
        scratch_shapes=[pltpu.VMEM((T, Bp, 6 * H), jnp.float32)],
    )(x_p, len_p, wih_cat, whh_f, whh_b, bgi, bhhn_f, bhhn_b)
    return out[:B]


def init_params(key, input_size, hidden_size):
    """PyTorch-style uniform(-1/sqrt(H), 1/sqrt(H)) init.  Weights stored
    pre-transposed as (in_features, 3H) with PyTorch gate order (r, z, n)."""
    k = 1.0 / np.sqrt(hidden_size)
    keys = jax.random.split(key, 8)

    def u(kk, shape):
        return jax.random.uniform(kk, shape, jnp.float32, -k, k)

    H3 = 3 * hidden_size
    return dict(
        wih_f=u(keys[0], (input_size, H3)), whh_f=u(keys[1], (hidden_size, H3)),
        bih_f=u(keys[2], (1, H3)), bhh_f=u(keys[3], (1, H3)),
        wih_b=u(keys[4], (input_size, H3)), whh_b=u(keys[5], (hidden_size, H3)),
        bih_b=u(keys[6], (1, H3)), bhh_b=u(keys[7], (1, H3)),
    )


def _reference(x, lengths, params):
    """Pure-JAX reference of the same bidirectional packed GRU, using the same
    bf16-input / f32-accumulation matmul precision as the kernel."""
    T, B, _ = x.shape
    H = params["whh_f"].shape[0]
    mask = (jnp.arange(T)[:, None] < lengths[None, :])          # (T, B) bool

    def cell(h, x_t, m_t, wih, whh, bih, bhh):
        gi = jnp.dot(x_t.astype(jnp.bfloat16), wih.astype(jnp.bfloat16),
                     preferred_element_type=jnp.float32) + bih
        gh = jnp.dot(h.astype(jnp.bfloat16), whh.astype(jnp.bfloat16),
                     preferred_element_type=jnp.float32) + bhh
        i_r, i_z, i_n = jnp.split(gi, 3, axis=-1)
        h_r, h_z, h_n = jnp.split(gh, 3, axis=-1)
        r = jax.nn.sigmoid(i_r + h_r)
        z = jax.nn.sigmoid(i_z + h_z)
        n = jnp.tanh(i_n + r * h_n)
        h_new = (1.0 - z) * n + z * h
        return jnp.where(m_t[:, None], h_new, h)

    h_f = jnp.zeros((B, H), jnp.float32)
    for t in range(T):
        h_f = cell(h_f, x[t], mask[t], params["wih_f"], params["whh_f"],
                   params["bih_f"], params["bhh_f"])
    h_b = jnp.zeros((B, H), jnp.float32)
    for t in range(T - 1, -1, -1):
        h_b = cell(h_b, x[t], mask[t], params["wih_b"], params["whh_b"],
                   params["bih_b"], params["bhh_b"])
    return jnp.concatenate([h_f, h_b], axis=-1)


if __name__ == "__main__":
    # Module defaults: input_size=128, hidden_size=128, 1 layer, bidirectional.
    T, B, D, H = 8, 2, 128, 128
    key = jax.random.PRNGKey(0)
    kx, kp = jax.random.split(key)

    x = jax.random.normal(kx, (T, B, D), dtype=jnp.float32)
    # Sorted descending, as pack_padded_sequence(enforce_sorted=True) requires.
    lengths = jnp.array([8, 5], dtype=jnp.int32)
    params = init_params(kp, D, H)

    h_n = jax.block_until_ready(rnn_encoder_forward(x, lengths, params))
    assert h_n.shape == (B, 2 * H)

    ref = jax.block_until_ready(_reference(x, lengths, params))
    np.testing.assert_allclose(np.asarray(h_n), np.asarray(ref),
                               rtol=0, atol=2e-3)
    print("KERNEL_OK")
</pallas_src>

<mosaic_0001>
module attributes {stable_mosaic.version = 11 : i64} {
  func.func @_bigru_kernel(%arg0: memref<8x8x128xbf16, #tpu.memory_space<vmem>>, %arg1: memref<8x1xi32, #tpu.memory_space<vmem>>, %arg2: memref<128x768xbf16, #tpu.memory_space<vmem>>, %arg3: memref<128x384xbf16, #tpu.memory_space<vmem>>, %arg4: memref<128x384xbf16, #tpu.memory_space<vmem>>, %arg5: memref<1x768xf32, #tpu.memory_space<vmem>>, %arg6: memref<1x128xf32, #tpu.memory_space<vmem>>, %arg7: memref<1x128xf32, #tpu.memory_space<vmem>>, %arg8: memref<8x256xf32, #tpu.memory_space<vmem>>, %arg9: memref<8x8x768xf32, #tpu.memory_space<vmem>>) attributes {dimension_semantics = [], scalar_prefetch = 0 : i64, scratch_operands = 1 : i64, tpu.core_type = #tpu.core_type<tc>} {
    %c0 = arith.constant 0 : index
    %c0_0 = arith.constant 0 : index
    %c0_1 = arith.constant 0 : index
    %0 = vector.load %arg0[%c0, %c0_0, %c0_1] : memref<8x8x128xbf16, #tpu.memory_space<vmem>>, vector<8x8x128xbf16>
    %1 = vector.shape_cast %0 : vector<8x8x128xbf16> to vector<64x128xbf16>
    %c0_2 = arith.constant 0 : index
    %c0_3 = arith.constant 0 : index
    %2 = vector.load %arg2[%c0_2, %c0_3] : memref<128x768xbf16, #tpu.memory_space<vmem>>, vector<128x768xbf16>
    %cst = arith.constant dense<0.000000e+00> : vector<64x768xf32>
    %3 = tpu.matmul %1, %2, %cst {dimension_numbers = #tpu.dot_dimension_numbers<[1], [0], [0], [1], [0, 0, 1, 1], [], []>} : vector<64x128xbf16>, vector<128x768xbf16>, vector<64x768xf32> -> vector<64x768xf32>
    %c0_4 = arith.constant 0 : index
    %c0_5 = arith.constant 0 : index
    %4 = vector.load %arg5[%c0_4, %c0_5] : memref<1x768xf32, #tpu.memory_space<vmem>>, vector<1x768xf32>
    %5 = vector.broadcast %4 : vector<1x768xf32> to vector<64x768xf32>
    %6 = arith.addf %3, %5 : vector<64x768xf32>
    %7 = vector.shape_cast %6 : vector<64x768xf32> to vector<8x8x768xf32>
    %c0_6 = arith.constant 0 : index
    %c0_7 = arith.constant 0 : index
    %c0_8 = arith.constant 0 : index
    %8 = vector.load %arg9[%c0_6, %c0_7, %c0_8] : memref<8x8x768xf32, #tpu.memory_space<vmem>>, vector<8x8x768xf32>
    tpu.vector_store %arg9[%c0_6, %c0_7, %c0_8], %7 {strides = array<i32>} : memref<8x8x768xf32, #tpu.memory_space<vmem>>, vector<8x8x768xf32>,
    %c0_9 = arith.constant 0 : index
    %c0_10 = arith.constant 0 : index
    %9 = vector.load %arg3[%c0_9, %c0_10] : memref<128x384xbf16, #tpu.memory_space<vmem>>, vector<128x384xbf16>
    %c0_11 = arith.constant 0 : index
    %c0_12 = arith.constant 0 : index
    %10 = vector.load %arg4[%c0_11, %c0_12] : memref<128x384xbf16, #tpu.memory_space<vmem>>, vector<128x384xbf16>
    %c0_13 = arith.constant 0 : index
    %c0_14 = arith.constant 0 : index
    %11 = vector.load %arg1[%c0_13, %c0_14] : memref<8x1xi32, #tpu.memory_space<vmem>>, vector<8x1xi32>
    %c0_15 = arith.constant 0 : index
    %c0_16 = arith.constant 0 : index
    %12 = vector.load %arg6[%c0_15, %c0_16] : memref<1x128xf32, #tpu.memory_space<vmem>>, vector<1x128xf32>
    %13 = vector.shape_cast %12 : vector<1x128xf32> to vector<1x128xf32>
    %14 = vector.broadcast %13 : vector<1x128xf32> to vector<8x128xf32>
    %c0_17 = arith.constant 0 : index
    %c0_18 = arith.constant 0 : index
    %15 = vector.load %arg7[%c0_17, %c0_18] : memref<1x128xf32, #tpu.memory_space<vmem>>, vector<1x128xf32>
    %16 = vector.shape_cast %15 : vector<1x128xf32> to vector<1x128xf32>
    %17 = vector.broadcast %16 : vector<1x128xf32> to vector<8x128xf32>
    %cst_19 = arith.constant 0.000000e+00 : f32
    %18 = vector.broadcast %cst_19 : f32 to vector<8x128xf32>
    %c0_i32 = arith.constant 0 : i32
    %c7_i32 = arith.constant 7 : i32
    %19 = arith.subi %c7_i32, %c0_i32 : i32
    %20 = arith.index_cast %c0_i32 : i32 to index
    %c0_20 = arith.constant 0 : index
    %c0_21 = arith.constant 0 : index
    %21 = vector.load %arg9[%20, %c0_20, %c0_21] : memref<8x8x768xf32, #tpu.memory_space<vmem>>, vector<1x8x768xf32>
    %22 = vector.shape_cast %21 : vector<1x8x768xf32> to vector<8x768xf32>
    %23 = arith.index_cast %19 : i32 to index
    %c0_22 = arith.constant 0 : index
    %c0_23 = arith.constant 0 : index
    %24 = vector.load %arg9[%23, %c0_22, %c0_23] : memref<8x8x768xf32, #tpu.memory_space<vmem>>, vector<1x8x768xf32>
    %25 = vector.shape_cast %24 : vector<1x8x768xf32> to vector<8x768xf32>
    %26 = vector.extract_strided_slice %22 {offsets = [0, 0], sizes = [8, 384], strides = [1, 1]} : vector<8x768xf32> to vector<8x384xf32>
    %27 = vector.broadcast %c0_i32 : i32 to vector<8x1xi32>
    %28 = arith.cmpi slt, %27, %11 : vector<8x1xi32>
    %29 = arith.truncf %18 : vector<8x128xf32> to vector<8x128xbf16>
    %cst_24 = arith.constant dense<0.000000e+00> : vector<8x384xf32>
    %30 = tpu.matmul %29, %9, %cst_24 {dimension_numbers = #tpu.dot_dimension_numbers<[1], [0], [0], [1], [0, 0, 1, 1], [], []>} : vector<8x128xbf16>, vector<128x384xbf16>, vector<8x384xf32> -> vector<8x384xf32>
    %31 = vector.extract_strided_slice %26 {offsets = [0, 0], sizes = [8, 128], strides = [1, 1]} : vector<8x384xf32> to vector<8x128xf32>
    %32 = vector.extract_strided_slice %30 {offsets = [0, 0], sizes = [8, 128], strides = [1, 1]} : vector<8x384xf32> to vector<8x128xf32>
    %33 = arith.addf %31, %32 : vector<8x128xf32>
    %34 = arith.negf %33 : vector<8x128xf32>
    %35 = math.exp %34 : vector<8x128xf32>
    %cst_25 = arith.constant 1.000000e+00 : f32
    %36 = vector.broadcast %cst_25 : f32 to vector<8x128xf32>
    %37 = arith.addf %36, %35 : vector<8x128xf32>
    %38 = arith.divf %36, %37 : vector<8x128xf32>
    %39 = vector.extract_strided_slice %26 {offsets = [0, 128], sizes = [8, 128], strides = [1, 1]} : vector<8x384xf32> to vector<8x128xf32>
    %40 = vector.extract_strided_slice %30 {offsets = [0, 128], sizes = [8, 128], strides = [1, 1]} : vector<8x384xf32> to vector<8x128xf32>
    %41 = arith.addf %39, %40 : vector<8x128xf32>
    %42 = arith.negf %41 : vector<8x128xf32>
    %43 = math.exp %42 : vector<8x128xf32>
    %cst_26 = arith.constant 1.000000e+00 : f32
    %44 = vector.broadcast %cst_26 : f32 to vector<8x128xf32>
    %45 = arith.addf %44, %43 : vector<8x128xf32>
    %46 = arith.divf %44, %45 : vector<8x128xf32>
    %47 = vector.extract_strided_slice %26 {offsets = [0, 256], sizes = [8, 128], strides = [1, 1]} : vector<8x384xf32> to vector<8x128xf32>
    %48 = vector.extract_strided_slice %30 {offsets = [0, 256], sizes = [8, 128], strides = [1, 1]} : vector<8x384xf32> to vector<8x128xf32>
    %49 = arith.addf %48, %14 : vector<8x128xf32>
    %50 = arith.mulf %38, %49 : vector<8x128xf32>
    %51 = arith.addf %47, %50 : vector<8x128xf32>
    %52 = math.tanh %51 : vector<8x128xf32>
    %cst_27 = arith.constant 1.000000e+00 : f32
    %53 = vector.broadcast %cst_27 : f32 to vector<8x128xf32>
    %54 = arith.subf %53, %46 : vector<8x128xf32>
    %55 = arith.mulf %54, %52 : vector<8x128xf32>
    %56 = arith.mulf %46, %18 : vector<8x128xf32>
    %57 = arith.addf %55, %56 : vector<8x128xf32>
    %58 = vector.shape_cast %28 : vector<8x1xi1> to vector<8x1xi1>
    %59 = vector.broadcast %58 : vector<8x1xi1> to vector<8x128xi1>
    %60 = arith.select %59, %57, %18 : vector<8x128xi1>, vector<8x128xf32>
    %61 = vector.extract_strided_slice %25 {offsets = [0, 384], sizes = [8, 384], strides = [1, 1]} : vector<8x768xf32> to vector<8x384xf32>
    %62 = vector.broadcast %19 : i32 to vector<8x1xi32>
    %63 = arith.cmpi slt, %62, %11 : vector<8x1xi32>
    %64 = arith.truncf %18 : vector<8x128xf32> to vector<8x128xbf16>
    %cst_28 = arith.constant dense<0.000000e+00> : vector<8x384xf32>
    %65 = tpu.matmul %64, %10, %cst_28 {dimension_numbers = #tpu.dot_dimension_numbers<[1], [0], [0], [1], [0, 0, 1, 1], [], []>} : vector<8x128xbf16>, vector<128x384xbf16>, vector<8x384xf32> -> vector<8x384xf32>
    %66 = vector.extract_strided_slice %61 {offsets = [0, 0], sizes = [8, 128], strides = [1, 1]} : vector<8x384xf32> to vector<8x128xf32>
    %67 = vector.extract_strided_slice %65 {offsets = [0, 0], sizes = [8, 128], strides = [1, 1]} : vector<8x384xf32> to vector<8x128xf32>
    %68 = arith.addf %66, %67 : vector<8x128xf32>
    %69 = arith.negf %68 : vector<8x128xf32>
    %70 = math.exp %69 : vector<8x128xf32>
    %cst_29 = arith.constant 1.000000e+00 : f32
    %71 = vector.broadcast %cst_29 : f32 to vector<8x128xf32>
    %72 = arith.addf %71, %70 : vector<8x128xf32>
    %73 = arith.divf %71, %72 : vector<8x128xf32>
    %74 = vector.extract_strided_slice %61 {offsets = [0, 128], sizes = [8, 128], strides = [1, 1]} : vector<8x384xf32> to vector<8x128xf32>
    %75 = vector.extract_strided_slice %65 {offsets = [0, 128], sizes = [8, 128], strides = [1, 1]} : vector<8x384xf32> to vector<8x128xf32>
    %76 = arith.addf %74, %75 : vector<8x128xf32>
    %77 = arith.negf %76 : vector<8x128xf32>
    %78 = math.exp %77 : vector<8x128xf32>
    %cst_30 = arith.constant 1.000000e+00 : f32
    %79 = vector.broadcast %cst_30 : f32 to vector<8x128xf32>
    %80 = arith.addf %79, %78 : vector<8x128xf32>
    %81 = arith.divf %79, %80 : vector<8x128xf32>
    %82 = vector.extract_strided_slice %61 {offsets = [0, 256], sizes = [8, 128], strides = [1, 1]} : vector<8x384xf32> to vector<8x128xf32>
    %83 = vector.extract_strided_slice %65 {offsets = [0, 256], sizes = [8, 128], strides = [1, 1]} : vector<8x384xf32> to vector<8x128xf32>
    %84 = arith.addf %83, %17 : vector<8x128xf32>
    %85 = arith.mulf %73, %84 : vector<8x128xf32>
    %86 = arith.addf %82, %85 : vector<8x128xf32>
    %87 = math.tanh %86 : vector<8x128xf32>
    %cst_31 = arith.constant 1.000000e+00 : f32
    %88 = vector.broadcast %cst_31 : f32 to vector<8x128xf32>
    %89 = arith.subf %88, %81 : vector<8x128xf32>
    %90 = arith.mulf %89, %87 : vector<8x128xf32>
    %91 = arith.mulf %81, %18 : vector<8x128xf32>
    %92 = arith.addf %90, %91 : vector<8x128xf32>
    %93 = vector.shape_cast %63 : vector<8x1xi1> to vector<8x1xi1>
    %94 = vector.broadcast %93 : vector<8x1xi1> to vector<8x128xi1>
    %95 = arith.select %94, %92, %18 : vector<8x128xi1>, vector<8x128xf32>
    %c1_i32 = arith.constant 1 : i32
    %c7_i32_32 = arith.constant 7 : i32
    %96 = arith.subi %c7_i32_32, %c1_i32 : i32
    %97 = arith.index_cast %c1_i32 : i32 to index
    %c0_33 = arith.constant 0 : index
    %c0_34 = arith.constant 0 : index
    %98 = vector.load %arg9[%97, %c0_33, %c0_34] : memref<8x8x768xf32, #tpu.memory_space<vmem>>, vector<1x8x768xf32>
    %99 = vector.shape_cast %98 : vector<1x8x768xf32> to vector<8x768xf32>
    %100 = arith.index_cast %96 : i32 to index
    %c0_35 = arith.constant 0 : index
    %c0_36 = arith.constant 0 : index
    %101 = vector.load %arg9[%100, %c0_35, %c0_36] : memref<8x8x768xf32, #tpu.memory_space<vmem>>, vector<1x8x768xf32>
    %102 = vector.shape_cast %101 : vector<1x8x768xf32> to vector<8x768xf32>
    %103 = vector.extract_strided_slice %99 {offsets = [0, 0], sizes = [8, 384], strides = [1, 1]} : vector<8x768xf32> to vector<8x384xf32>
    %104 = vector.broadcast %c1_i32 : i32 to vector<8x1xi32>
    %105 = arith.cmpi slt, %104, %11 : vector<8x1xi32>
    %106 = arith.truncf %60 : vector<8x128xf32> to vector<8x128xbf16>
    %cst_37 = arith.constant dense<0.000000e+00> : vector<8x384xf32>
    %107 = tpu.matmul %106, %9, %cst_37 {dimension_numbers = #tpu.dot_dimension_numbers<[1], [0], [0], [1], [0, 0, 1, 1], [], []>} : vector<8x128xbf16>, vector<128x384xbf16>, vector<8x384xf32> -> vector<8x384xf32>
    %108 = vector.extract_strided_slice %103 {offsets = [0, 0], sizes = [8, 128], strides = [1, 1]} : vector<8x384xf32> to vector<8x128xf32>
    %109 = vector.extract_strided_slice %107 {offsets = [0, 0], sizes = [8, 128], strides = [1, 1]} : vector<8x384xf32> to vector<8x128xf32>
    %110 = arith.addf %108, %109 : vector<8x128xf32>
    %111 = arith.negf %110 : vector<8x128xf32>
    %112 = math.exp %111 : vector<8x128xf32>
    %cst_38 = arith.constant 1.000000e+00 : f32
    %113 = vector.broadcast %cst_38 : f32 to vector<8x128xf32>
    %114 = arith.addf %113, %112 : vector<8x128xf32>
    %115 = arith.divf %113, %114 : vector<8x128xf32>
    %116 = vector.extract_strided_slice %103 {offsets = [0, 128], sizes = [8, 128], strides = [1, 1]} : vector<8x384xf32> to vector<8x128xf32>
    %117 = vector.extract_strided_slice %107 {offsets = [0, 128], sizes = [8, 128], strides = [1, 1]} : vector<8x384xf32> to vector<8x128xf32>
    %118 = arith.addf %116, %117 : vector<8x128xf32>
    %119 = arith.negf %118 : vector<8x128xf32>
    %120 = math.exp %119 : vector<8x128xf32>
    %cst_39 = arith.constant 1.000000e+00 : f32
    %121 = vector.broadcast %cst_39 : f32 to vector<8x128xf32>
    %122 = arith.addf %121, %120 : vector<8x128xf32>
    %123 = arith.divf %121, %122 : vector<8x128xf32>
    %124 = vector.extract_strided_slice %103 {offsets = [0, 256], sizes = [8, 128], strides = [1, 1]} : vector<8x384xf32> to vector<8x128xf32>
    %125 = vector.extract_strided_slice %107 {offsets = [0, 256], sizes = [8, 128], strides = [1, 1]} : vector<8x384xf32> to vector<8x128xf32>
    %126 = arith.addf %125, %14 : vector<8x128xf32>
    %127 = arith.mulf %115, %126 : vector<8x128xf32>
    %128 = arith.addf %124, %127 : vector<8x128xf32>
    %129 = math.tanh %128 : vector<8x128xf32>
    %cst_40 = arith.constant 1.000000e+00 : f32
    %130 = vector.broadcast %cst_40 : f32 to vector<8x128xf32>
    %131 = arith.subf %130, %123 : vector<8x128xf32>
    %132 = arith.mulf %131, %129 : vector<8x128xf32>
    %133 = arith.mulf %123, %60 : vector<8x128xf32>
    %134 = arith.addf %132, %133 : vector<8x128xf32>
    %135 = vector.shape_cast %105 : vector<8x1xi1> to vector<8x1xi1>
    %136 = vector.broadcast %135 : vector<8x1xi1> to vector<8x128xi1>
    %137 = arith.select %136, %134, %60 : vector<8x128xi1>, vector<8x128xf32>
    %138 = vector.extract_strided_slice %102 {offsets = [0, 384], sizes = [8, 384], strides = [1, 1]} : vector<8x768xf32> to vector<8x384xf32>
    %139 = vector.broadcast %96 : i32 to vector<8x1xi32>
    %140 = arith.cmpi slt, %139, %11 : vector<8x1xi32>
    %141 = arith.truncf %95 : vector<8x128xf32> to vector<8x128xbf16>
    %cst_41 = arith.constant dense<0.000000e+00> : vector<8x384xf32>
    %142 = tpu.matmul %141, %10, %cst_41 {dimension_numbers = #tpu.dot_dimension_numbers<[1], [0], [0], [1], [0, 0, 1, 1], [], []>} : vector<8x128xbf16>, vector<128x384xbf16>, vector<8x384xf32> -> vector<8x384xf32>
    %143 = vector.extract_strided_slice %138 {offsets = [0, 0], sizes = [8, 128], strides = [1, 1]} : vector<8x384xf32> to vector<8x128xf32>
    %144 = vector.extract_strided_slice %142 {offsets = [0, 0], sizes = [8, 128], strides = [1, 1]} : vector<8x384xf32> to vector<8x128xf32>
    %145 = arith.addf %143, %144 : vector<8x128xf32>
    %146 = arith.negf %145 : vector<8x128xf32>
    %147 = math.exp %146 : vector<8x128xf32>
    %cst_42 = arith.constant 1.000000e+00 : f32
    %148 = vector.broadcast %cst_42 : f32 to vector<8x128xf32>
    %149 = arith.addf %148, %147 : vector<8x128xf32>
    %150 = arith.divf %148, %149 : vector<8x128xf32>
    %151 = vector.extract_strided_slice %138 {offsets = [0, 128], sizes = [8, 128], strides = [1, 1]} : vector<8x384xf32> to vector<8x128xf32>
    %152 = vector.extract_strided_slice %142 {offsets = [0, 128], sizes = [8, 128], strides = [1, 1]} : vector<8x384xf32> to vector<8x128xf32>
    %153 = arith.addf %151, %152 : vector<8x128xf32>
    %154 = arith.negf %153 : vector<8x128xf32>
    %155 = math.exp %154 : vector<8x128xf32>
    %cst_43 = arith.constant 1.000000e+00 : f32
    %156 = vector.broadcast %cst_43 : f32 to vector<8x128xf32>
    %157 = arith.addf %156, %155 : vector<8x128xf32>
    %158 = arith.divf %156, %157 : vector<8x128xf32>
    %159 = vector.extract_strided_slice %138 {offsets = [0, 256], sizes = [8, 128], strides = [1, 1]} : vector<8x384xf32> to vector<8x128xf32>
    %160 = vector.extract_strided_slice %142 {offsets = [0, 256], sizes = [8, 128], strides = [1, 1]} : vector<8x384xf32> to vector<8x128xf32>
    %161 = arith.addf %160, %17 : vector<8x128xf32>
    %162 = arith.mulf %150, %161 : vector<8x128xf32>
    %163 = arith.addf %159, %162 : vector<8x128xf32>
    %164 = math.tanh %163 : vector<8x128xf32>
    %cst_44 = arith.constant 1.000000e+00 : f32
    %165 = vector.broadcast %cst_44 : f32 to vector<8x128xf32>
    %166 = arith.subf %165, %158 : vector<8x128xf32>
    %167 = arith.mulf %166, %164 : vector<8x128xf32>
    %168 = arith.mulf %158, %95 : vector<8x128xf32>
    %169 = arith.addf %167, %168 : vector<8x128xf32>
    %170 = vector.shape_cast %140 : vector<8x1xi1> to vector<8x1xi1>
    %171 = vector.broadcast %170 : vector<8x1xi1> to vector<8x128xi1>
    %172 = arith.select %171, %169, %95 : vector<8x128xi1>, vector<8x128xf32>
    %c2_i32 = arith.constant 2 : i32
    %c7_i32_45 = arith.constant 7 : i32
    %173 = arith.subi %c7_i32_45, %c2_i32 : i32
    %174 = arith.index_cast %c2_i32 : i32 to index
    %c0_46 = arith.constant 0 : index
    %c0_47 = arith.constant 0 : index
    %175 = vector.load %arg9[%174, %c0_46, %c0_47] : memref<8x8x768xf32, #tpu.memory_space<vmem>>, vector<1x8x768xf32>
    %176 = vector.shape_cast %175 : vector<1x8x768xf32> to vector<8x768xf32>
    %177 = arith.index_cast %173 : i32 to index
    %c0_48 = arith.constant 0 : index
    %c0_49 = arith.constant 0 : index
    %178 = vector.load %arg9[%177, %c0_48, %c0_49] : memref<8x8x768xf32, #tpu.memory_space<vmem>>, vector<1x8x768xf32>
    %179 = vector.shape_cast %178 : vector<1x8x768xf32> to vector<8x768xf32>
    %180 = vector.extract_strided_slice %176 {offsets = [0, 0], sizes = [8, 384], strides = [1, 1]} : vector<8x768xf32> to vector<8x384xf32>
    %181 = vector.broadcast %c2_i32 : i32 to vector<8x1xi32>
    %182 = arith.cmpi slt, %181, %11 : vector<8x1xi32>
    %183 = arith.truncf %137 : vector<8x128xf32> to vector<8x128xbf16>
    %cst_50 = arith.constant dense<0.000000e+00> : vector<8x384xf32>
    %184 = tpu.matmul %183, %9, %cst_50 {dimension_numbers = #tpu.dot_dimension_numbers<[1], [0], [0], [1], [0, 0, 1, 1], [], []>} : vector<8x128xbf16>, vector<128x384xbf16>, vector<8x384xf32> -> vector<8x384xf32>
    %185 = vector.extract_strided_slice %180 {offsets = [0, 0], sizes = [8, 128], strides = [1, 1]} : vector<8x384xf32> to vector<8x128xf32>
    %186 = vector.extract_strided_slice %184 {offsets = [0, 0], sizes = [8, 128], strides = [1, 1]} : vector<8x384xf32> to vector<8x128xf32>
    %187 = arith.addf %185, %186 : vector<8x128xf32>
    %188 = arith.negf %187 : vector<8x128xf32>
    %189 = math.exp %188 : vector<8x128xf32>
    %cst_51 = arith.constant 1.000000e+00 : f32
    %190 = vector.broadcast %cst_51 : f32 to vector<8x128xf32>
    %191 = arith.addf %190, %189 : vector<8x128xf32>
    %192 = arith.divf %190, %191 : vector<8x128xf32>
    %193 = vector.extract_strided_slice %180 {offsets = [0, 128], sizes = [8, 128], strides = [1, 1]} : vector<8x384xf32> to vector<8x128xf32>
    %194 = vector.extract_strided_slice %184 {offsets = [0, 128], sizes = [8, 128], strides = [1, 1]} : vector<8x384xf32> to vector<8x128xf32>
    %195 = arith.addf %193, %194 : vector<8x128xf32>
    %196 = arith.negf %195 : vector<8x128xf32>
    %197 = math.exp %196 : vector<8x128xf32>
    %cst_52 = arith.constant 1.000000e+00 : f32
    %198 = vector.broadcast %cst_52 : f32 to vector<8x128xf32>
    %199 = arith.addf %198, %197 : vector<8x128xf32>
    %200 = arith.divf %198, %199 : vector<8x128xf32>
    %201 = vector.extract_strided_slice %180 {offsets = [0, 256], sizes = [8, 128], strides = [1, 1]} : vector<8x384xf32> to vector<8x128xf32>
    %202 = vector.extract_strided_slice %184 {offsets = [0, 256], sizes = [8, 128], strides = [1, 1]} : vector<8x384xf32> to vector<8x128xf32>
    %203 = arith.addf %202, %14 : vector<8x128xf32>
    %204 = arith.mulf %192, %203 : vector<8x128xf32>
    %205 = arith.addf %201, %204 : vector<8x128xf32>
    %206 = math.tanh %205 : vector<8x128xf32>
    %cst_53 = arith.constant 1.000000e+00 : f32
    %207 = vector.broadcast %cst_53 : f32 to vector<8x128xf32>
    %208 = arith.subf %207, %200 : vector<8x128xf32>
    %209 = arith.mulf %208, %206 : vector<8x128xf32>
    %210 = arith.mulf %200, %137 : vector<8x128xf32>
    %211 = arith.addf %209, %210 : vector<8x128xf32>
    %212 = vector.shape_cast %182 : vector<8x1xi1> to vector<8x1xi1>
    %213 = vector.broadcast %212 : vector<8x1xi1> to vector<8x128xi1>
    %214 = arith.select %213, %211, %137 : vector<8x128xi1>, vector<8x128xf32>
    %215 = vector.extract_strided_slice %179 {offsets = [0, 384], sizes = [8, 384], strides = [1, 1]} : vector<8x768xf32> to vector<8x384xf32>
    %216 = vector.broadcast %173 : i32 to vector<8x1xi32>
    %217 = arith.cmpi slt, %216, %11 : vector<8x1xi32>
    %218 = arith.truncf %172 : vector<8x128xf32> to vector<8x128xbf16>
    %cst_54 = arith.constant dense<0.000000e+00> : vector<8x384xf32>
    %219 = tpu.matmul %218, %10, %cst_54 {dimension_numbers = #tpu.dot_dimension_numbers<[1], [0], [0], [1], [0, 0, 1, 1], [], []>} : vector<8x128xbf16>, vector<128x384xbf16>, vector<8x384xf32> -> vector<8x384xf32>
    %220 = vector.extract_strided_slice %215 {offsets = [0, 0], sizes = [8, 128], strides = [1, 1]} : vector<8x384xf32> to vector<8x128xf32>
    %221 = vector.extract_strided_slice %219 {offsets = [0, 0], sizes = [8, 128], strides = [1, 1]} : vector<8x384xf32> to vector<8x128xf32>
    %222 = arith.addf %220, %221 : vector<8x128xf32>
    %223 = arith.negf %222 : vector<8x128xf32>
    %224 = math.exp %223 : vector<8x128xf32>
    %cst_55 = arith.constant 1.000000e+00 : f32
    %225 = vector.broadcast %cst_55 : f32 to vector<8x128xf32>
    %226 = arith.addf %225, %224 : vector<8x128xf32>
    %227 = arith.divf %225, %226 : vector<8x128xf32>
    %228 = vector.extract_strided_slice %215 {offsets = [0, 128], sizes = [8, 128], strides = [1, 1]} : vector<8x384xf32> to vector<8x128xf32>
    %229 = vector.extract_strided_slice %219 {offsets = [0, 128], sizes = [8, 128], strides = [1, 1]} : vector<8x384xf32> to vector<8x128xf32>
    %230 = arith.addf %228, %229 : vector<8x128xf32>
    %231 = arith.negf %230 : vector<8x128xf32>
    %232 = math.exp %231 : vector<8x128xf32>
    %cst_56 = arith.constant 1.000000e+00 : f32
    %233 = vector.broadcast %cst_56 : f32 to vector<8x128xf32>
    %234 = arith.addf %233, %232 : vector<8x128xf32>
    %235 = arith.divf %233, %234 : vector<8x128xf32>
    %236 = vector.extract_strided_slice %215 {offsets = [0, 256], sizes = [8, 128], strides = [1, 1]} : vector<8x384xf32> to vector<8x128xf32>
    %237 = vector.extract_strided_slice %219 {offsets = [0, 256], sizes = [8, 128], strides = [1, 1]} : vector<8x384xf32> to vector<8x128xf32>
    %238 = arith.addf %237, %17 : vector<8x128xf32>
    %239 = arith.mulf %227, %238 : vector<8x128xf32>
    %240 = arith.addf %236, %239 : vector<8x128xf32>
    %241 = math.tanh %240 : vector<8x128xf32>
    %cst_57 = arith.constant 1.000000e+00 : f32
    %242 = vector.broadcast %cst_57 : f32 to vector<8x128xf32>
    %243 = arith.subf %242, %235 : vector<8x128xf32>
    %244 = arith.mulf %243, %241 : vector<8x128xf32>
    %245 = arith.mulf %235, %172 : vector<8x128xf32>
    %246 = arith.addf %244, %245 : vector<8x128xf32>
    %247 = vector.shape_cast %217 : vector<8x1xi1> to vector<8x1xi1>
    %248 = vector.broadcast %247 : vector<8x1xi1> to vector<8x128xi1>
    %249 = arith.select %248, %246, %172 : vector<8x128xi1>, vector<8x128xf32>
    %c3_i32 = arith.constant 3 : i32
    %c7_i32_58 = arith.constant 7 : i32
    %250 = arith.subi %c7_i32_58, %c3_i32 : i32
    %251 = arith.index_cast %c3_i32 : i32 to index
    %c0_59 = arith.constant 0 : index
    %c0_60 = arith.constant 0 : index
    %252 = vector.load %arg9[%251, %c0_59, %c0_60] : memref<8x8x768xf32, #tpu.memory_space<vmem>>, vector<1x8x768xf32>
    %253 = vector.shape_cast %252 : vector<1x8x768xf32> to vector<8x768xf32>
    %254 = arith.index_cast %250 : i32 to index
    %c0_61 = arith.constant 0 : index
    %c0_62 = arith.constant 0 : index
    %255 = vector.load %arg9[%254, %c0_61, %c0_62] : memref<8x8x768xf32, #tpu.memory_space<vmem>>, vector<1x8x768xf32>
    %256 = vector.shape_cast %255 : vector<1x8x768xf32> to vector<8x768xf32>
    %257 = vector.extract_strided_slice %253 {offsets = [0, 0], sizes = [8, 384], strides = [1, 1]} : vector<8x768xf32> to vector<8x384xf32>
    %258 = vector.broadcast %c3_i32 : i32 to vector<8x1xi32>
    %259 = arith.cmpi slt, %258, %11 : vector<8x1xi32>
    %260 = arith.truncf %214 : vector<8x128xf32> to vector<8x128xbf16>
    %cst_63 = arith.constant dense<0.000000e+00> : vector<8x384xf32>
    %261 = tpu.matmul %260, %9, %cst_63 {dimension_numbers = #tpu.dot_dimension_numbers<[1], [0], [0], [1], [0, 0, 1, 1], [], []>} : vector<8x128xbf16>, vector<128x384xbf16>, vector<8x384xf32> -> vector<8x384xf32>
    %262 = vector.extract_strided_slice %257 {offsets = [0, 0], sizes = [8, 128], strides = [1, 1]} : vector<8x384xf32> to vector<8x128xf32>
    %263 = vector.extract_strided_slice %261 {offsets = [0, 0], sizes = [8, 128], strides = [1, 1]} : vector<8x384xf32> to vector<8x128xf32>
    %264 = arith.addf %262, %263 : vector<8x128xf32>
    %265 = arith.negf %264 : vector<8x128xf32>
    %266 = math.exp %265 : vector<8x128xf32>
    %cst_64 = arith.constant 1.000000e+00 : f32
    %267 = vector.broadcast %cst_64 : f32 to vector<8x128xf32>
    %268 = arith.addf %267, %266 : vector<8x128xf32>
    %269 = arith.divf %267, %268 : vector<8x128xf32>
    %270 = vector.extract_strided_slice %257 {offsets = [0, 128], sizes = [8, 128], strides = [1, 1]} : vector<8x384xf32> to vector<8x128xf32>
    %271 = vector.extract_strided_slice %261 {offsets = [0, 128], sizes = [8, 128], strides = [1, 1]} : vector<8x384xf32> to vector<8x128xf32>
    %272 = arith.addf %270, %271 : vector<8x128xf32>
    %273 = arith.negf %272 : vector<8x128xf32>
    %274 = math.exp %273 : vector<8x128xf32>
    %cst_65 = arith.constant 1.000000e+00 : f32
    %275 = vector.broadcast %cst_65 : f32 to vector<8x128xf32>
    %276 = arith.addf %275, %274 : vector<8x128xf32>
    %277 = arith.divf %275, %276 : vector<8x128xf32>
    %278 = vector.extract_strided_slice %257 {offsets = [0, 256], sizes = [8, 128], strides = [1, 1]} : vector<8x384xf32> to vector<8x128xf32>
    %279 = vector.extract_strided_slice %261 {offsets = [0, 256], sizes = [8, 128], strides = [1, 1]} : vector<8x384xf32> to vector<8x128xf32>
    %280 = arith.addf %279, %14 : vector<8x128xf32>
    %281 = arith.mulf %269, %280 : vector<8x128xf32>
    %282 = arith.addf %278, %281 : vector<8x128xf32>
    %283 = math.tanh %282 : vector<8x128xf32>
    %cst_66 = arith.constant 1.000000e+00 : f32
    %284 = vector.broadcast %cst_66 : f32 to vector<8x128xf32>
    %285 = arith.subf %284, %277 : vector<8x128xf32>
    %286 = arith.mulf %285, %283 : vector<8x128xf32>
    %287 = arith.mulf %277, %214 : vector<8x128xf32>
    %288 = arith.addf %286, %287 : vector<8x128xf32>
    %289 = vector.shape_cast %259 : vector<8x1xi1> to vector<8x1xi1>
    %290 = vector.broadcast %289 : vector<8x1xi1> to vector<8x128xi1>
    %291 = arith.select %290, %288, %214 : vector<8x128xi1>, vector<8x128xf32>
    %292 = vector.extract_strided_slice %256 {offsets = [0, 384], sizes = [8, 384], strides = [1, 1]} : vector<8x768xf32> to vector<8x384xf32>
    %293 = vector.broadcast %250 : i32 to vector<8x1xi32>
    %294 = arith.cmpi slt, %293, %11 : vector<8x1xi32>
    %295 = arith.truncf %249 : vector<8x128xf32> to vector<8x128xbf16>
    %cst_67 = arith.constant dense<0.000000e+00> : vector<8x384xf32>
    %296 = tpu.matmul %295, %10, %cst_67 {dimension_numbers = #tpu.dot_dimension_numbers<[1], [0], [0], [1], [0, 0, 1, 1], [], []>} : vector<8x128xbf16>, vector<128x384xbf16>, vector<8x384xf32> -> vector<8x384xf32>
    %297 = vector.extract_strided_slice %292 {offsets = [0, 0], sizes = [8, 128], strides = [1, 1]} : vector<8x384xf32> to vector<8x128xf32>
    %298 = vector.extract_strided_slice %296 {offsets = [0, 0], sizes = [8, 128], strides = [1, 1]} : vector<8x384xf32> to vector<8x128xf32>
    %299 = arith.addf %297, %298 : vector<8x128xf32>
    %300 = arith.negf %299 : vector<8x128xf32>
    %301 = math.exp %300 : vector<8x128xf32>
    %cst_68 = arith.constant 1.000000e+00 : f32
    %302 = vector.broadcast %cst_68 : f32 to vector<8x128xf32>
    %303 = arith.addf %302, %301 : vector<8x128xf32>
    %304 = arith.divf %302, %303 : vector<8x128xf32>
    %305 = vector.extract_strided_slice %292 {offsets = [0, 128], sizes = [8, 128], strides = [1, 1]} : vector<8x384xf32> to vector<8x128xf32>
    %306 = vector.extract_strided_slice %296 {offsets = [0, 128], sizes = [8, 128], strides = [1, 1]} : vector<8x384xf32> to vector<8x128xf32>
    %307 = arith.addf %305, %306 : vector<8x128xf32>
    %308 = arith.negf %307 : vector<8x128xf32>
    %309 = math.exp %308 : vector<8x128xf32>
    %cst_69 = arith.constant 1.000000e+00 : f32
    %310 = vector.broadcast %cst_69 : f32 to vector<8x128xf32>
    %311 = arith.addf %310, %309 : vector<8x128xf32>
    %312 = arith.divf %310, %311 : vector<8x128xf32>
    %313 = vector.extract_strided_slice %292 {offsets = [0, 256], sizes = [8, 128], strides = [1, 1]} : vector<8x384xf32> to vector<8x128xf32>
    %314 = vector.extract_strided_slice %296 {offsets = [0, 256], sizes = [8, 128], strides = [1, 1]} : vector<8x384xf32> to vector<8x128xf32>
    %315 = arith.addf %314, %17 : vector<8x128xf32>
    %316 = arith.mulf %304, %315 : vector<8x128xf32>
    %317 = arith.addf %313, %316 : vector<8x128xf32>
    %318 = math.tanh %317 : vector<8x128xf32>
    %cst_70 = arith.constant 1.000000e+00 : f32
    %319 = vector.broadcast %cst_70 : f32 to vector<8x128xf32>
    %320 = arith.subf %319, %312 : vector<8x128xf32>
    %321 = arith.mulf %320, %318 : vector<8x128xf32>
    %322 = arith.mulf %312, %249 : vector<8x128xf32>
    %323 = arith.addf %321, %322 : vector<8x128xf32>
    %324 = vector.shape_cast %294 : vector<8x1xi1> to vector<8x1xi1>
    %325 = vector.broadcast %324 : vector<8x1xi1> to vector<8x128xi1>
    %326 = arith.select %325, %323, %249 : vector<8x128xi1>, vector<8x128xf32>
    %c4_i32 = arith.constant 4 : i32
    %c7_i32_71 = arith.constant 7 : i32
    %327 = arith.subi %c7_i32_71, %c4_i32 : i32
    %328 = arith.index_cast %c4_i32 : i32 to index
    %c0_72 = arith.constant 0 : index
    %c0_73 = arith.constant 0 : index
    %329 = vector.load %arg9[%328, %c0_72, %c0_73] : memref<8x8x768xf32, #tpu.memory_space<vmem>>, vector<1x8x768xf32>
    %330 = vector.shape_cast %329 : vector<1x8x768xf32> to vector<8x768xf32>
    %331 = arith.index_cast %327 : i32 to index
    %c0_74 = arith.constant 0 : index
    %c0_75 = arith.constant 0 : index
    %332 = vector.load %arg9[%331, %c0_74, %c0_75] : memref<8x8x768xf32, #tpu.memory_space<vmem>>, vector<1x8x768xf32>
    %333 = vector.shape_cast %332 : vector<1x8x768xf32> to vector<8x768xf32>
    %334 = vector.extract_strided_slice %330 {offsets = [0, 0], sizes = [8, 384], strides = [1, 1]} : vector<8x768xf32> to vector<8x384xf32>
    %335 = vector.broadcast %c4_i32 : i32 to vector<8x1xi32>
    %336 = arith.cmpi slt, %335, %11 : vector<8x1xi32>
    %337 = arith.truncf %291 : vector<8x128xf32> to vector<8x128xbf16>
    %cst_76 = arith.constant dense<0.000000e+00> : vector<8x384xf32>
    %338 = tpu.matmul %337, %9, %cst_76 {dimension_numbers = #tpu.dot_dimension_numbers<[1], [0], [0], [1], [0, 0, 1, 1], [], []>} : vector<8x128xbf16>, vector<128x384xbf16>, vector<8x384xf32> -> vector<8x384xf32>
    %339 = vector.extract_strided_slice %334 {offsets = [0, 0], sizes = [8, 128], strides = [1, 1]} : vector<8x384xf32> to vector<8x128xf32>
    %340 = vector.extract_strided_slice %338 {offsets = [0, 0], sizes = [8, 128], strides = [1, 1]} : vector<8x384xf32> to vector<8x128xf32>
    %341 = arith.addf %339, %340 : vector<8x128xf32>
    %342 = arith.negf %341 : vector<8x128xf32>
    %343 = math.exp %342 : vector<8x128xf32>
    %cst_77 = arith.constant 1.000000e+00 : f32
    %344 = vector.broadcast %cst_77 : f32 to vector<8x128xf32>
    %345 = arith.addf %344, %343 : vector<8x128xf32>
    %346 = arith.divf %344, %345 : vector<8x128xf32>
    %347 = vector.extract_strided_slice %334 {offsets = [0, 128], sizes = [8, 128], strides = [1, 1]} : vector<8x384xf32> to vector<8x128xf32>
    %348 = vector.extract_strided_slice %338 {offsets = [0, 128], sizes = [8, 128], strides = [1, 1]} : vector<8x384xf32> to vector<8x128xf32>
    %349 = arith.addf %347, %348 : vector<8x128xf32>
    %350 = arith.negf %349 : vector<8x128xf32>
    %351 = math.exp %350 : vector<8x128xf32>
    %cst_78 = arith.constant 1.000000e+00 : f32
    %352 = vector.broadcast %cst_78 : f32 to vector<8x128xf32>
    %353 = arith.addf %352, %351 : vector<8x128xf32>
    %354 = arith.divf %352, %353 : vector<8x128xf32>
    %355 = vector.extract_strided_slice %334 {offsets = [0, 256], sizes = [8, 128], strides = [1, 1]} : vector<8x384xf32> to vector<8x128xf32>
    %356 = vector.extract_strided_slice %338 {offsets = [0, 256], sizes = [8, 128], strides = [1, 1]} : vector<8x384xf32> to vector<8x128xf32>
    %357 = arith.addf %356, %14 : vector<8x128xf32>
    %358 = arith.mulf %346, %357 : vector<8x128xf32>
    %359 = arith.addf %355, %358 : vector<8x128xf32>
    %360 = math.tanh %359 : vector<8x128xf32>
    %cst_79 = arith.constant 1.000000e+00 : f32
    %361 = vector.broadcast %cst_79 : f32 to vector<8x128xf32>
    %362 = arith.subf %361, %354 : vector<8x128xf32>
    %363 = arith.mulf %362, %360 : vector<8x128xf32>
    %364 = arith.mulf %354, %291 : vector<8x128xf32>
    %365 = arith.addf %363, %364 : vector<8x128xf32>
    %366 = vector.shape_cast %336 : vector<8x1xi1> to vector<8x1xi1>
    %367 = vector.broadcast %366 : vector<8x1xi1> to vector<8x128xi1>
    %368 = arith.select %367, %365, %291 : vector<8x128xi1>, vector<8x128xf32>
    %369 = vector.extract_strided_slice %333 {offsets = [0, 384], sizes = [8, 384], strides = [1, 1]} : vector<8x768xf32> to vector<8x384xf32>
    %370 = vector.broadcast %327 : i32 to vector<8x1xi32>
    %371 = arith.cmpi slt, %370, %11 : vector<8x1xi32>
    %372 = arith.truncf %326 : vector<8x128xf32> to vector<8x128xbf16>
    %cst_80 = arith.constant dense<0.000000e+00> : vector<8x384xf32>
    %373 = tpu.matmul %372, %10, %cst_80 {dimension_numbers = #tpu.dot_dimension_numbers<[1], [0], [0], [1], [0, 0, 1, 1], [], []>} : vector<8x128xbf16>, vector<128x384xbf16>, vector<8x384xf32> -> vector<8x384xf32>
    %374 = vector.extract_strided_slice %369 {offsets = [0, 0], sizes = [8, 128], strides = [1, 1]} : vector<8x384xf32> to vector<8x128xf32>
    %375 = vector.extract_strided_slice %373 {offsets = [0, 0], sizes = [8, 128], strides = [1, 1]} : vector<8x384xf32> to vector<8x128xf32>
    %376 = arith.addf %374, %375 : vector<8x128xf32>
    %377 = arith.negf %376 : vector<8x128xf32>
    %378 = math.exp %377 : vector<8x128xf32>
    %cst_81 = arith.constant 1.000000e+00 : f32
    %379 = vector.broadcast %cst_81 : f32 to vector<8x128xf32>
    %380 = arith.addf %379, %378 : vector<8x128xf32>
    %381 = arith.divf %379, %380 : vector<8x128xf32>
    %382 = vector.extract_strided_slice %369 {offsets = [0, 128], sizes = [8, 128], strides = [1, 1]} : vector<8x384xf32> to vector<8x128xf32>
    %383 = vector.extract_strided_slice %373 {offsets = [0, 128], sizes = [8, 128], strides = [1, 1]} : vector<8x384xf32> to vector<8x128xf32>
    %384 = arith.addf %382, %383 : vector<8x128xf32>
    %385 = arith.negf %384 : vector<8x128xf32>
    %386 = math.exp %385 : vector<8x128xf32>
    %cst_82 = arith.constant 1.000000e+00 : f32
    %387 = vector.broadcast %cst_82 : f32 to vector<8x128xf32>
    %388 = arith.addf %387, %386 : vector<8x128xf32>
    %389 = arith.divf %387, %388 : vector<8x128xf32>
    %390 = vector.extract_strided_slice %369 {offsets = [0, 256], sizes = [8, 128], strides = [1, 1]} : vector<8x384xf32> to vector<8x128xf32>
    %391 = vector.extract_strided_slice %373 {offsets = [0, 256], sizes = [8, 128], strides = [1, 1]} : vector<8x384xf32> to vector<8x128xf32>
    %392 = arith.addf %391, %17 : vector<8x128xf32>
    %393 = arith.mulf %381, %392 : vector<8x128xf32>
    %394 = arith.addf %390, %393 : vector<8x128xf32>
    %395 = math.tanh %394 : vector<8x128xf32>
    %cst_83 = arith.constant 1.000000e+00 : f32
    %396 = vector.broadcast %cst_83 : f32 to vector<8x128xf32>
    %397 = arith.subf %396, %389 : vector<8x128xf32>
    %398 = arith.mulf %397, %395 : vector<8x128xf32>
    %399 = arith.mulf %389, %326 : vector<8x128xf32>
    %400 = arith.addf %398, %399 : vector<8x128xf32>
    %401 = vector.shape_cast %371 : vector<8x1xi1> to vector<8x1xi1>
    %402 = vector.broadcast %401 : vector<8x1xi1> to vector<8x128xi1>
    %403 = arith.select %402, %400, %326 : vector<8x128xi1>, vector<8x128xf32>
    %c5_i32 = arith.constant 5 : i32
    %c7_i32_84 = arith.constant 7 : i32
    %404 = arith.subi %c7_i32_84, %c5_i32 : i32
    %405 = arith.index_cast %c5_i32 : i32 to index
    %c0_85 = arith.constant 0 : index
    %c0_86 = arith.constant 0 : index
    %406 = vector.load %arg9[%405, %c0_85, %c0_86] : memref<8x8x768xf32, #tpu.memory_space<vmem>>, vector<1x8x768xf32>
    %407 = vector.shape_cast %406 : vector<1x8x768xf32> to vector<8x768xf32>
    %408 = arith.index_cast %404 : i32 to index
    %c0_87 = arith.constant 0 : index
    %c0_88 = arith.constant 0 : index
    %409 = vector.load %arg9[%408, %c0_87, %c0_88] : memref<8x8x768xf32, #tpu.memory_space<vmem>>, vector<1x8x768xf32>
    %410 = vector.shape_cast %409 : vector<1x8x768xf32> to vector<8x768xf32>
    %411 = vector.extract_strided_slice %407 {offsets = [0, 0], sizes = [8, 384], strides = [1, 1]} : vector<8x768xf32> to vector<8x384xf32>
    %412 = vector.broadcast %c5_i32 : i32 to vector<8x1xi32>
    %413 = arith.cmpi slt, %412, %11 : vector<8x1xi32>
    %414 = arith.truncf %368 : vector<8x128xf32> to vector<8x128xbf16>
    %cst_89 = arith.constant dense<0.000000e+00> : vector<8x384xf32>
    %415 = tpu.matmul %414, %9, %cst_89 {dimension_numbers = #tpu.dot_dimension_numbers<[1], [0], [0], [1], [0, 0, 1, 1], [], []>} : vector<8x128xbf16>, vector<128x384xbf16>, vector<8x384xf32> -> vector<8x384xf32>
    %416 = vector.extract_strided_slice %411 {offsets = [0, 0], sizes = [8, 128], strides = [1, 1]} : vector<8x384xf32> to vector<8x128xf32>
    %417 = vector.extract_strided_slice %415 {offsets = [0, 0], sizes = [8, 128], strides = [1, 1]} : vector<8x384xf32> to vector<8x128xf32>
    %418 = arith.addf %416, %417 : vector<8x128xf32>
    %419 = arith.negf %418 : vector<8x128xf32>
    %420 = math.exp %419 : vector<8x128xf32>
    %cst_90 = arith.constant 1.000000e+00 : f32
    %421 = vector.broadcast %cst_90 : f32 to vector<8x128xf32>
    %422 = arith.addf %421, %420 : vector<8x128xf32>
    %423 = arith.divf %421, %422 : vector<8x128xf32>
    %424 = vector.extract_strided_slice %411 {offsets = [0, 128], sizes = [8, 128], strides = [1, 1]} : vector<8x384xf32> to vector<8x128xf32>
    %425 = vector.extract_strided_slice %415 {offsets = [0, 128], sizes = [8, 128], strides = [1, 1]} : vector<8x384xf32> to vector<8x128xf32>
    %426 = arith.addf %424, %425 : vector<8x128xf32>
    %427 = arith.negf %426 : vector<8x128xf32>
    %428 = math.exp %427 : vector<8x128xf32>
    %cst_91 = arith.constant 1.000000e+00 : f32
    %429 = vector.broadcast %cst_91 : f32 to vector<8x128xf32>
    %430 = arith.addf %429, %428 : vector<8x128xf32>
    %431 = arith.divf %429, %430 : vector<8x128xf32>
    %432 = vector.extract_strided_slice %411 {offsets = [0, 256], sizes = [8, 128], strides = [1, 1]} : vector<8x384xf32> to vector<8x128xf32>
    %433 = vector.extract_strided_slice %415 {offsets = [0, 256], sizes = [8, 128], strides = [1, 1]} : vector<8x384xf32> to vector<8x128xf32>
    %434 = arith.addf %433, %14 : vector<8x128xf32>
    %435 = arith.mulf %423, %434 : vector<8x128xf32>
    %436 = arith.addf %432, %435 : vector<8x128xf32>
    %437 = math.tanh %436 : vector<8x128xf32>
    %cst_92 = arith.constant 1.000000e+00 : f32
    %438 = vector.broadcast %cst_92 : f32 to vector<8x128xf32>
    %439 = arith.subf %438, %431 : vector<8x128xf32>
    %440 = arith.mulf %439, %437 : vector<8x128xf32>
    %441 = arith.mulf %431, %368 : vector<8x128xf32>
    %442 = arith.addf %440, %441 : vector<8x128xf32>
    %443 = vector.shape_cast %413 : vector<8x1xi1> to vector<8x1xi1>
    %444 = vector.broadcast %443 : vector<8x1xi1> to vector<8x128xi1>
    %445 = arith.select %444, %442, %368 : vector<8x128xi1>, vector<8x128xf32>
    %446 = vector.extract_strided_slice %410 {offsets = [0, 384], sizes = [8, 384], strides = [1, 1]} : vector<8x768xf32> to vector<8x384xf32>
    %447 = vector.broadcast %404 : i32 to vector<8x1xi32>
    %448 = arith.cmpi slt, %447, %11 : vector<8x1xi32>
    %449 = arith.truncf %403 : vector<8x128xf32> to vector<8x128xbf16>
    %cst_93 = arith.constant dense<0.000000e+00> : vector<8x384xf32>
    %450 = tpu.matmul %449, %10, %cst_93 {dimension_numbers = #tpu.dot_dimension_numbers<[1], [0], [0], [1], [0, 0, 1, 1], [], []>} : vector<8x128xbf16>, vector<128x384xbf16>, vector<8x384xf32> -> vector<8x384xf32>
    %451 = vector.extract_strided_slice %446 {offsets = [0, 0], sizes = [8, 128], strides = [1, 1]} : vector<8x384xf32> to vector<8x128xf32>
    %452 = vector.extract_strided_slice %450 {offsets = [0, 0], sizes = [8, 128], strides = [1, 1]} : vector<8x384xf32> to vector<8x128xf32>
    %453 = arith.addf %451, %452 : vector<8x128xf32>
    %454 = arith.negf %453 : vector<8x128xf32>
    %455 = math.exp %454 : vector<8x128xf32>
    %cst_94 = arith.constant 1.000000e+00 : f32
    %456 = vector.broadcast %cst_94 : f32 to vector<8x128xf32>
    %457 = arith.addf %456, %455 : vector<8x128xf32>
    %458 = arith.divf %456, %457 : vector<8x128xf32>
    %459 = vector.extract_strided_slice %446 {offsets = [0, 128], sizes = [8, 128], strides = [1, 1]} : vector<8x384xf32> to vector<8x128xf32>
    %460 = vector.extract_strided_slice %450 {offsets = [0, 128], sizes = [8, 128], strides = [1, 1]} : vector<8x384xf32> to vector<8x128xf32>
    %461 = arith.addf %459, %460 : vector<8x128xf32>
    %462 = arith.negf %461 : vector<8x128xf32>
    %463 = math.exp %462 : vector<8x128xf32>
    %cst_95 = arith.constant 1.000000e+00 : f32
    %464 = vector.broadcast %cst_95 : f32 to vector<8x128xf32>
    %465 = arith.addf %464, %463 : vector<8x128xf32>
    %466 = arith.divf %464, %465 : vector<8x128xf32>
    %467 = vector.extract_strided_slice %446 {offsets = [0, 256], sizes = [8, 128], strides = [1, 1]} : vector<8x384xf32> to vector<8x128xf32>
    %468 = vector.extract_strided_slice %450 {offsets = [0, 256], sizes = [8, 128], strides = [1, 1]} : vector<8x384xf32> to vector<8x128xf32>
    %469 = arith.addf %468, %17 : vector<8x128xf32>
    %470 = arith.mulf %458, %469 : vector<8x128xf32>
    %471 = arith.addf %467, %470 : vector<8x128xf32>
    %472 = math.tanh %471 : vector<8x128xf32>
    %cst_96 = arith.constant 1.000000e+00 : f32
    %473 = vector.broadcast %cst_96 : f32 to vector<8x128xf32>
    %474 = arith.subf %473, %466 : vector<8x128xf32>
    %475 = arith.mulf %474, %472 : vector<8x128xf32>
    %476 = arith.mulf %466, %403 : vector<8x128xf32>
    %477 = arith.addf %475, %476 : vector<8x128xf32>
    %478 = vector.shape_cast %448 : vector<8x1xi1> to vector<8x1xi1>
    %479 = vector.broadcast %478 : vector<8x1xi1> to vector<8x128xi1>
    %480 = arith.select %479, %477, %403 : vector<8x128xi1>, vector<8x128xf32>
    %c6_i32 = arith.constant 6 : i32
    %c7_i32_97 = arith.constant 7 : i32
    %481 = arith.subi %c7_i32_97, %c6_i32 : i32
    %482 = arith.index_cast %c6_i32 : i32 to index
    %c0_98 = arith.constant 0 : index
    %c0_99 = arith.constant 0 : index
    %483 = vector.load %arg9[%482, %c0_98, %c0_99] : memref<8x8x768xf32, #tpu.memory_space<vmem>>, vector<1x8x768xf32>
    %484 = vector.shape_cast %483 : vector<1x8x768xf32> to vector<8x768xf32>
    %485 = arith.index_cast %481 : i32 to index
    %c0_100 = arith.constant 0 : index
    %c0_101 = arith.constant 0 : index
    %486 = vector.load %arg9[%485, %c0_100, %c0_101] : memref<8x8x768xf32, #tpu.memory_space<vmem>>, vector<1x8x768xf32>
    %487 = vector.shape_cast %486 : vector<1x8x768xf32> to vector<8x768xf32>
    %488 = vector.extract_strided_slice %484 {offsets = [0, 0], sizes = [8, 384], strides = [1, 1]} : vector<8x768xf32> to vector<8x384xf32>
    %489 = vector.broadcast %c6_i32 : i32 to vector<8x1xi32>
    %490 = arith.cmpi slt, %489, %11 : vector<8x1xi32>
    %491 = arith.truncf %445 : vector<8x128xf32> to vector<8x128xbf16>
    %cst_102 = arith.constant dense<0.000000e+00> : vector<8x384xf32>
    %492 = tpu.matmul %491, %9, %cst_102 {dimension_numbers = #tpu.dot_dimension_numbers<[1], [0], [0], [1], [0, 0, 1, 1], [], []>} : vector<8x128xbf16>, vector<128x384xbf16>, vector<8x384xf32> -> vector<8x384xf32>
    %493 = vector.extract_strided_slice %488 {offsets = [0, 0], sizes = [8, 128], strides = [1, 1]} : vector<8x384xf32> to vector<8x128xf32>
    %494 = vector.extract_strided_slice %492 {offsets = [0, 0], sizes = [8, 128], strides = [1, 1]} : vector<8x384xf32> to vector<8x128xf32>
    %495 = arith.addf %493, %494 : vector<8x128xf32>
    %496 = arith.negf %495 : vector<8x128xf32>
    %497 = math.exp %496 : vector<8x128xf32>
    %cst_103 = arith.constant 1.000000e+00 : f32
    %498 = vector.broadcast %cst_103 : f32 to vector<8x128xf32>
    %499 = arith.addf %498, %497 : vector<8x128xf32>
    %500 = arith.divf %498, %499 : vector<8x128xf32>
    %501 = vector.extract_strided_slice %488 {offsets = [0, 128], sizes = [8, 128], strides = [1, 1]} : vector<8x384xf32> to vector<8x128xf32>
    %502 = vector.extract_strided_slice %492 {offsets = [0, 128], sizes = [8, 128], strides = [1, 1]} : vector<8x384xf32> to vector<8x128xf32>
    %503 = arith.addf %501, %502 : vector<8x128xf32>
    %504 = arith.negf %503 : vector<8x128xf32>
    %505 = math.exp %504 : vector<8x128xf32>
    %cst_104 = arith.constant 1.000000e+00 : f32
    %506 = vector.broadcast %cst_104 : f32 to vector<8x128xf32>
    %507 = arith.addf %506, %505 : vector<8x128xf32>
    %508 = arith.divf %506, %507 : vector<8x128xf32>
    %509 = vector.extract_strided_slice %488 {offsets = [0, 256], sizes = [8, 128], strides = [1, 1]} : vector<8x384xf32> to vector<8x128xf32>
    %510 = vector.extract_strided_slice %492 {offsets = [0, 256], sizes = [8, 128], strides = [1, 1]} : vector<8x384xf32> to vector<8x128xf32>
    %511 = arith.addf %510, %14 : vector<8x128xf32>
    %512 = arith.mulf %500, %511 : vector<8x128xf32>
    %513 = arith.addf %509, %512 : vector<8x128xf32>
    %514 = math.tanh %513 : vector<8x128xf32>
    %cst_105 = arith.constant 1.000000e+00 : f32
    %515 = vector.broadcast %cst_105 : f32 to vector<8x128xf32>
    %516 = arith.subf %515, %508 : vector<8x128xf32>
    %517 = arith.mulf %516, %514 : vector<8x128xf32>
    %518 = arith.mulf %508, %445 : vector<8x128xf32>
    %519 = arith.addf %517, %518 : vector<8x128xf32>
    %520 = vector.shape_cast %490 : vector<8x1xi1> to vector<8x1xi1>
    %521 = vector.broadcast %520 : vector<8x1xi1> to vector<8x128xi1>
    %522 = arith.select %521, %519, %445 : vector<8x128xi1>, vector<8x128xf32>
    %523 = vector.extract_strided_slice %487 {offsets = [0, 384], sizes = [8, 384], strides = [1, 1]} : vector<8x768xf32> to vector<8x384xf32>
    %524 = vector.broadcast %481 : i32 to vector<8x1xi32>
    %525 = arith.cmpi slt, %524, %11 : vector<8x1xi32>
    %526 = arith.truncf %480 : vector<8x128xf32> to vector<8x128xbf16>
    %cst_106 = arith.constant dense<0.000000e+00> : vector<8x384xf32>
    %527 = tpu.matmul %526, %10, %cst_106 {dimension_numbers = #tpu.dot_dimension_numbers<[1], [0], [0], [1], [0, 0, 1, 1], [], []>} : vector<8x128xbf16>, vector<128x384xbf16>, vector<8x384xf32> -> vector<8x384xf32>
    %528 = vector.extract_strided_slice %523 {offsets = [0, 0], sizes = [8, 128], strides = [1, 1]} : vector<8x384xf32> to vector<8x128xf32>
    %529 = vector.extract_strided_slice %527 {offsets = [0, 0], sizes = [8, 128], strides = [1, 1]} : vector<8x384xf32> to vector<8x128xf32>
    %530 = arith.addf %528, %529 : vector<8x128xf32>
    %531 = arith.negf %530 : vector<8x128xf32>
    %532 = math.exp %531 : vector<8x128xf32>
    %cst_107 = arith.constant 1.000000e+00 : f32
    %533 = vector.broadcast %cst_107 : f32 to vector<8x128xf32>
    %534 = arith.addf %533, %532 : vector<8x128xf32>
    %535 = arith.divf %533, %534 : vector<8x128xf32>
    %536 = vector.extract_strided_slice %523 {offsets = [0, 128], sizes = [8, 128], strides = [1, 1]} : vector<8x384xf32> to vector<8x128xf32>
    %537 = vector.extract_strided_slice %527 {offsets = [0, 128], sizes = [8, 128], strides = [1, 1]} : vector<8x384xf32> to vector<8x128xf32>
    %538 = arith.addf %536, %537 : vector<8x128xf32>
    %539 = arith.negf %538 : vector<8x128xf32>
    %540 = math.exp %539 : vector<8x128xf32>
    %cst_108 = arith.constant 1.000000e+00 : f32
    %541 = vector.broadcast %cst_108 : f32 to vector<8x128xf32>
    %542 = arith.addf %541, %540 : vector<8x128xf32>
    %543 = arith.divf %541, %542 : vector<8x128xf32>
    %544 = vector.extract_strided_slice %523 {offsets = [0, 256], sizes = [8, 128], strides = [1, 1]} : vector<8x384xf32> to vector<8x128xf32>
    %545 = vector.extract_strided_slice %527 {offsets = [0, 256], sizes = [8, 128], strides = [1, 1]} : vector<8x384xf32> to vector<8x128xf32>
    %546 = arith.addf %545, %17 : vector<8x128xf32>
    %547 = arith.mulf %535, %546 : vector<8x128xf32>
    %548 = arith.addf %544, %547 : vector<8x128xf32>
    %549 = math.tanh %548 : vector<8x128xf32>
    %cst_109 = arith.constant 1.000000e+00 : f32
    %550 = vector.broadcast %cst_109 : f32 to vector<8x128xf32>
    %551 = arith.subf %550, %543 : vector<8x128xf32>
    %552 = arith.mulf %551, %549 : vector<8x128xf32>
    %553 = arith.mulf %543, %480 : vector<8x128xf32>
    %554 = arith.addf %552, %553 : vector<8x128xf32>
    %555 = vector.shape_cast %525 : vector<8x1xi1> to vector<8x1xi1>
    %556 = vector.broadcast %555 : vector<8x1xi1> to vector<8x128xi1>
    %557 = arith.select %556, %554, %480 : vector<8x128xi1>, vector<8x128xf32>
    %c7_i32_110 = arith.constant 7 : i32
    %c7_i32_111 = arith.constant 7 : i32
    %558 = arith.subi %c7_i32_111, %c7_i32_110 : i32
    %559 = arith.index_cast %c7_i32_110 : i32 to index
    %c0_112 = arith.constant 0 : index
    %c0_113 = arith.constant 0 : index
    %560 = vector.load %arg9[%559, %c0_112, %c0_113] : memref<8x8x768xf32, #tpu.memory_space<vmem>>, vector<1x8x768xf32>
    %561 = vector.shape_cast %560 : vector<1x8x768xf32> to vector<8x768xf32>
    %562 = arith.index_cast %558 : i32 to index
    %c0_114 = arith.constant 0 : index
    %c0_115 = arith.constant 0 : index
    %563 = vector.load %arg9[%562, %c0_114, %c0_115] : memref<8x8x768xf32, #tpu.memory_space<vmem>>, vector<1x8x768xf32>
    %564 = vector.shape_cast %563 : vector<1x8x768xf32> to vector<8x768xf32>
    %565 = vector.extract_strided_slice %561 {offsets = [0, 0], sizes = [8, 384], strides = [1, 1]} : vector<8x768xf32> to vector<8x384xf32>
    %566 = vector.broadcast %c7_i32_110 : i32 to vector<8x1xi32>
    %567 = arith.cmpi slt, %566, %11 : vector<8x1xi32>
    %568 = arith.truncf %522 : vector<8x128xf32> to vector<8x128xbf16>
    %cst_116 = arith.constant dense<0.000000e+00> : vector<8x384xf32>
    %569 = tpu.matmul %568, %9, %cst_116 {dimension_numbers = #tpu.dot_dimension_numbers<[1], [0], [0], [1], [0, 0, 1, 1], [], []>} : vector<8x128xbf16>, vector<128x384xbf16>, vector<8x384xf32> -> vector<8x384xf32>
    %570 = vector.extract_strided_slice %565 {offsets = [0, 0], sizes = [8, 128], strides = [1, 1]} : vector<8x384xf32> to vector<8x128xf32>
    %571 = vector.extract_strided_slice %569 {offsets = [0, 0], sizes = [8, 128], strides = [1, 1]} : vector<8x384xf32> to vector<8x128xf32>
    %572 = arith.addf %570, %571 : vector<8x128xf32>
    %573 = arith.negf %572 : vector<8x128xf32>
    %574 = math.exp %573 : vector<8x128xf32>
    %cst_117 = arith.constant 1.000000e+00 : f32
    %575 = vector.broadcast %cst_117 : f32 to vector<8x128xf32>
    %576 = arith.addf %575, %574 : vector<8x128xf32>
    %577 = arith.divf %575, %576 : vector<8x128xf32>
    %578 = vector.extract_strided_slice %565 {offsets = [0, 128], sizes = [8, 128], strides = [1, 1]} : vector<8x384xf32> to vector<8x128xf32>
    %579 = vector.extract_strided_slice %569 {offsets = [0, 128], sizes = [8, 128], strides = [1, 1]} : vector<8x384xf32> to vector<8x128xf32>
    %580 = arith.addf %578, %579 : vector<8x128xf32>
    %581 = arith.negf %580 : vector<8x128xf32>
    %582 = math.exp %581 : vector<8x128xf32>
    %cst_118 = arith.constant 1.000000e+00 : f32
    %583 = vector.broadcast %cst_118 : f32 to vector<8x128xf32>
    %584 = arith.addf %583, %582 : vector<8x128xf32>
    %585 = arith.divf %583, %584 : vector<8x128xf32>
    %586 = vector.extract_strided_slice %565 {offsets = [0, 256], sizes = [8, 128], strides = [1, 1]} : vector<8x384xf32> to vector<8x128xf32>
    %587 = vector.extract_strided_slice %569 {offsets = [0, 256], sizes = [8, 128], strides = [1, 1]} : vector<8x384xf32> to vector<8x128xf32>
    %588 = arith.addf %587, %14 : vector<8x128xf32>
    %589 = arith.mulf %577, %588 : vector<8x128xf32>
    %590 = arith.addf %586, %589 : vector<8x128xf32>
    %591 = math.tanh %590 : vector<8x128xf32>
    %cst_119 = arith.constant 1.000000e+00 : f32
    %592 = vector.broadcast %cst_119 : f32 to vector<8x128xf32>
    %593 = arith.subf %592, %585 : vector<8x128xf32>
    %594 = arith.mulf %593, %591 : vector<8x128xf32>
    %595 = arith.mulf %585, %522 : vector<8x128xf32>
    %596 = arith.addf %594, %595 : vector<8x128xf32>
    %597 = vector.shape_cast %567 : vector<8x1xi1> to vector<8x1xi1>
    %598 = vector.broadcast %597 : vector<8x1xi1> to vector<8x128xi1>
    %599 = arith.select %598, %596, %522 : vector<8x128xi1>, vector<8x128xf32>
    %600 = vector.extract_strided_slice %564 {offsets = [0, 384], sizes = [8, 384], strides = [1, 1]} : vector<8x768xf32> to vector<8x384xf32>
    %601 = vector.broadcast %558 : i32 to vector<8x1xi32>
    %602 = arith.cmpi slt, %601, %11 : vector<8x1xi32>
    %603 = arith.truncf %557 : vector<8x128xf32> to vector<8x128xbf16>
    %cst_120 = arith.constant dense<0.000000e+00> : vector<8x384xf32>
    %604 = tpu.matmul %603, %10, %cst_120 {dimension_numbers = #tpu.dot_dimension_numbers<[1], [0], [0], [1], [0, 0, 1, 1], [], []>} : vector<8x128xbf16>, vector<128x384xbf16>, vector<8x384xf32> -> vector<8x384xf32>
    %605 = vector.extract_strided_slice %600 {offsets = [0, 0], sizes = [8, 128], strides = [1, 1]} : vector<8x384xf32> to vector<8x128xf32>
    %606 = vector.extract_strided_slice %604 {offsets = [0, 0], sizes = [8, 128], strides = [1, 1]} : vector<8x384xf32> to vector<8x128xf32>
    %607 = arith.addf %605, %606 : vector<8x128xf32>
    %608 = arith.negf %607 : vector<8x128xf32>
    %609 = math.exp %608 : vector<8x128xf32>
    %cst_121 = arith.constant 1.000000e+00 : f32
    %610 = vector.broadcast %cst_121 : f32 to vector<8x128xf32>
    %611 = arith.addf %610, %609 : vector<8x128xf32>
    %612 = arith.divf %610, %611 : vector<8x128xf32>
    %613 = vector.extract_strided_slice %600 {offsets = [0, 128], sizes = [8, 128], strides = [1, 1]} : vector<8x384xf32> to vector<8x128xf32>
    %614 = vector.extract_strided_slice %604 {offsets = [0, 128], sizes = [8, 128], strides = [1, 1]} : vector<8x384xf32> to vector<8x128xf32>
    %615 = arith.addf %613, %614 : vector<8x128xf32>
    %616 = arith.negf %615 : vector<8x128xf32>
    %617 = math.exp %616 : vector<8x128xf32>
    %cst_122 = arith.constant 1.000000e+00 : f32
    %618 = vector.broadcast %cst_122 : f32 to vector<8x128xf32>
    %619 = arith.addf %618, %617 : vector<8x128xf32>
    %620 = arith.divf %618, %619 : vector<8x128xf32>
    %621 = vector.extract_strided_slice %600 {offsets = [0, 256], sizes = [8, 128], strides = [1, 1]} : vector<8x384xf32> to vector<8x128xf32>
    %622 = vector.extract_strided_slice %604 {offsets = [0, 256], sizes = [8, 128], strides = [1, 1]} : vector<8x384xf32> to vector<8x128xf32>
    %623 = arith.addf %622, %17 : vector<8x128xf32>
    %624 = arith.mulf %612, %623 : vector<8x128xf32>
    %625 = arith.addf %621, %624 : vector<8x128xf32>
    %626 = math.tanh %625 : vector<8x128xf32>
    %cst_123 = arith.constant 1.000000e+00 : f32
    %627 = vector.broadcast %cst_123 : f32 to vector<8x128xf32>
    %628 = arith.subf %627, %620 : vector<8x128xf32>
    %629 = arith.mulf %628, %626 : vector<8x128xf32>
    %630 = arith.mulf %620, %557 : vector<8x128xf32>
    %631 = arith.addf %629, %630 : vector<8x128xf32>
    %632 = vector.shape_cast %602 : vector<8x1xi1> to vector<8x1xi1>
    %633 = vector.broadcast %632 : vector<8x1xi1> to vector<8x128xi1>
    %634 = arith.select %633, %631, %557 : vector<8x128xi1>, vector<8x128xf32>
    %c8_i32 = arith.constant 8 : i32
    %635 = tpu.concatenate %599, %634 in 1 : vector<8x128xf32>, vector<8x128xf32> -> vector<8x256xf32>
    %c0_124 = arith.constant 0 : index
    %c0_125 = arith.constant 0 : index
    %636 = vector.load %arg8[%c0_124, %c0_125] : memref<8x256xf32, #tpu.memory_space<vmem>>, vector<8x256xf32>
    tpu.vector_store %arg8[%c0_124, %c0_125], %635 {strides = array<i32>} : memref<8x256xf32, #tpu.memory_space<vmem>>, vector<8x256xf32>,
    return
  }
}

</mosaic_0001>

<bundles_post_ra>
// kernel: tpu_custom_call.1
= control target key start
LH: loop header
LB: loop body
LE: loop exit
PB: predicated region body
PF: predicated region fallthrough
CT: control target
= control target key end

     0   :  { %13 = vsyncpa [#allocation4], 0  ;;  %s5266_s0 = inlined_call_operand.hbm [shape: bf16[8,8,128], index: 0, kind: input, shape index: {}]   ;;  %s5267_s1 = inlined_call_operand.vmem [shape: s32[8,1], index: 1, kind: input, shape index: {}]   ;;  %s5268_s2 = inlined_call_operand.hbm [shape: bf16[128,768], index: 2, kind: input, shape index: {}]   ;;  %s5269_s3 = inlined_call_operand.hbm [shape: bf16[128,384], index: 3, kind: input, shape index: {}]   ;;  %s5270_s4 = inlined_call_operand.hbm [shape: bf16[128,384], index: 4, kind: input, shape index: {}]   ;;  %s5271_s5 = inlined_call_operand.vmem [shape: f32[1,768], index: 5, kind: input, shape index: {}]   ;;  %s5272_s6 = inlined_call_operand.vmem [shape: f32[1,128], index: 6, kind: input, shape index: {}]   ;;  %s5273_s7 = inlined_call_operand.vmem [shape: f32[1,128], index: 7, kind: input, shape index: {}]   ;;  %s5274_s8 = inlined_call_operand.hbm [shape: f32[8,256], index: 8, kind: output, shape index: {}]  }
   0x1   :  { %14 = vsyncpa [#allocation7], 0 }
   0x2   :  { %15 = vsyncpa [#allocation10], 0 }
   0x3   :  { %16 = vsyncpa [#allocation5], 0  ;;  %s3977_s27 = smov [#allocation6]   ;;  %s3859_s9 = scalar_lea.hbm %s5268_s2, 6144 }
   0x4   :  { %s36_s28 = sshll.u32 %s3977_s27, 4  ;;  %p3860_p0 = scmp.ne.s32.totalorder %s5268_s2, %s3859_s9  ;;  %s37_s28 = int_to_ptr.vmem [resolvable:$true] %s36_s28 }
   0x5   :  { %p3863_p1 = scmp.lt.u32.totalorder %s3859_s9, %s5268_s2 }
   0x7   :  { %p3865_p2 = pnand %p3863_p1, %p3860_p0 }
   0x9   :  { %3868 = shalt.err (!%p3865_p2)
}
   0xa   :  { %s3869_s14 = scalar_lea.vmem %s37_s28, 6144  ;;  %p3874_p4 = scmp.lt.s32.totalorder %s37_s28, %s37_s28 }
   0xb   :  { %p3870_p3 = scmp.ne.s32.totalorder %s37_s28, %s3869_s14  ;;  %p3875_p5 = scmp.lt.s32.totalorder %s3869_s14, %s3869_s14 }
   0xd   :  { %p3876_p6 = por %p3875_p5, %p3874_p4 }
   0xf   :  { %p3877_p7 = pnand %p3876_p6, %p3870_p3 }
  0x11   :  { %3880 = shalt.err (!%p3877_p7)
}
  0x12   :  { %s3978_s15 = smov 384   ;;  %s3979_s16 = smov 24  }
  0x13   :  { %42 = dma.hbm_to_vmem [thread:$0]  %s5268_s2, 6144, %s37_s28, [#allocation7], %s3978_s15, %s3978_s15, %s3979_s16  }
  0x14   :  { %s3980_s19 = smov [#allocation3]   ;;  %s3881_s23 = scalar_lea.hbm %s5266_s0, 512 }
  0x15   :  { %s22_s20 = sshll.u32 %s3980_s19, 4  ;;  %p3882_p8 = scmp.ne.s32.totalorder %s5266_s0, %s3881_s23  ;;  %s23_s20 = int_to_ptr.vmem [resolvable:$true] %s22_s20 }
  0x16   :  { %p3885_p9 = scmp.lt.u32.totalorder %s3881_s23, %s5266_s0 }
  0x18   :  { %p3887_p10 = pnand %p3885_p9, %p3882_p8 }
  0x1a   :  { %3890 = shalt.err (!%p3887_p10)
}
  0x1b   :  { %s3891_s29 = scalar_lea.vmem %s23_s20, 512  ;;  %p3896_p12 = scmp.lt.s32.totalorder %s23_s20, %s23_s20 }
  0x1c   :  { %p3892_p11 = scmp.ne.s32.totalorder %s23_s20, %s3891_s29  ;;  %p3897_p13 = scmp.lt.s32.totalorder %s3891_s29, %s3891_s29 }
  0x1e   :  { %p3898_p0 = por %p3897_p13, %p3896_p12 }
  0x20   :  { %p3899_p1 = pnand %p3898_p0, %p3892_p11 }
  0x22   :  { %3902 = shalt.err (!%p3899_p1)
}
  0x23   :  { %s3981_s2 = smov 64   ;;  %s3982_s28 = smov 4  }
  0x24   :  { %28 = dma.hbm_to_vmem [thread:$0]  %s5266_s0, 512, %s23_s20, [#allocation4], %s3981_s2, %s3981_s2, %s3982_s28  }
  0x25   :  { %s3983_s10 = smov [#allocation8]   ;;  %s3903_s14 = scalar_lea.hbm %s5269_s3, 3072 }
  0x26   :  { %s48_s11 = sshll.u32 %s3983_s10, 4  ;;  %p3904_p2 = scmp.ne.s32.totalorder %s5269_s3, %s3903_s14  ;;  %s49_s11 = int_to_ptr.vmem [resolvable:$true] %s48_s11 }
  0x27   :  { %p3907_p3 = scmp.lt.u32.totalorder %s3903_s14, %s5269_s3 }
  0x29   :  { %p3909_p4 = pnand %p3907_p3, %p3904_p2 }
  0x2b   :  { %3912 = shalt.err (!%p3909_p4)
}
  0x2c   :  { %s3913_s19 = scalar_lea.vmem %s49_s11, 3072  ;;  %p3918_p6 = scmp.lt.s32.totalorder %s49_s11, %s49_s11 }
  0x2d   :  { %p3914_p5 = scmp.ne.s32.totalorder %s49_s11, %s3913_s19  ;;  %p3919_p7 = scmp.lt.s32.totalorder %s3913_s19, %s3913_s19 }
  0x2f   :  { %p3920_p8 = por %p3919_p7, %p3918_p6 }
  0x31   :  { %p3921_p9 = pnand %p3920_p8, %p3914_p5 }
  0x33   :  { %3924 = shalt.err (!%p3921_p9)
}
  0x34   :  { %s3984_s0 = smov 192   ;;  %s3985_s20 = smov 12  }
  0x35   :  { %54 = dma.hbm_to_vmem [thread:$0]  %s5269_s3, 3072, %s49_s11, [#allocation7], %s3984_s0, %s3984_s0, %s3985_s20  }
  0x36   :  { %s3986_s23 = smov [#allocation9]   ;;  %s3925_s27 = scalar_lea.hbm %s5270_s4, 3072 }
  0x37   :  { %s60_s24 = sshll.u32 %s3986_s23, 4  ;;  %p3926_p10 = scmp.ne.s32.totalorder %s5270_s4, %s3925_s27  ;;  %s61_s24 = int_to_ptr.vmem [resolvable:$true] %s60_s24 }
  0x38   :  { %p3929_p11 = scmp.lt.u32.totalorder %s3925_s27, %s5270_s4 }
  0x3a   :  { %p3931_p12 = pnand %p3929_p11, %p3926_p10 }
  0x3c   :  { %3934 = shalt.err (!%p3931_p12)
}
  0x3d   :  { %s3935_s9 = scalar_lea.vmem %s61_s24, 3072  ;;  %p3940_p0 = scmp.lt.s32.totalorder %s61_s24, %s61_s24 }
  0x3e   :  { %p3936_p13 = scmp.ne.s32.totalorder %s61_s24, %s3935_s9  ;;  %p3941_p1 = scmp.lt.s32.totalorder %s3935_s9, %s3935_s9 }
  0x40   :  { %p3942_p2 = por %p3941_p1, %p3940_p0 }
  0x42   :  { %p3943_p3 = pnand %p3942_p2, %p3936_p13 }
  0x44   :  { %3946 = shalt.err (!%p3943_p3)
}
  0x45   :  { %66 = dma.hbm_to_vmem [thread:$0]  %s5270_s4, 3072, %s61_s24, [#allocation10], %s3984_s0, %s3984_s0, %s3985_s20  }
  0x46   :  { %3969 = dma.done.wait [#allocation4], 512  }
  0x47   :  { %3970 = vsyncadd [#allocation4], 4294966784 }
  0x48   :  { %3971 = dma.done.wait [#allocation7], 9216  }
  0x49   :  { %3972 = vsyncadd [#allocation7], 4294958080 }
  0x4a   :  { %3973 = dma.done.wait [#allocation10], 3072  }
  0x4b   :  { %3974 = vsyncadd [#allocation10], 4294964224  ;;  %v5278_v0 = vmov 0   ;;  %v3466_v1 = vld [vmem:[#allocation6 + $0x4] ss:$24 sps:$4 sm:$0xff]   ;;  %v4107_v44 = vld [vmem:[#allocation3 + $0x8] sm:$0xff]  }
  0x4c   :  { %470 = vmatprep.mubr.bf16.mxu0 %v5278_v0  ;;  %543 = vmatprep.mubr.bf16.mxu1 %v5278_v0  ;;  %v3468_v2 = vld [vmem:[#allocation6 + $0xc] ss:$24 sps:$4 sm:$0xff]   ;;  %v3470_v3 = vld [vmem:[#allocation6] ss:$24 sps:$4 sm:$0xff]   ;;  %v3474_v6 = vld [vmem:[#allocation6 + $0x3c] ss:$24 sps:$4 sm:$0xff]  }
  0x4d   :  { %3464 = vset.pattern.permute.xlu0 %v5278_v0  ;;  %3465 = vset.pattern.permute.xlu1 %v5278_v0  ;;  %v3471_v4 = vld [vmem:[#allocation6 + $0x8] ss:$24 sps:$4 sm:$0xff]   ;;  %v3472_v5 = vld [vmem:[#allocation6 + $0x34] ss:$24 sps:$4 sm:$0xff]   ;;  %v3477_v8 = vld [vmem:[#allocation6 + $0x38] ss:$24 sps:$4 sm:$0xff]  }
  0x4e   :  { %438 = vmatprep.subr.bf16.mxu0 %v3466_v1  ;;  %511 = vmatprep.subr.bf16.mxu1 %v3468_v2  ;;  %v3476_v7 = vld [vmem:[#allocation6 + $0x30] ss:$24 sps:$4 sm:$0xff]   ;;  %v3478_v9 = vld [vmem:[#allocation6 + $0x64] ss:$24 sps:$4 sm:$0xff]   ;;  %v3482_v11 = vld [vmem:[#allocation6 + $0x60] ss:$24 sps:$4 sm:$0xff]  }
  0x4f   :  { %439 = vmatpush1.bf16.msra.mxu0 %v3470_v3  ;;  %512 = vmatpush1.bf16.msra.mxu1 %v3471_v4  ;;  %v3480_v10 = vld [vmem:[#allocation6 + $0x6c] ss:$24 sps:$4 sm:$0xff]   ;;  %v3483_v12 = vld [vmem:[#allocation6 + $0x68] ss:$24 sps:$4 sm:$0xff]   ;;  %v3486_v14 = vld [vmem:[#allocation6 + $0x9c] ss:$24 sps:$4 sm:$0xff]  }
  0x50   :  { %440 = vmatprep.subr.bf16.mxu0 %v3472_v5  ;;  %513 = vmatprep.subr.bf16.mxu1 %v3474_v6  ;;  %v3484_v13 = vld [vmem:[#allocation6 + $0x94] ss:$24 sps:$4 sm:$0xff]   ;;  %v3488_v15 = vld [vmem:[#allocation6 + $0x90] ss:$24 sps:$4 sm:$0xff]   ;;  %v3490_v17 = vld [vmem:[#allocation6 + $0xc4] ss:$24 sps:$4 sm:$0xff]  }
  0x51   :  { %v3489_v16 = vld [vmem:[#allocation6 + $0x98] ss:$24 sps:$4 sm:$0xff]   ;;  %v3492_v18 = vld [vmem:[#allocation6 + $0xcc] ss:$24 sps:$4 sm:$0xff]   ;;  %v3495_v20 = vld [vmem:[#allocation6 + $0xc8] ss:$24 sps:$4 sm:$0xff]  }
  0x52   :  { %v3494_v19 = vld [vmem:[#allocation6 + $0xc0] ss:$24 sps:$4 sm:$0xff]   ;;  %v3496_v21 = vld [vmem:[#allocation6 + $0xf4] ss:$24 sps:$4 sm:$0xff]   ;;  %v3500_v23 = vld [vmem:[#allocation6 + $0xf0] ss:$24 sps:$4 sm:$0xff]  }
  0x53   :  { %441 = vmatpush1.bf16.msra.mxu0 %v3476_v7  ;;  %514 = vmatpush1.bf16.msra.mxu1 %v3477_v8  ;;  %v3498_v22 = vld [vmem:[#allocation6 + $0xfc] ss:$24 sps:$4 sm:$0xff]   ;;  %v3501_v24 = vld [vmem:[#allocation6 + $0xf8] ss:$24 sps:$4 sm:$0xff]   ;;  %v3504_v26 = vld [vmem:[#allocation6 + $0x12c] ss:$24 sps:$4 sm:$0xff]  }
  0x54   :  { %442 = vmatprep.subr.bf16.mxu0 %v3478_v9  ;;  %515 = vmatprep.subr.bf16.mxu1 %v3480_v10  ;;  %v3502_v25 = vld [vmem:[#allocation6 + $0x124] ss:$24 sps:$4 sm:$0xff]   ;;  %v3506_v27 = vld [vmem:[#allocation6 + $0x120] ss:$24 sps:$4 sm:$0xff]   ;;  %v3508_v29 = vld [vmem:[#allocation6 + $0x154] ss:$24 sps:$4 sm:$0xff]  }
  0x55   :  { %v3507_v28 = vld [vmem:[#allocation6 + $0x128] ss:$24 sps:$4 sm:$0xff]   ;;  %v3510_v30 = vld [vmem:[#allocation6 + $0x15c] ss:$24 sps:$4 sm:$0xff]   ;;  %v3513_v32 = vld [vmem:[#allocation6 + $0x158] ss:$24 sps:$4 sm:$0xff]  }
  0x56   :  { %v3512_v31 = vld [vmem:[#allocation6 + $0x150] ss:$24 sps:$4 sm:$0xff]   ;;  %v3517_v33 = vld [vmem:[#allocation6 + $0x14] ss:$24 sps:$4 sm:$0xff]   ;;  %v4090_v35 = vld [vmem:[#allocation3] sm:$0xff]   ;;  %v5275_v9 = vmov 0.0  }
  0x57   :  { %443 = vmatpush1.bf16.msra.mxu0 %v3482_v11  ;;  %516 = vmatpush1.bf16.msra.mxu1 %v3483_v12  ;;  %v4088_v34 = vld [vmem:[#allocation8 + $0x4] ss:$12 sps:$4 sm:$0xff]   ;;  %v4092_v37 = vld [vmem:[#allocation8] ss:$12 sps:$4 sm:$0xff]   ;;  %v4095_v39 = vld [vmem:[#allocation8 + $0x1c] ss:$12 sps:$4 sm:$0xff]  }
  0x58   :  { %444 = vmatprep.subr.bf16.mxu0 %v3484_v13  ;;  %517 = vmatprep.subr.bf16.mxu1 %v3486_v14  ;;  %v3515_v36 = vld [vmem:[#allocation6 + $0x10] ss:$24 sps:$4 sm:$0xff]   ;;  %v3523_v38 = vld [vmem:[#allocation6 + $0x44] ss:$24 sps:$4 sm:$0xff]   ;;  %v3521_v40 = vld [vmem:[#allocation6 + $0x40] ss:$24 sps:$4 sm:$0xff]  }
  0x59   :  { %v4100_v41 = vld [vmem:[#allocation8 + $0x18] ss:$12 sps:$4 sm:$0xff]   ;;  %v3530_v42 = vld [vmem:[#allocation6 + $0x74] ss:$24 sps:$4 sm:$0xff]   ;;  %v3528_v45 = vld [vmem:[#allocation6 + $0x70] ss:$24 sps:$4 sm:$0xff]  }
  0x5a   :  { %v4103_v43 = vld [vmem:[#allocation8 + $0x34] ss:$12 sps:$4 sm:$0xff]   ;;  %v4109_v46 = vld [vmem:[#allocation8 + $0x30] ss:$12 sps:$4 sm:$0xff]   ;;  %v4113_v48 = vld [vmem:[#allocation8 + $0x4c] ss:$12 sps:$4 sm:$0xff]  }
  0x5b   :  { %445 = vmatpush1.bf16.msra.mxu0 %v3488_v15  ;;  %518 = vmatpush1.bf16.msra.mxu1 %v3489_v16  ;;  %v3536_v47 = vld [vmem:[#allocation6 + $0xa4] ss:$24 sps:$4 sm:$0xff]   ;;  %v3534_v49 = vld [vmem:[#allocation6 + $0xa0] ss:$24 sps:$4 sm:$0xff]   ;;  %v4117_v50 = vld [vmem:[#allocation8 + $0x48] ss:$12 sps:$4 sm:$0xff]  }
  0x5c   :  { %446 = vmatprep.subr.bf16.mxu0 %v3490_v17  ;;  %519 = vmatprep.subr.bf16.mxu1 %v3492_v18  ;;  %v3543_v51 = vld [vmem:[#allocation6 + $0xd4] ss:$24 sps:$4 sm:$0xff]   ;;  %v4121_v52 = vld [vmem:[#allocation8 + $0x64] ss:$12 sps:$4 sm:$0xff]   ;;  %v4131_v57 = vld [vmem:[#allocation8 + $0x7c] ss:$12 sps:$4 sm:$0xff]  }
  0x5d   :  { %v4125_v53 = vld [vmem:[#allocation3 + $0x10] sm:$0xff]   ;;  %v4128_v55 = vld [vmem:[#allocation8 + $0x60] ss:$12 sps:$4 sm:$0xff]   ;;  %v3549_v56 = vld [vmem:[#allocation6 + $0x104] ss:$24 sps:$4 sm:$0xff]   ;;  %vm3989_vm4 = vmmov 0  }
  0x5e   :  { %v3541_v54 = vld [vmem:[#allocation6 + $0xd0] ss:$24 sps:$4 sm:$0xff]   ;;  %v3547_v58 = vld [vmem:[#allocation6 + $0x100] ss:$24 sps:$4 sm:$0xff]   ;;  %v3556_v60 = vld [vmem:[#allocation6 + $0x134] ss:$24 sps:$4 sm:$0xff]  }
  0x5f   :  { %447 = vmatpush1.bf16.msra.mxu0 %v3494_v19  ;;  %520 = vmatpush1.bf16.msra.mxu1 %v3495_v20  ;;  %v4136_v59 = vld [vmem:[#allocation8 + $0x78] ss:$12 sps:$4 sm:$0xff]   ;;  %v4139_v61 = vld [vmem:[#allocation8 + $0x94] ss:$12 sps:$4 sm:$0xff]   ;;  %v3554_v63 = vld [vmem:[#allocation6 + $0x130] ss:$24 sps:$4 sm:$0xff]  }
  0x60   :  { %448 = vmatprep.subr.bf16.mxu0 %v3496_v21  ;;  %521 = vmatprep.subr.bf16.mxu1 %v3498_v22  ;;  %v4143_v62 = vld [vmem:[#allocation3 + $0x18] sm:$0xff]   ;;  %v4154_v5 = vld [vmem:[#allocation8 + $0xa8] ss:$12 sps:$4 sm:$0xff]   ;;  %v4157_v6 = vld [vmem:[#allocation9 + $0x4] ss:$12 sps:$4 sm:$0xff]  }
  0x61   :  { %v4145_v1 = vld [vmem:[#allocation8 + $0x90] ss:$12 sps:$4 sm:$0xff]   ;;  %v4149_v3 = vld [vmem:[#allocation8 + $0xac] ss:$12 sps:$4 sm:$0xff]   ;;  %5313 = vst [vmem:[#allocation17_spill] sm:$0xff] %v4154_v5  ;;  %5314 = vst [vmem:[#allocation18_spill] sm:$0xff] %v4157_v6 }
  0x62   :  { %v3562_v2 = vld [vmem:[#allocation6 + $0x164] ss:$24 sps:$4 sm:$0xff]   ;;  %5312 = vst [vmem:[#allocation16_spill] sm:$0xff] %v4149_v3  ;;  %v3560_v4 = vld [vmem:[#allocation6 + $0x160] ss:$24 sps:$4 sm:$0xff]  }
  0x63   :  { %449 = vmatpush1.bf16.msra.mxu0 %v3500_v23  ;;  %522 = vmatpush1.bf16.msra.mxu1 %v3501_v24  ;;  %v4161_v7 = vld [vmem:[#allocation8 + $0x8] ss:$12 sps:$4 sm:$0xff]   ;;  %v4164_v8 = vld [vmem:[#allocation9] ss:$12 sps:$4 sm:$0xff]   ;;  %v4176_v12 = vld [vmem:[#allocation9 + $0x18] ss:$12 sps:$4 sm:$0xff]  }
  0x64   :  { %450 = vmatprep.subr.bf16.mxu0 %v3502_v25  ;;  %523 = vmatprep.subr.bf16.mxu1 %v3504_v26  ;;  %v4168_v10 = vld [vmem:[#allocation9 + $0x1c] ss:$12 sps:$4 sm:$0xff]   ;;  %v4172_v11 = vld [vmem:[#allocation8 + $0x20] ss:$12 sps:$4 sm:$0xff]   ;;  %v4184_v14 = vld [vmem:[#allocation8 + $0x38] ss:$12 sps:$4 sm:$0xff]  }
  0x65   :  { %v4180_v13 = vld [vmem:[#allocation9 + $0x34] ss:$12 sps:$4 sm:$0xff]   ;;  %v4188_v15 = vld [vmem:[#allocation9 + $0x30] ss:$12 sps:$4 sm:$0xff]   ;;  %v4192_v16 = vld [vmem:[#allocation9 + $0x4c] ss:$12 sps:$4 sm:$0xff]  }
  0x66   :  { %v4197_v17 = vld [vmem:[%s5267_s1] sm:$0xff]  ;;  %v4204_v19 = vld [vmem:[#allocation8 + $0x50] ss:$12 sps:$4 sm:$0xff]   ;;  %v4206_v20 = vld [vmem:[#allocation9 + $0x48] ss:$12 sps:$4 sm:$0xff]  }
  0x67   :  { %451 = vmatpush1.bf16.msra.mxu0 %v3506_v27  ;;  %524 = vmatpush1.bf16.msra.mxu1 %v3507_v28  ;;  %vm797_vm0 = vcmp.gt.s32.totalorder %v4197_v17, 0  ;;  %vm1035_vm1 = vcmp.gt.s32.totalorder %v4197_v17, 7  ;;  %v4211_v21 = vld [vmem:[#allocation9 + $0x64] ss:$12 sps:$4 sm:$0xff]   ;;  %v4217_v23 = vld [vmem:[#allocation8 + $0x68] ss:$12 sps:$4 sm:$0xff]  }
  0x68   :  { %452 = vmatprep.subr.bf16.mxu0 %v3508_v29  ;;  %525 = vmatprep.subr.bf16.mxu1 %v3510_v30  ;;  %v1029_v18 = vsel %vm797_vm0, 1, %v5278_v0  ;;  %v1267_v22 = vsel %vm1035_vm1, 1, %v5278_v0  ;;  %v4219_v24 = vld [vmem:[#allocation9 + $0x60] ss:$12 sps:$4 sm:$0xff]   ;;  %vm1523_vm2 = vcmp.gt.s32.totalorder %v4197_v17, 2  ;;  %vm1759_vm3 = vcmp.gt.s32.totalorder %v4197_v17, 3 }
  0x69   :  { %1031 = vperm.xlu0 %3464, %v1029_v18   ;;  %v4224_v25 = vld [vmem:[#allocation9 + $0x7c] ss:$12 sps:$4 sm:$0xff]   ;;  %v1628_v26 = vsel %vm1523_vm2, 1, %v5278_v0  ;;  %v4230_v27 = vld [vmem:[#allocation8 + $0x80] ss:$12 sps:$4 sm:$0xff]   ;;  %v1864_v30 = vsel %vm1759_vm3, 1, %v5278_v0 }
  0x6a   :  { %v4232_v28 = vld [vmem:[#allocation9 + $0x78] ss:$12 sps:$4 sm:$0xff]   ;;  %v4237_v29 = vld [vmem:[#allocation9 + $0x94] ss:$12 sps:$4 sm:$0xff]   ;;  %vm1287_vm5 = vcmp.gt.s32.totalorder %v4197_v17, 1  ;;  %vm1398_vm6 = vcmp.gt.s32.totalorder %v4197_v17, 6 }
  0x6b   :  { %453 = vmatpush1.bf16.msra.mxu0 %v3512_v31  ;;  %526 = vmatpush1.bf16.msra.mxu1 %v3513_v32  ;;  %v4243_v31 = vld [vmem:[#allocation8 + $0x98] ss:$12 sps:$4 sm:$0xff]   ;;  %v4245_v32 = vld [vmem:[#allocation9 + $0x90] ss:$12 sps:$4 sm:$0xff]   ;;  %vm1634_vm7 = vcmp.gt.s32.totalorder %v4197_v17, 5  ;;  %vm1870_vm8 = vcmp.gt.s32.totalorder %v4197_v17, 4 }
  0x6c   :  { %584 = vmatprep.subr.bf16.mxu0 %v3517_v33  ;;  %926 = vmatprep.subr.bf16.mxu1 %v4088_v34  ;;  %5315 = vst [vmem:[#allocation19_spill] sm:$0xff] %v4243_v31  ;;  %v4249_v33 = vld [vmem:[#allocation9 + $0xac] ss:$12 sps:$4 sm:$0xff]  }
  0x6d   :  { %1269 = vperm.xlu0 %3464, %v1267_v22  }
  0x6e   :  { %471 = vmatmul.mubr.bf16.vlgmr.msra.gmra.mrb[0].mxu0 %v4090_v35  ;;  %544 = vmatmul.mubr.bf16.vlgmr.msra.gmra.mrb[0].mxu1 %v4090_v35 }
  0x6f   :  { %585 = vmatpush1.bf16.msra.mxu0 %v3515_v36  ;;  %927 = vmatpush1.bf16.msra.mxu1 %v4092_v37  ;;  %v4256_v36 = vld [vmem:[#allocation9 + $0xa8] ss:$12 sps:$4 sm:$0xff]  }
  0x70   :  { %586 = vmatprep.subr.bf16.mxu0 %v3523_v38  ;;  %928 = vmatprep.subr.bf16.mxu1 %v4095_v39  ;;  %v4264_v38 = vld [vmem:[#allocation9 + $0x8] ss:$12 sps:$4 sm:$0xff]  }
  0x71   :  { %480 = vmatprep.mubr.bf16.mxu0 %v5278_v0  ;;  %553 = vmatprep.mubr.bf16.mxu1 %v5278_v0 }
  0x72   :  { %1630 = vperm.xlu0 %3464, %v1628_v26  }
  0x73   :  { %587 = vmatpush1.bf16.msra.mxu0 %v3521_v40  ;;  %929 = vmatpush1.bf16.msra.mxu1 %v4100_v41  ;;  %v4271_v40 = vld [vmem:[#allocation9 + $0x20] ss:$12 sps:$4 sm:$0xff]  }
  0x74   :  { %588 = vmatprep.subr.bf16.mxu0 %v3530_v42  ;;  %930 = vmatprep.subr.bf16.mxu1 %v4103_v43  ;;  %v4286_v42 = vld [vmem:[#allocation9 + $0x50] ss:$12 sps:$4 sm:$0xff]  }
  0x76   :  { %481 = vmatmul.mubr.bf16.gmra.mrb[4].mxu0 %v4107_v44  ;;  %554 = vmatmul.mubr.bf16.gmra.mrb[4].mxu1 %v4107_v44 }
  0x77   :  { %589 = vmatpush1.bf16.msra.mxu0 %v3528_v45  ;;  %931 = vmatpush1.bf16.msra.mxu1 %v4109_v46 }
  0x78   :  { %590 = vmatprep.subr.bf16.mxu0 %v3536_v47  ;;  %932 = vmatprep.subr.bf16.mxu1 %v4113_v48  ;;  %v1392_v47 = vsel %vm1287_vm5, 1, %v5278_v0 }
  0x79   :  { %490 = vmatprep.mubr.bf16.mxu0 %v5278_v0  ;;  %563 = vmatprep.mubr.bf16.mxu1 %v5278_v0 }
  0x7a   :  { %1866 = vperm.xlu0 %3464, %v1864_v30   ;;  %1394 = vperm.xlu1 %3465, %v1392_v47  }
  0x7b   :  { %591 = vmatpush1.bf16.msra.mxu0 %v3534_v49  ;;  %933 = vmatpush1.bf16.msra.mxu1 %v4117_v50 }
  0x7c   :  { %592 = vmatprep.subr.bf16.mxu0 %v3543_v51  ;;  %934 = vmatprep.subr.bf16.mxu1 %v4121_v52 }
  0x7e   :  { %491 = vmatmul.mubr.bf16.gmra.mrb[8].mxu0 %v4125_v53  ;;  %564 = vmatmul.mubr.bf16.gmra.mrb[8].mxu1 %v4125_v53 }
  0x7f   :  { %593 = vmatpush1.bf16.msra.mxu0 %v3541_v54  ;;  %935 = vmatpush1.bf16.msra.mxu1 %v4128_v55  ;;  %v1503_v54 = vsel %vm1398_vm6, 1, %v5278_v0 }
  0x80   :  { %594 = vmatprep.subr.bf16.mxu0 %v3549_v56  ;;  %936 = vmatprep.subr.bf16.mxu1 %v4131_v57  ;;  %v4350_v56 = vld [vmem:[%s5271_s5] sm:$0x3f] }
  0x81   :  { %500 = vmatprep.mubr.bf16.mxu0 %v5278_v0  ;;  %573 = vmatprep.mubr.bf16.mxu1 %v5278_v0 }
  0x82   :  { %1505 = vperm.xlu1 %3465, %v1503_v54  }
  0x83   :  { %595 = vmatpush1.bf16.msra.mxu0 %v3547_v58  ;;  %937 = vmatpush1.bf16.msra.mxu1 %v4136_v59 }
  0x84   :  { %596 = vmatprep.subr.bf16.mxu0 %v3556_v60  ;;  %938 = vmatprep.subr.bf16.mxu1 %v4139_v61 }
  0x86   :  { %501 = vmatmul.mubr.bf16.gmra.mrb[12].mxu0 %v4143_v62  ;;  %574 = vmatmul.mubr.bf16.gmra.mrb[12].mxu1 %v4143_v62 }
  0x87   :  { %597 = vmatpush1.bf16.msra.mxu0 %v3554_v63  ;;  %939 = vmatpush1.bf16.msra.mxu1 %v4145_v1 }
  0x88   :  { %598 = vmatprep.subr.bf16.mxu0 %v3562_v2  ;;  %940 = vmatprep.subr.bf16.mxu1 %v4149_v3  ;;  %v1739_v2 = vsel %vm1634_vm7, 1, %v5278_v0 }
  0x89   :  { %616 = vmatprep.mubr.bf16.mxu0 %v5278_v0  ;;  %958 = vmatprep.mubr.bf16.mxu1 %v5278_v0 }
  0x8a   :  { %1741 = vperm.xlu1 %3465, %v1739_v2  }
  0x8b   :  { %599 = vmatpush1.bf16.msra.mxu0 %v3560_v4  ;;  %941 = vmatpush1.bf16.msra.mxu1 %v4154_v5 }
  0x8c   :  { %3130 = vmatprep.subr.bf16.mxu0 %v5275_v9  ;;  %1164 = vmatprep.subr.bf16.mxu1 %v4157_v6 }
  0x8e   :  { %617 = vmatmul.mubr.bf16.vlgmr.msra.gmra.mrb[16].mxu0 %v4090_v35  ;;  %959 = vmatmul.mubr.bf16.vlgmr.msra.gmra.mrb[16].mxu1 %v5278_v0  ;;  %v4254_v35 = vld [vmem:[#allocation8 + $0xb0] ss:$12 sps:$4 sm:$0xff]  }
  0x8f   :  { %3131 = vmatpush3.bf16.msra.mxu0 %v4161_v7  ;;  %1165 = vmatpush1.bf16.msra.mxu1 %v4164_v8  ;;  %5316 = vst [vmem:[#allocation20_spill] sm:$0xff] %v4254_v35 }
  0x90   :  { %3132 = vmatprep.subr.bf16.mxu0 %v5275_v9  ;;  %1166 = vmatprep.subr.bf16.mxu1 %v4168_v10 }
  0x91   :  { %626 = vmatprep.mubr.bf16.mxu0 %v5278_v0  ;;  %1196 = vmatprep.mubr.bf16.mxu1 %v5278_v0 }
  0x93   :  { %3133 = vmatpush3.bf16.msra.mxu0 %v4172_v11  ;;  %1167 = vmatpush1.bf16.msra.mxu1 %v4176_v12 }
  0x94   :  { %3134 = vmatprep.subr.bf16.mxu0 %v5275_v9  ;;  %1168 = vmatprep.subr.bf16.mxu1 %v4180_v13 }
  0x96   :  { %627 = vmatmul.mubr.bf16.gmra.mrb[20].mxu0 %v4107_v44  ;;  %v144_v44 = vlaneseq }
  0x97   :  { %3135 = vmatpush3.bf16.msra.mxu0 %v4184_v14  ;;  %1169 = vmatpush1.bf16.msra.mxu1 %v4188_v15 }
  0x98   :  { %3136 = vmatprep.subr.bf16.mxu0 %v5275_v9  ;;  %1170 = vmatprep.subr.bf16.mxu1 %v4192_v16  ;;  %v4338_v45 = vshrl.u32 %v144_v44, 7 }
  0x99   :  { %636 = vmatprep.mubr.bf16.mxu0 %v5278_v0 }
  0x9a   :  { %v158_v49 = vsub.s32 3, %v4338_v45  ;;  %v146_v51 = vsub.s32 0, %v4338_v45  ;;  %v150_v58 = vsub.s32 1, %v4338_v45 }
  0x9b   :  { %3137 = vmatpush3.bf16.msra.mxu0 %v4204_v19  ;;  %1171 = vmatpush1.bf16.msra.mxu1 %v4206_v20 }
  0x9c   :  { %3138 = vmatprep.subr.bf16.mxu0 %v5275_v9  ;;  %1172 = vmatprep.subr.bf16.mxu1 %v4211_v21  ;;  %v4355_v60 = vrot.slane %v4350_v56, %v158_v49  ;;  %v4372_v30 = vrot.slane %v4350_v56, %v150_v58 }
  0x9e   :  { %637 = vmatmul.mubr.bf16.gmra.mrb[24].mxu0 %v4125_v53  ;;  %v154_v53 = vsub.s32 2, %v4338_v45 }
  0x9f   :  { %3139 = vmatpush3.bf16.msra.mxu0 %v4217_v23  ;;  %1173 = vmatpush1.bf16.msra.mxu1 %v4219_v24 }
  0xa0   :  { %3140 = vmatprep.subr.bf16.mxu0 %v5275_v9  ;;  %1174 = vmatprep.subr.bf16.mxu1 %v4224_v25  ;;  %v4361_v63 = vrot.slane %v4350_v56, %v154_v53 }
  0xa1   :  { %646 = vmatprep.mubr.bf16.mxu0 %v5278_v0 }
  0xa3   :  { %3141 = vmatpush3.bf16.msra.mxu0 %v4230_v27  ;;  %1175 = vmatpush1.bf16.msra.mxu1 %v4232_v28 }
  0xa4   :  { %3142 = vmatprep.subr.bf16.mxu0 %v5275_v9  ;;  %1176 = vmatprep.subr.bf16.mxu1 %v4237_v29 }
  0xa6   :  { %647 = vmatmul.mubr.bf16.gmra.mrb[28].mxu0 %v4143_v62  ;;  %v4358_v62 = vrot.slane %v4350_v56, %v146_v51 }
  0xa7   :  { %3143 = vmatpush3.bf16.msra.mxu0 %v4243_v31  ;;  %1177 = vmatpush1.bf16.msra.mxu1 %v4245_v32 }
  0xa8   :  { %3144 = vmatprep.subr.bf16.mxu0 %v5275_v9  ;;  %1178 = vmatprep.subr.bf16.mxu1 %v4249_v33 }
  0xa9   :  { %3146 = vmatprep.mubr.msk.bf16.mxu0 %vm3989_vm4, %v5275_v9 }
  0xab   :  { %3145 = vmatpush3.bf16.msra.mxu0 %v4254_v35  ;;  %1179 = vmatpush1.bf16.msra.mxu1 %v4256_v36 }
  0xac   :  { %3150 = vmatprep.subr.bf16.mxu0 %v5275_v9  ;;  %1289 = vmatprep.subr.bf16.mxu1 %v4088_v34  ;;  %v4280_v34 = vld [vmem:[#allocation9 + $0x38] ss:$12 sps:$4 sm:$0xff]  }
  0xae   :  { %3147 = vmatmul.mubr.bf16.vlgmr.msra.gmra.mrb[32].mxu0 %v5278_v0  ;;  %1197 = vmatmul.mubr.bf16.vlgmr.msra.gmra.mrb[20].mxu1 %v5278_v0 }
  0xaf   :  { %3151 = vmatpush3.bf16.msra.mxu0 %v4264_v38  ;;  %3166 = vmatprep.mubr.msk.bf16.mxu0 %vm3989_vm4, %v5275_v9 }
  0xb0   :  { %3152 = vmatprep.subr.bf16.mxu0 %v5275_v9  ;;  %1290 = vmatpush1.bf16.msra.mxu1 %v4092_v37  ;;  %v4292_v37 = vld [vmem:[#allocation9 + $0x68] ss:$12 sps:$4 sm:$0xff]  }
  0xb1   :  { %1291 = vmatprep.subr.bf16.mxu1 %v4095_v39  ;;  %1321 = vmatprep.mubr.bf16.mxu1 %v5278_v0  ;;  %v4298_v39 = vld [vmem:[#allocation9 + $0x80] ss:$12 sps:$4 sm:$0xff]  }
  0xb3   :  { %3153 = vmatpush3.bf16.msra.mxu0 %v4271_v40 }
  0xb4   :  { %3154 = vmatprep.subr.bf16.mxu0 %v5275_v9  ;;  %1292 = vmatpush1.bf16.msra.mxu1 %v4100_v41  ;;  %v4304_v41 = vld [vmem:[#allocation9 + $0x98] ss:$12 sps:$4 sm:$0xff]  }
  0xb5   :  { %1293 = vmatprep.subr.bf16.mxu1 %v4103_v43  ;;  %v4310_v43 = vld [vmem:[#allocation9 + $0xb0] ss:$12 sps:$4 sm:$0xff]  }
  0xb7   :  { %3155 = vmatpush3.bf16.msra.mxu0 %v4280_v34 }
  0xb8   :  { %3156 = vmatprep.subr.bf16.mxu0 %v5275_v9  ;;  %1294 = vmatpush1.bf16.msra.mxu1 %v4109_v46 }
  0xb9   :  { %1295 = vmatprep.subr.bf16.mxu1 %v4113_v48 }
  0xbb   :  { %3157 = vmatpush3.bf16.msra.mxu0 %v4286_v42 }
  0xbc   :  { %3158 = vmatprep.subr.bf16.mxu0 %v5275_v9  ;;  %1296 = vmatpush1.bf16.msra.mxu1 %v4117_v50 }
  0xbd   :  { %1297 = vmatprep.subr.bf16.mxu1 %v4121_v52 }
  0xbf   :  { %3159 = vmatpush3.bf16.msra.mxu0 %v4292_v37 }
  0xc0   :  { %3160 = vmatprep.subr.bf16.mxu0 %v5275_v9  ;;  %1298 = vmatpush1.bf16.msra.mxu1 %v4128_v55 }
  0xc1   :  { %1299 = vmatprep.subr.bf16.mxu1 %v4131_v57 }
  0xc3   :  { %3161 = vmatpush3.bf16.msra.mxu0 %v4298_v39 }
  0xc4   :  { %3162 = vmatprep.subr.bf16.mxu0 %v5275_v9  ;;  %1300 = vmatpush1.bf16.msra.mxu1 %v4136_v59 }
  0xc5   :  { %1301 = vmatprep.subr.bf16.mxu1 %v4139_v61 }
  0xc7   :  { %3163 = vmatpush3.bf16.msra.mxu0 %v4304_v41 }
  0xc8   :  { %3164 = vmatprep.subr.bf16.mxu0 %v5275_v9  ;;  %1302 = vmatpush1.bf16.msra.mxu1 %v4145_v1 }
  0xc9   :  { %1303 = vmatprep.subr.bf16.mxu1 %v4149_v3 }
  0xcb   :  { %3165 = vmatpush3.bf16.msra.mxu0 %v4310_v43 }
  0xcc   :  { %3170 = vmatprep.subr.bf16.mxu0 %v5275_v9  ;;  %1304 = vmatpush1.bf16.msra.mxu1 %v4154_v5 }
  0xcd   :  { %1400 = vmatprep.subr.bf16.mxu1 %v4157_v6 }
  0xce   :  { %3167 = vmatmul.mubr.bf16.vlgmr.msra.gmra.mrb[36].mxu0 %v5278_v0 }
  0xcf   :  { %3171 = vmatpush3.bf16.msra.mxu0 %v4161_v7  ;;  %3186 = vmatprep.mubr.msk.bf16.mxu0 %vm3989_vm4, %v5275_v9 }
  0xd0   :  { %3172 = vmatprep.subr.bf16.mxu0 %v5275_v9 }
  0xd3   :  { %3173 = vmatpush3.bf16.msra.mxu0 %v4172_v11 }
  0xd4   :  { %3174 = vmatprep.subr.bf16.mxu0 %v5275_v9 }
  0xd7   :  { %3175 = vmatpush3.bf16.msra.mxu0 %v4184_v14 }
  0xd8   :  { %3176 = vmatprep.subr.bf16.mxu0 %v5275_v9 }
  0xdb   :  { %3177 = vmatpush3.bf16.msra.mxu0 %v4204_v19 }
  0xdc   :  { %3178 = vmatprep.subr.bf16.mxu0 %v5275_v9 }
  0xdf   :  { %3179 = vmatpush3.bf16.msra.mxu0 %v4217_v23 }
  0xe0   :  { %3180 = vmatprep.subr.bf16.mxu0 %v5275_v9 }
  0xe3   :  { %3181 = vmatpush3.bf16.msra.mxu0 %v4230_v27 }
  0xe4   :  { %3182 = vmatprep.subr.bf16.mxu0 %v5275_v9 }
  0xe7   :  { %3183 = vmatpush3.bf16.msra.mxu0 %v4243_v31 }
  0xe8   :  { %3184 = vmatprep.subr.bf16.mxu0 %v5275_v9 }
  0xeb   :  { %3185 = vmatpush3.bf16.msra.mxu0 %v4254_v35 }
  0xec   :  { %3190 = vmatprep.subr.bf16.mxu0 %v5275_v9  ;;  %v1975_v9 = vsel %vm1870_vm8, 1, %v5278_v0 }
  0xed   :  { %1977 = vperm.xlu1 %3465, %v1975_v9  }
 0x141   :  { %v4364_v4 = vpop.f32.mrb[0].mxu0  ;;  %v4366_v18 = vpop.f32.mrb[0].mxu1 }
 0x142   :  { %v4369_v22 = vpop.f32.mrb[1].mxu0  ;;  %v547_v26 = vpop.f32.mrb[1].mxu1 }
 0x143   :  { %v476_v44 = vpop.f32.mrb[2].mxu0  ;;  %v4375_v47 = vadd.f32 %v547_v26, %v4355_v60  ;;  %v549_v49 = vpop.f32.mrb[2].mxu1 }
 0x144   :  { %v4378_v51 = vadd.f32 %v476_v44, %v4358_v62  ;;  %v478_v53 = vpop.f32.mrb[3].mxu0  ;;  %v4381_v54 = vadd.f32 %v549_v49, %v4361_v63  ;;  %v551_v17 = vpop.f32.mrb[3].mxu1 }
 0x145   :  { %5317 = vst [vmem:[#allocation21_spill] sm:$0xff] %v4375_v47  ;;  %v4385_v6 = vadd.f32 %v478_v53, %v4372_v30  ;;  %v4388_v58 = vadd.f32 %v551_v17, %v4355_v60 }
 0x146   :  { %5318 = vst [vmem:[#allocation22_spill] sm:$0xff] %v4378_v51  ;;  %5319 = vst [vmem:[#allocation23_spill] sm:$0xff] %v4381_v54 }
 0x147   :  { %5320 = vst [vmem:[#allocation24_spill] sm:$0xff] %v4385_v6  ;;  %5321 = vst [vmem:[#allocation25_spill] sm:$0xff] %v4388_v58 }
 0x149   :  { %v482_v26 = vpop.f32.mrb[4].mxu0  ;;  %v555_v47 = vpop.f32.mrb[4].mxu1 }
 0x14a   :  { %v4391_v2 = vadd.f32 %v482_v26, %v4358_v62  ;;  %v484_v44 = vpop.f32.mrb[5].mxu0  ;;  %v4394_v51 = vadd.f32 %v555_v47, %v4361_v63  ;;  %v557_v49 = vpop.f32.mrb[5].mxu1 }
 0x14b   :  { %v4397_v54 = vadd.f32 %v484_v44, %v4372_v30  ;;  %v486_v0 = vpop.f32.mrb[6].mxu0  ;;  %v4400_v53 = vadd.f32 %v557_v49, %v4355_v60  ;;  %v559_v17 = vpop.f32.mrb[6].mxu1 }
 0x14c   :  { %5322 = vst [vmem:[#allocation26_spill] sm:$0xff] %v4391_v2  ;;  %5323 = vst [vmem:[#allocation27_spill] sm:$0xff] %v4394_v51  ;;  %v4403_v9 = vadd.f32 %v486_v0, %v4358_v62  ;;  %v488_v58 = vpop.f32.mrb[7].mxu0  ;;  %v4406_v26 = vadd.f32 %v559_v17, %v4361_v63  ;;  %v561_v2 = vpop.f32.mrb[7].mxu1 }
 0x14d   :  { %5324 = vst [vmem:[#allocation28_spill] sm:$0xff] %v4397_v54  ;;  %5325 = vst [vmem:[#allocation29_spill] sm:$0xff] %v4400_v53  ;;  %v4409_v47 = vadd.f32 %v488_v58, %v4372_v30  ;;  %v4412_v51 = vadd.f32 %v561_v2, %v4355_v60 }
 0x14e   :  { %5326 = vst [vmem:[#allocation30_spill] sm:$0xff] %v4403_v9  ;;  %5327 = vst [vmem:[#allocation31_spill] sm:$0xff] %v4406_v26 }
 0x14f   :  { %5328 = vst [vmem:[#allocation32_spill] sm:$0xff] %v4409_v47  ;;  %5329 = vst [vmem:[#allocation33_spill] sm:$0xff] %v4412_v51 }
 0x151   :  { %v492_v44 = vpop.f32.mrb[8].mxu0  ;;  %v565_v54 = vpop.f32.mrb[8].mxu1 }
 0x152   :  { %v4415_v49 = vadd.f32 %v492_v44, %v4358_v62  ;;  %v494_v53 = vpop.f32.mrb[9].mxu0  ;;  %v4418_v0 = vadd.f32 %v565_v54, %v4361_v63  ;;  %v567_v9 = vpop.f32.mrb[9].mxu1 }
 0x153   :  { %v4421_v17 = vadd.f32 %v494_v53, %v4372_v30  ;;  %v496_v26 = vpop.f32.mrb[10].mxu0  ;;  %v4424_v58 = vadd.f32 %v567_v9, %v4355_v60  ;;  %v569_v47 = vpop.f32.mrb[10].mxu1 }
 0x154   :  { %5330 = vst [vmem:[#allocation34_spill] sm:$0xff] %v4415_v49  ;;  %5331 = vst [vmem:[#allocation35_spill] sm:$0xff] %v4418_v0  ;;  %v4427_v2 = vadd.f32 %v496_v26, %v4358_v62  ;;  %v498_v51 = vpop.f32.mrb[11].mxu0  ;;  %v4430_v44 = vadd.f32 %v569_v47, %v4361_v63  ;;  %v571_v49 = vpop.f32.mrb[11].mxu1  ;;  %v162_v47 = vsub.s32 4, %v4338_v45 }
 0x155   :  { %5332 = vst [vmem:[#allocation36_spill] sm:$0xff] %v4421_v17  ;;  %5333 = vst [vmem:[#allocation37_spill] sm:$0xff] %v4424_v58  ;;  %v4433_v54 = vadd.f32 %v498_v51, %v4372_v30  ;;  %v4436_v0 = vadd.f32 %v571_v49, %v4355_v60 }
 0x156   :  { %5334 = vst [vmem:[#allocation38_spill] sm:$0xff] %v4427_v2  ;;  %5335 = vst [vmem:[#allocation39_spill] sm:$0xff] %v4430_v44 }
 0x157   :  { %5336 = vst [vmem:[#allocation40_spill] sm:$0xff] %v4433_v54  ;;  %5337 = vst [vmem:[#allocation41_spill] sm:$0xff] %v4436_v0  ;;  %v166_v0 = vsub.s32 5, %v4338_v45  ;;  %v475_v45 = vadd.f32 %v4369_v22, %v4372_v30 }
 0x159   :  { %v502_v53 = vpop.f32.mrb[12].mxu0  ;;  %v575_v17 = vpop.f32.mrb[12].mxu1 }
 0x15a   :  { %v4439_v9 = vadd.f32 %v502_v53, %v4358_v62  ;;  %v504_v58 = vpop.f32.mrb[13].mxu0  ;;  %v4442_v26 = vadd.f32 %v575_v17, %v4361_v63  ;;  %v577_v2 = vpop.f32.mrb[13].mxu1 }
 0x15b   :  { %v4446_v44 = vadd.f32 %v504_v58, %v4372_v30  ;;  %v506_v51 = vpop.f32.mrb[14].mxu0  ;;  %v4449_v54 = vadd.f32 %v577_v2, %v4355_v60  ;;  %v579_v49 = vpop.f32.mrb[14].mxu1  ;;  %v163_v58 = vrot.slane %v4350_v56, %v162_v47  ;;  %v473_v2 = vadd.f32 %v4364_v4, %v4358_v62 }
 0x15c   :  { %5338 = vst [vmem:[#allocation42_spill] sm:$0xff] %v4439_v9  ;;  %5339 = vst [vmem:[#allocation43_spill] sm:$0xff] %v4442_v26  ;;  %v4453_v53 = vadd.f32 %v506_v51, %v4358_v62  ;;  %v508_v9 = vpop.f32.mrb[15].mxu0  ;;  %v4456_v17 = vadd.f32 %v579_v49, %v4361_v63  ;;  %v581_v26 = vpop.f32.mrb[15].mxu1 }
 0x15d   :  { %5340 = vst [vmem:[#allocation44_spill] sm:$0xff] %v4446_v44  ;;  %5341 = vst [vmem:[#allocation45_spill] sm:$0xff] %v4449_v54  ;;  %v4459_v6 = vadd.f32 %v508_v9, %v4372_v30  ;;  %v4463_v44 = vrot.slane %v4350_v56, %v166_v0 }
 0x15e   :  { %5342 = vst [vmem:[#allocation46_spill] sm:$0xff] %v4453_v53  ;;  %5343 = vst [vmem:[#allocation47_spill] sm:$0xff] %v4456_v17 }
 0x15f   :  { %5344 = vst [vmem:[#allocation48_spill] sm:$0xff] %v4459_v6 }
 0x161   :  { %v618_v51 = vpop.f32.mrb[16].mxu0  ;;  %v960_v53 = vpop.f32.mrb[16].mxu1 }
 0x162   :  { %v4469_v54 = vadd.f32 %v618_v51, %v163_v58  ;;  %v1007_v49 = vadd.f32 %v960_v53, %v473_v2  ;;  %v620_v17 = vpop.f32.mrb[17].mxu0  ;;  %v962_v35 = vpop.f32.mrb[17].mxu1 }
 0x163   :  { %v4472_v9 = vadd.f32 %v620_v17, %v4463_v44  ;;  %v1014_v47 = vadd.f32 %v962_v35, %v475_v45  ;;  %v622_v6 = vpop.f32.mrb[18].mxu0  ;;  %v964_v56 = vpop.f32.mrb[18].mxu1 }
 0x164   :  { %5345 = vst [vmem:[#allocation49_spill] sm:$0xff] %v4469_v54  ;;  %v2918_v0 = vmul.f32 -1.442695, %v1007_v49  ;;  %v4474_v5 = vadd.f32 %v622_v6, %v163_v58  ;;  %v624_v62 = vpop.f32.mrb[19].mxu0  ;;  %v965_v4 = vpop.f32.mrb[19].mxu1 }
 0x165   :  { %5346 = vst [vmem:[#allocation50_spill] sm:$0xff] %v4472_v9  ;;  %v4477_v22 = vadd.f32 %v624_v62, %v4463_v44  ;;  %v2919_v49 = vmul.f32 -1.442695, %v1014_v47 }
 0x166   :  { %5347 = vst [vmem:[#allocation51_spill] sm:$0xff] %v4474_v5  ;;  %3606 = vpow2.f32 %v2918_v0 }
 0x167   :  { %5348 = vst [vmem:[#allocation52_spill] sm:$0xff] %v4477_v22  ;;  %3608 = vpow2.f32 %v2919_v49 }
 0x169   :  { %v628_v30 = vpop.f32.mrb[20].mxu0 }
 0x16a   :  { %v4479_v51 = vadd.f32 %v628_v30, %v163_v58  ;;  %v630_v53 = vpop.f32.mrb[21].mxu0 }
 0x16b   :  { %v4482_v2 = vadd.f32 %v630_v53, %v4463_v44  ;;  %v632_v17 = vpop.f32.mrb[22].mxu0 }
 0x16c   :  { %5349 = vst [vmem:[#allocation53_spill] sm:$0xff] %v4479_v51  ;;  %v4484_v35 = vadd.f32 %v632_v17, %v163_v58  ;;  %v634_v45 = vpop.f32.mrb[23].mxu0 }
 0x16d   :  { %5350 = vst [vmem:[#allocation54_spill] sm:$0xff] %v4482_v2  ;;  %v4487_v6 = vadd.f32 %v634_v45, %v4463_v44 }
 0x16e   :  { %5351 = vst [vmem:[#allocation55_spill] sm:$0xff] %v4484_v35 }
 0x16f   :  { %5352 = vst [vmem:[#allocation56_spill] sm:$0xff] %v4487_v6 }
 0x170   :  { %v3607_v4 = vpop.eup %3606 }
 0x171   :  { %v638_v56 = vpop.f32.mrb[24].mxu0  ;;  %v1011_v17 = vadd.f32 1.0, %v3607_v4 }
 0x172   :  { %v4489_v62 = vadd.f32 %v638_v56, %v163_v58  ;;  %v640_v0 = vpop.f32.mrb[25].mxu0 }
 0x173   :  { %v4492_v30 = vadd.f32 %v640_v0, %v4463_v44  ;;  %v642_v9 = vpop.f32.mrb[26].mxu0  ;;  %3610 = vrcp.f32 %v1011_v17  ;;  %v3609_v0 = vpop.eup %3608 }
 0x174   :  { %5353 = vst [vmem:[#allocation57_spill] sm:$0xff] %v4489_v62  ;;  %v4494_v53 = vadd.f32 %v642_v9, %v163_v58  ;;  %v644_v54 = vpop.f32.mrb[27].mxu0  ;;  %v4509_v9 = vld [vmem:[%s5272_s6] ss:$0 sm:$0xff]  ;;  %v1018_v4 = vadd.f32 1.0, %v3609_v0 }
 0x175   :  { %5354 = vst [vmem:[#allocation58_spill] sm:$0xff] %v4492_v30  ;;  %v4497_v22 = vadd.f32 %v644_v54, %v4463_v44  ;;  %v582_v54 = vadd.f32 %v581_v26, %v4355_v60 }
 0x176   :  { %5355 = vst [vmem:[#allocation59_spill] sm:$0xff] %v4494_v53  ;;  %3612 = vrcp.f32 %v1018_v4 }
 0x177   :  { %5356 = vst [vmem:[#allocation60_spill] sm:$0xff] %v4497_v22 }
 0x179   :  { %v648_v45 = vpop.f32.mrb[28].mxu0 }
 0x17a   :  { %v4499_v47 = vadd.f32 %v648_v45, %v163_v58  ;;  %v650_v5 = vpop.f32.mrb[29].mxu0 }
 0x17b   :  { %v4502_v56 = vadd.f32 %v650_v5, %v4463_v44  ;;  %v652_v49 = vpop.f32.mrb[30].mxu0 }
 0x17c   :  { %5357 = vst [vmem:[#allocation61_spill] sm:$0xff] %v4499_v47  ;;  %v4504_v2 = vpop.f32.mrb[31].mxu0  ;;  %v653_v17 = vadd.f32 %v652_v49, %v163_v58  ;;  %v546_v47 = vadd.f32 %v4366_v18, %v4361_v63 }
 0x17d   :  { %5358 = vst [vmem:[#allocation62_spill] sm:$0xff] %v4502_v56  ;;  %v3611_v62 = vpop.eup %3610 }
 0x180   :  { %v3613_v49 = vpop.eup %3612 }
 0x181   :  { %v1001_v51 = vpop.f32.mrb[32].mxu0  ;;  %v1198_v45 = vpop.f32.mrb[20].mxu1 }
 0x182   :  { %v1021_v6 = vadd.f32 %v4509_v9, %v1001_v51  ;;  %v1245_v35 = vadd.f32 %v1198_v45, %v582_v54  ;;  %v3148_v5 = vpop.f32.mrb[33].mxu0  ;;  %v1200_v30 = vpop.f32.mrb[21].mxu1  ;;  %v1025_v54 = vsub.f32 1.0, %v3613_v49 }
 0x183   :  { %v1252_v22 = vadd.f32 %v1200_v30, %v653_v17  ;;  %v1004_v53 = vpop.f32.mrb[34].mxu0  ;;  %v1202_v56 = vpop.f32.mrb[22].mxu1 }
 0x184   :  { %v1022_v3 = vmul.f32 %v3611_v62, %v1021_v6  ;;  %v2944_v31 = vmul.f32 -1.442695, %v1245_v35  ;;  %v3149_v60 = vpop.f32.mrb[35].mxu0  ;;  %v1203_v26 = vpop.f32.mrb[23].mxu1  ;;  %v1027_v53 = vmul.f32 0.0, %v3613_v49 }
 0x185   :  { %v2945_v51 = vmul.f32 -1.442695, %v1252_v22  ;;  %v4515_v5 = vpop.permute.xlu0 %1031  ;;  %v5361_v22 = vmov 0   ;;  %v4537_v6 = vld [vmem:[%s5273_s7] ss:$0 sm:$0xff]  ;;  %v655_v26 = vadd.f32 %v4504_v2, %v4463_v44 }
 0x186   :  { %v1023_v58 = vadd.f32 %v1022_v3, %v546_v47  ;;  %3614 = vpow2.f32 %v2944_v31  ;;  %5359 = vst [vmem:[#allocation63_spill] sm:$0xff] %v4515_v5  ;;  %vm1033_vm9 = vcmp.eq.s32.totalorder %v4515_v5, 1  ;;  %v5360_v31 = vmov 0.0  }
 0x187   :  { %vm2946_vm10 = vmpackc.low %vm1033_vm9, %vm1033_vm9 }
 0x188   :  { %3616 = vtanh.f32 %v1023_v58 }
 0x189   :  { %3618 = vpow2.f32 %v2945_v51 }
 0x190   :  { %v3615_v0 = vpop.eup %3614 }
 0x191   :  { %v1249_v63 = vadd.f32 1.0, %v3615_v0 }
 0x192   :  { %v3617_v45 = vpop.eup %3616 }
 0x193   :  { %v1026_v30 = vmul.f32 %v3617_v45, %v1025_v54  ;;  %3620 = vrcp.f32 %v1249_v63  ;;  %v3619_v35 = vpop.eup %3618 }
 0x194   :  { %v1256_v62 = vadd.f32 1.0, %v3619_v35  ;;  %v4580_v35 = vld [vmem:[#allocation8] ss:$12 sps:$4 sm:$0xff]  }
 0x195   :  { %v4518_v18 = vadd.f32 %v1027_v53, %v1026_v30  ;;  %v4564_v30 = vpop.permute.xlu0 %1269 }
 0x196   :  { %3622 = vrcp.f32 %v1256_v62  ;;  %5362 = vst [vmem:[#allocation64_spill] sm:$0xff] %v4564_v30  ;;  %vm1271_vm11 = vcmp.eq.s32.totalorder %v4564_v30, 1  ;;  %v4584_v62 = vld [vmem:[#allocation8 + $0x1c] ss:$12 sps:$4 sm:$0xff]  }
 0x197   :  { %v2947_v3 = vpack.c.bf16 %v4518_v18, %v4518_v18  ;;  %vm2954_vm12 = vmpackc.low %vm1271_vm11, %vm1271_vm11 }
 0x199   :  { %2948 = vmatmul.mubr.msk.bf16.vlgmr.msra.gmra.mrb[24].mxu1 %vm2946_vm10, %v2947_v3  ;;  %3187 = vmatmul.mubr.msk.bf16.vlgmr.msra.gmra.mrb[40].mxu0 %vm2946_vm10, %v2947_v3  ;;  %v4573_v3 = vld [vmem:[#allocation8 + $0x4] ss:$12 sps:$4 sm:$0xff]  }
 0x19a   :  { %1401 = vmatpush1.bf16.msra.mxu1 %v4164_v8  ;;  %3191 = vmatpush3.bf16.msra.mxu0 %v4264_v38 }
 0x19b   :  { %1402 = vmatprep.subr.bf16.mxu1 %v4168_v10  ;;  %3192 = vmatprep.subr.bf16.mxu0 %v5360_v31 }
 0x19c   :  { %1432 = vmatprep.mubr.bf16.mxu1 %v5361_v22  ;;  %3206 = vmatprep.mubr.msk.bf16.mxu0 %vm3989_vm4, %v5360_v31 }
 0x19d   :  { %v3621_v17 = vpop.eup %3620 }
 0x19e   :  { %1403 = vmatpush1.bf16.msra.mxu1 %v4176_v12  ;;  %3193 = vmatpush3.bf16.msra.mxu0 %v4271_v40 }
 0x19f   :  { %1404 = vmatprep.subr.bf16.mxu1 %v4180_v13  ;;  %3194 = vmatprep.subr.bf16.mxu0 %v5360_v31 }
 0x1a0   :  { %v3623_v44 = vpop.eup %3622 }
 0x1a1   :  { %v1239_v47 = vpop.f32.mrb[36].mxu0  ;;  %v1263_v2 = vsub.f32 1.0, %v3623_v44  ;;  %v1265_v54 = vmul.f32 0.0, %v3623_v44 }
 0x1a2   :  { %v1259_v56 = vadd.f32 %v4537_v6, %v1239_v47  ;;  %v3168_v4 = vpop.f32.mrb[37].mxu0  ;;  %1405 = vmatpush1.bf16.msra.mxu1 %v4188_v15  ;;  %3195 = vmatpush3.bf16.msra.mxu0 %v4280_v34  ;;  %v4591_v47 = vld [vmem:[#allocation8 + $0x18] ss:$12 sps:$4 sm:$0xff]  }
 0x1a3   :  { %v1242_v60 = vpop.f32.mrb[38].mxu0  ;;  %1406 = vmatprep.subr.bf16.mxu1 %v4192_v16  ;;  %3196 = vmatprep.subr.bf16.mxu0 %v5360_v31 }
 0x1a4   :  { %v1260_v58 = vmul.f32 %v3621_v17, %v1259_v56  ;;  %v3169_v49 = vpop.f32.mrb[39].mxu0  ;;  %v4595_v56 = vld [vmem:[#allocation8 + $0x34] ss:$12 sps:$4 sm:$0xff]  }
 0x1a6   :  { %v1261_v51 = vadd.f32 %v1260_v58, %v655_v26  ;;  %1407 = vmatpush1.bf16.msra.mxu1 %v4206_v20  ;;  %3197 = vmatpush3.bf16.msra.mxu0 %v4286_v42 }
 0x1a7   :  { %1408 = vmatprep.subr.bf16.mxu1 %v4211_v21  ;;  %3198 = vmatprep.subr.bf16.mxu0 %v5360_v31 }
 0x1a8   :  { %3624 = vtanh.f32 %v1261_v51 }
 0x1aa   :  { %1409 = vmatpush1.bf16.msra.mxu1 %v4219_v24  ;;  %3199 = vmatpush3.bf16.msra.mxu0 %v4292_v37 }
 0x1ab   :  { %1410 = vmatprep.subr.bf16.mxu1 %v4224_v25  ;;  %3200 = vmatprep.subr.bf16.mxu0 %v5360_v31 }
 0x1ae   :  { %1411 = vmatpush1.bf16.msra.mxu1 %v4232_v28  ;;  %3201 = vmatpush3.bf16.msra.mxu0 %v4298_v39 }
 0x1af   :  { %1412 = vmatprep.subr.bf16.mxu1 %v4237_v29  ;;  %3202 = vmatprep.subr.bf16.mxu0 %v5360_v31 }
 0x1b2   :  { %v3625_v0 = vpop.eup %3624  ;;  %1413 = vmatpush1.bf16.msra.mxu1 %v4245_v32  ;;  %3203 = vmatpush3.bf16.msra.mxu0 %v4304_v41 }
 0x1b3   :  { %1414 = vmatprep.subr.bf16.mxu1 %v4249_v33  ;;  %3204 = vmatprep.subr.bf16.mxu0 %v5360_v31  ;;  %v1264_v45 = vmul.f32 %v3625_v0, %v1263_v2 }
 0x1b5   :  { %v4567_v53 = vadd.f32 %v1265_v54, %v1264_v45 }
 0x1b6   :  { %1415 = vmatpush1.bf16.msra.mxu1 %v4256_v36  ;;  %3205 = vmatpush3.bf16.msra.mxu0 %v4310_v43 }
 0x1b7   :  { %v2955_v63 = vpack.c.bf16 %v4567_v53, %v4567_v53  ;;  %1525 = vmatprep.subr.bf16.mxu1 %v4573_v3  ;;  %3210 = vmatprep.subr.bf16.mxu0 %v5360_v31 }
 0x1b9   :  { %2956 = vmatmul.mubr.msk.bf16.vlgmr.msra.gmra.mrb[28].mxu1 %vm2954_vm12, %v2955_v63  ;;  %3207 = vmatmul.mubr.msk.bf16.vlgmr.msra.gmra.mrb[44].mxu0 %vm2954_vm12, %v2955_v63 }
 0x1ba   :  { %1526 = vmatpush1.bf16.msra.mxu1 %v4580_v35  ;;  %3211 = vmatpush3.bf16.msra.mxu0 %v4161_v7 }
 0x1bb   :  { %1527 = vmatprep.subr.bf16.mxu1 %v4584_v62  ;;  %3212 = vmatprep.subr.bf16.mxu0 %v5360_v31 }
 0x1bc   :  { %1557 = vmatprep.mubr.bf16.mxu1 %v5361_v22  ;;  %3226 = vmatprep.mubr.msk.bf16.mxu0 %vm3989_vm4, %v5360_v31 }
 0x1be   :  { %1528 = vmatpush1.bf16.msra.mxu1 %v4591_v47  ;;  %3213 = vmatpush3.bf16.msra.mxu0 %v4172_v11 }
 0x1bf   :  { %1529 = vmatprep.subr.bf16.mxu1 %v4595_v56  ;;  %3214 = vmatprep.subr.bf16.mxu0 %v5360_v31 }
 0x1c2   :  { %1530 = vmatpush1.bf16.msra.mxu1 %v4109_v46  ;;  %3215 = vmatpush3.bf16.msra.mxu0 %v4184_v14  ;;  %v5363_v46 = vld [vmem:[#allocation19_spill] sm:$0xff]  ;;  %v5369_v14 = vld [vmem:[#allocation24_spill] sm:$0xff] }
 0x1c3   :  { %1531 = vmatprep.subr.bf16.mxu1 %v4113_v48  ;;  %3216 = vmatprep.subr.bf16.mxu0 %v5360_v31  ;;  %v5364_v48 = vld [vmem:[#allocation16_spill] sm:$0xff] }
 0x1c6   :  { %1532 = vmatpush1.bf16.msra.mxu1 %v4117_v50  ;;  %3217 = vmatpush3.bf16.msra.mxu0 %v4204_v19  ;;  %v5365_v50 = vld [vmem:[#allocation17_spill] sm:$0xff] }
 0x1c7   :  { %1533 = vmatprep.subr.bf16.mxu1 %v4121_v52  ;;  %3218 = vmatprep.subr.bf16.mxu0 %v5360_v31  ;;  %v5366_v52 = vld [vmem:[#allocation20_spill] sm:$0xff] }
 0x1ca   :  { %1534 = vmatpush1.bf16.msra.mxu1 %v4128_v55  ;;  %3219 = vmatpush3.bf16.msra.mxu0 %v4217_v23  ;;  %v5367_v55 = vld [vmem:[#allocation18_spill] sm:$0xff] }
 0x1cb   :  { %1535 = vmatprep.subr.bf16.mxu1 %v4131_v57  ;;  %3220 = vmatprep.subr.bf16.mxu0 %v5360_v31 }
 0x1ce   :  { %1536 = vmatpush1.bf16.msra.mxu1 %v4136_v59  ;;  %3221 = vmatpush3.bf16.msra.mxu0 %v4230_v27 }
 0x1cf   :  { %1537 = vmatprep.subr.bf16.mxu1 %v4139_v61  ;;  %3222 = vmatprep.subr.bf16.mxu0 %v5360_v31  ;;  %v5368_v61 = vld [vmem:[#allocation22_spill] sm:$0xff] }
 0x1d2   :  { %1538 = vmatpush1.bf16.msra.mxu1 %v4145_v1  ;;  %3223 = vmatpush3.bf16.msra.mxu0 %v5363_v46 }
 0x1d3   :  { %1539 = vmatprep.subr.bf16.mxu1 %v5364_v48  ;;  %3224 = vmatprep.subr.bf16.mxu0 %v5360_v31 }
 0x1d6   :  { %1540 = vmatpush1.bf16.msra.mxu1 %v5365_v50  ;;  %3225 = vmatpush3.bf16.msra.mxu0 %v5366_v52  ;;  %v1034_v50 = vsel %vm1033_vm9, %v4518_v18, 0.0 }
 0x1d7   :  { %1636 = vmatprep.subr.bf16.mxu1 %v5367_v55  ;;  %3230 = vmatprep.subr.bf16.mxu0 %v5360_v31 }
 0x26c   :  { %v1323_v57 = vpop.f32.mrb[24].mxu1  ;;  %v1364_v59 = vpop.f32.mrb[40].mxu0 }
 0x26d   :  { %v1370_v7 = vadd.f32 %v1323_v57, %v5368_v61  ;;  %v1325_v11 = vpop.f32.mrb[25].mxu1  ;;  %v3188_v1 = vpop.f32.mrb[41].mxu0  ;;  %v1384_v45 = vadd.f32 %v4509_v9, %v1364_v59  ;;  %v5370_v61 = vld [vmem:[#allocation23_spill] sm:$0xff] }
 0x26e   :  { %v1377_v4 = vadd.f32 %v1325_v11, %v5369_v14  ;;  %v1327_v17 = vpop.f32.mrb[26].mxu1  ;;  %v1367_v60 = vpop.f32.mrb[42].mxu0  ;;  %v5371_v14 = vld [vmem:[#allocation45_spill] sm:$0xff] }
 0x26f   :  { %v2952_v26 = vmul.f32 -1.442695, %v1370_v7  ;;  %v1328_v58 = vpop.f32.mrb[27].mxu1  ;;  %v3189_v49 = vpop.f32.mrb[43].mxu0 }
 0x270   :  { %v2953_v51 = vmul.f32 -1.442695, %v1377_v4 }
 0x271   :  { %3626 = vpow2.f32 %v2952_v26  ;;  %v5372_v26 = vld [vmem:[#allocation61_spill] sm:$0xff] }
 0x272   :  { %3628 = vpow2.f32 %v2953_v51 }
 0x27b   :  { %v3627_v44 = vpop.eup %3626 }
 0x27c   :  { %v3629_v2 = vpop.eup %3628  ;;  %v1374_v0 = vadd.f32 1.0, %v3627_v44 }
 0x27d   :  { %v1381_v54 = vadd.f32 1.0, %v3629_v2 }
 0x27e   :  { %3630 = vrcp.f32 %v1374_v0 }
 0x27f   :  { %3632 = vrcp.f32 %v1381_v54 }
 0x288   :  { %v3631_v63 = vpop.eup %3630 }
 0x289   :  { %v3633_v48 = vpop.eup %3632  ;;  %v1385_v55 = vmul.f32 %v3631_v63, %v1384_v45  ;;  %v4632_v45 = vpop.permute.xlu1 %1394 }
 0x28a   :  { %v1390_v57 = vmul.f32 %v3633_v48, %v1034_v50  ;;  %v1388_v18 = vsub.f32 1.0, %v3633_v48  ;;  %5373 = vst [vmem:[#allocation19_spill] sm:$0xff] %v4632_v45  ;;  %vm1396_vm13 = vcmp.eq.s32.totalorder %v4632_v45, 1  ;;  %v5395_v45 = vld [vmem:[#allocation32_spill] sm:$0xff] }
 0x28b   :  { %v1386_v7 = vadd.f32 %v1385_v55, %v5370_v61 }
 0x28c   :  { %v1434_v11 = vpop.f32.mrb[28].mxu1  ;;  %v1475_v1 = vpop.f32.mrb[44].mxu0 }
 0x28d   :  { %3634 = vtanh.f32 %v1386_v7  ;;  %v1481_v4 = vadd.f32 %v1434_v11, %v5371_v14  ;;  %v1436_v17 = vpop.f32.mrb[29].mxu1  ;;  %v3208_v60 = vpop.f32.mrb[45].mxu0 }
 0x28e   :  { %v1488_v58 = vadd.f32 %v1436_v17, %v5372_v26  ;;  %v1438_v59 = vpop.f32.mrb[30].mxu1  ;;  %v1478_v49 = vpop.f32.mrb[46].mxu0  ;;  %v5383_v60 = vld [vmem:[#allocation26_spill] sm:$0xff] }
 0x28f   :  { %v2960_v51 = vmul.f32 -1.442695, %v1481_v4  ;;  %v1439_v44 = vpop.f32.mrb[31].mxu1  ;;  %v3209_v2 = vpop.f32.mrb[47].mxu0  ;;  %v5384_v49 = vld [vmem:[#allocation28_spill] sm:$0xff] }
 0x290   :  { %v2961_v0 = vmul.f32 -1.442695, %v1488_v58 }
 0x291   :  { %3636 = vpow2.f32 %v2960_v51 }
 0x292   :  { %3638 = vpow2.f32 %v2961_v0 }
 0x297   :  { %v3635_v54 = vpop.eup %3634 }
 0x298   :  { %v1389_v63 = vmul.f32 %v3635_v54, %v1388_v18 }
 0x29a   :  { %v1391_v55 = vadd.f32 %v1390_v57, %v1389_v63  ;;  %v4747_v57 = vld [vmem:[#allocation8 + $0xa8] ss:$12 sps:$4 sm:$0xff]  }
 0x29b   :  { %v3637_v61 = vpop.eup %3636  ;;  %5381 = vst [vmem:[#allocation23_spill] sm:$0xff] %v4747_v57 }
 0x29c   :  { %v3639_v7 = vpop.eup %3638  ;;  %v1485_v11 = vadd.f32 1.0, %v3637_v61  ;;  %v4637_v14 = vsel %vm1396_vm13, %v1391_v55, %v1034_v50  ;;  %v1272_v50 = vsel %vm1271_vm11, %v4567_v53, 0.0  ;;  %v4739_v53 = vld [vmem:[#allocation8 + $0x90] ss:$12 sps:$4 sm:$0xff]  }
 0x29d   :  { %v1492_v4 = vadd.f32 1.0, %v3639_v7  ;;  %v1524_v17 = vpack.c.bf16 %v4637_v14, %v4637_v14  ;;  %5379 = vst [vmem:[#allocation22_spill] sm:$0xff] %v4739_v53 }
 0x29e   :  { %3640 = vrcp.f32 %v1485_v11 }
 0x29f   :  { %3642 = vrcp.f32 %v1492_v4  ;;  %1558 = vmatmul.mubr.bf16.vlgmr.msra.gmra.mrb[32].mxu1 %v1524_v17  ;;  %3227 = vmatmul.mubr.bf16.vlgmr.msra.gmra.mrb[48].mxu0 %v1524_v17 }
 0x2a0   :  { %1637 = vmatpush1.bf16.msra.mxu1 %v4164_v8  ;;  %3231 = vmatpush3.bf16.msra.mxu0 %v4264_v38  ;;  %v1495_v8 = vadd.f32 %v4537_v6, %v1475_v1 }
 0x2a1   :  { %1638 = vmatprep.subr.bf16.mxu1 %v4168_v10  ;;  %3232 = vmatprep.subr.bf16.mxu0 %v5360_v31 }
 0x2a2   :  { %1668 = vmatprep.mubr.bf16.mxu1 %v5361_v22  ;;  %3246 = vmatprep.mubr.msk.bf16.mxu0 %vm3989_vm4, %v5360_v31 }
 0x2a4   :  { %1639 = vmatpush1.bf16.msra.mxu1 %v4176_v12  ;;  %3233 = vmatpush3.bf16.msra.mxu0 %v4271_v40 }
 0x2a5   :  { %1640 = vmatprep.subr.bf16.mxu1 %v4180_v13  ;;  %3234 = vmatprep.subr.bf16.mxu0 %v5360_v31  ;;  %v5374_v13 = vld [vmem:[#allocation62_spill] sm:$0xff] }
 0x2a8   :  { %v3641_v38 = vpop.eup %3640  ;;  %1641 = vmatpush1.bf16.msra.mxu1 %v4188_v15  ;;  %3235 = vmatpush3.bf16.msra.mxu0 %v4280_v34  ;;  %v4711_v34 = vld [vmem:[#allocation8 + $0x4c] ss:$12 sps:$4 sm:$0xff]  }
 0x2a9   :  { %v3643_v10 = vpop.eup %3642  ;;  %v1496_v48 = vmul.f32 %v3641_v38, %v1495_v8  ;;  %1642 = vmatprep.subr.bf16.mxu1 %v4192_v16  ;;  %3236 = vmatprep.subr.bf16.mxu0 %v5360_v31  ;;  %v5385_v8 = vld [vmem:[#allocation27_spill] sm:$0xff] }
 0x2aa   :  { %v1501_v12 = vmul.f32 %v3643_v10, %v1272_v50  ;;  %v1499_v15 = vsub.f32 1.0, %v3643_v10 }
 0x2ab   :  { %v1497_v40 = vadd.f32 %v1496_v48, %v5374_v13 }
 0x2ac   :  { %1643 = vmatpush1.bf16.msra.mxu1 %v4206_v20  ;;  %3237 = vmatpush3.bf16.msra.mxu0 %v4286_v42  ;;  %v4715_v42 = vld [vmem:[#allocation8 + $0x48] ss:$12 sps:$4 sm:$0xff]  }
 0x2ad   :  { %3644 = vtanh.f32 %v1497_v40  ;;  %1644 = vmatprep.subr.bf16.mxu1 %v4211_v21  ;;  %3238 = vmatprep.subr.bf16.mxu0 %v5360_v31  ;;  %v4677_v21 = vpop.permute.xlu1 %1505 }
 0x2ae   :  { %5375 = vst [vmem:[#allocation16_spill] sm:$0xff] %v4677_v21  ;;  %vm1507_vm14 = vcmp.eq.s32.totalorder %v4677_v21, 1 }
 0x2b0   :  { %1645 = vmatpush1.bf16.msra.mxu1 %v4219_v24  ;;  %3239 = vmatpush3.bf16.msra.mxu0 %v4292_v37  ;;  %v4719_v37 = vld [vmem:[#allocation8 + $0x64] ss:$12 sps:$4 sm:$0xff]  }
 0x2b1   :  { %1646 = vmatprep.subr.bf16.mxu1 %v4224_v25  ;;  %3240 = vmatprep.subr.bf16.mxu0 %v5360_v31 }
 0x2b4   :  { %1647 = vmatpush1.bf16.msra.mxu1 %v4232_v28  ;;  %3241 = vmatpush3.bf16.msra.mxu0 %v4298_v39  ;;  %v4723_v39 = vld [vmem:[#allocation8 + $0x60] ss:$12 sps:$4 sm:$0xff]  }
 0x2b5   :  { %1648 = vmatprep.subr.bf16.mxu1 %v4237_v29  ;;  %3242 = vmatprep.subr.bf16.mxu0 %v5360_v31  ;;  %v4691_v29 = vld [vmem:[#allocation8 + $0x8] ss:$12 sps:$4 sm:$0xff]  }
 0x2b7   :  { %v3645_v16 = vpop.eup %3644 }
 0x2b8   :  { %v1500_v20 = vmul.f32 %v3645_v16, %v1499_v15  ;;  %1649 = vmatpush1.bf16.msra.mxu1 %v4245_v32  ;;  %3243 = vmatpush3.bf16.msra.mxu0 %v4304_v41  ;;  %v4700_v32 = vld [vmem:[#allocation8 + $0x20] ss:$12 sps:$4 sm:$0xff]   ;;  %v4727_v41 = vld [vmem:[#allocation8 + $0x7c] ss:$12 sps:$4 sm:$0xff]  }
 0x2b9   :  { %1650 = vmatprep.subr.bf16.mxu1 %v4249_v33  ;;  %3244 = vmatprep.subr.bf16.mxu0 %v5360_v31  ;;  %v4705_v33 = vld [vmem:[#allocation8 + $0x30] ss:$12 sps:$4 sm:$0xff]   ;;  %5376 = vst [vmem:[#allocation17_spill] sm:$0xff] %v4727_v41  ;;  %v5387_v15 = vld [vmem:[#allocation59_spill] sm:$0xff] }
 0x2ba   :  { %v1502_v24 = vadd.f32 %v1501_v12, %v1500_v20 }
 0x2bc   :  { %v4682_v25 = vsel %vm1507_vm14, %v1502_v24, %v1272_v50  ;;  %1651 = vmatpush1.bf16.msra.mxu1 %v4256_v36  ;;  %3245 = vmatpush3.bf16.msra.mxu0 %v4310_v43  ;;  %v4708_v36 = vld [vmem:[#allocation8 + $0x38] ss:$12 sps:$4 sm:$0xff]  }
 0x2bd   :  { %v1635_v28 = vpack.c.bf16 %v4682_v25, %v4682_v25  ;;  %1761 = vmatprep.subr.bf16.mxu1 %v4573_v3  ;;  %3250 = vmatprep.subr.bf16.mxu0 %v5360_v31  ;;  %v4731_v43 = vld [vmem:[#allocation8 + $0x78] ss:$12 sps:$4 sm:$0xff]  }
 0x2be   :  { %5377 = vst [vmem:[#allocation20_spill] sm:$0xff] %v4731_v43  ;;  %v5386_v50 = vld [vmem:[#allocation41_spill] sm:$0xff] }
 0x2bf   :  { %1669 = vmatmul.mubr.bf16.vlgmr.msra.gmra.mrb[36].mxu1 %v1635_v28  ;;  %3247 = vmatmul.mubr.bf16.vlgmr.msra.gmra.mrb[52].mxu0 %v1635_v28 }
 0x2c0   :  { %1762 = vmatpush1.bf16.msra.mxu1 %v4580_v35  ;;  %3251 = vmatpush3.bf16.msra.mxu0 %v4691_v29 }
 0x2c1   :  { %1763 = vmatprep.subr.bf16.mxu1 %v4584_v62  ;;  %3252 = vmatprep.subr.bf16.mxu0 %v5360_v31 }
 0x2c2   :  { %1793 = vmatprep.mubr.bf16.mxu1 %v5361_v22  ;;  %3266 = vmatprep.mubr.msk.bf16.mxu0 %vm3989_vm4, %v5360_v31 }
 0x2c4   :  { %1764 = vmatpush1.bf16.msra.mxu1 %v4591_v47  ;;  %3253 = vmatpush3.bf16.msra.mxu0 %v4700_v32 }
 0x2c5   :  { %1765 = vmatprep.subr.bf16.mxu1 %v4595_v56  ;;  %3254 = vmatprep.subr.bf16.mxu0 %v5360_v31 }
 0x2c8   :  { %1766 = vmatpush1.bf16.msra.mxu1 %v4705_v33  ;;  %3255 = vmatpush3.bf16.msra.mxu0 %v4708_v36 }
 0x2c9   :  { %1767 = vmatprep.subr.bf16.mxu1 %v4711_v34  ;;  %3256 = vmatprep.subr.bf16.mxu0 %v5360_v31 }
 0x2cc   :  { %1768 = vmatpush1.bf16.msra.mxu1 %v4715_v42  ;;  %3257 = vmatpush3.bf16.msra.mxu0 %v4204_v19  ;;  %v4735_v19 = vld [vmem:[#allocation8 + $0x94] ss:$12 sps:$4 sm:$0xff]  }
 0x2cd   :  { %1769 = vmatprep.subr.bf16.mxu1 %v4719_v37  ;;  %3258 = vmatprep.subr.bf16.mxu0 %v5360_v31  ;;  %5378 = vst [vmem:[#allocation18_spill] sm:$0xff] %v4735_v19 }
 0x2d0   :  { %1770 = vmatpush1.bf16.msra.mxu1 %v4723_v39  ;;  %3259 = vmatpush3.bf16.msra.mxu0 %v4217_v23  ;;  %v4743_v23 = vld [vmem:[#allocation8 + $0xac] ss:$12 sps:$4 sm:$0xff]  }
 0x2d1   :  { %1771 = vmatprep.subr.bf16.mxu1 %v4727_v41  ;;  %3260 = vmatprep.subr.bf16.mxu0 %v5360_v31  ;;  %5380 = vst [vmem:[#allocation24_spill] sm:$0xff] %v4743_v23 }
 0x2d4   :  { %1772 = vmatpush1.bf16.msra.mxu1 %v4731_v43  ;;  %3261 = vmatpush3.bf16.msra.mxu0 %v4230_v27  ;;  %v4751_v27 = vld [vmem:[#allocation9 + $0x4] ss:$12 sps:$4 sm:$0xff]  }
 0x2d5   :  { %1773 = vmatprep.subr.bf16.mxu1 %v4735_v19  ;;  %3262 = vmatprep.subr.bf16.mxu0 %v5360_v31  ;;  %5382 = vst [vmem:[#allocation45_spill] sm:$0xff] %v4751_v27 }
 0x2d8   :  { %1774 = vmatpush1.bf16.msra.mxu1 %v4739_v53  ;;  %3263 = vmatpush3.bf16.msra.mxu0 %v5363_v46 }
 0x2d9   :  { %1775 = vmatprep.subr.bf16.mxu1 %v4743_v23  ;;  %3264 = vmatprep.subr.bf16.mxu0 %v5360_v31 }
 0x2dc   :  { %1776 = vmatpush1.bf16.msra.mxu1 %v4747_v57  ;;  %3265 = vmatpush3.bf16.msra.mxu0 %v5366_v52 }
 0x2dd   :  { %1872 = vmatprep.subr.bf16.mxu1 %v4751_v27  ;;  %3270 = vmatprep.subr.bf16.mxu0 %v5360_v31 }
 0x372   :  { %v1559_v1 = vpop.f32.mrb[32].mxu1  ;;  %v1600_v46 = vpop.f32.mrb[48].mxu0 }
 0x373   :  { %v1606_v26 = vadd.f32 %v1559_v1, %v5383_v60  ;;  %v1561_v58 = vpop.f32.mrb[33].mxu1  ;;  %v3228_v59 = vpop.f32.mrb[49].mxu0  ;;  %v1620_v11 = vadd.f32 %v4509_v9, %v1600_v46 }
 0x374   :  { %v1613_v51 = vadd.f32 %v1561_v58, %v5384_v49  ;;  %v1563_v44 = vpop.f32.mrb[34].mxu1  ;;  %v1603_v2 = vpop.f32.mrb[50].mxu0 }
 0x375   :  { %v2962_v0 = vmul.f32 -1.442695, %v1606_v26  ;;  %v1564_v18 = vpop.f32.mrb[35].mxu1  ;;  %v3229_v54 = vpop.f32.mrb[51].mxu0 }
 0x376   :  { %v2963_v52 = vmul.f32 -1.442695, %v1613_v51  ;;  %v4762_v44 = vpop.permute.xlu0 %1630 }
 0x377   :  { %3646 = vpow2.f32 %v2962_v0  ;;  %5388 = vst [vmem:[#allocation61_spill] sm:$0xff] %v4762_v44  ;;  %vm1632_vm15 = vcmp.eq.s32.totalorder %v4762_v44, 1 }
 0x378   :  { %3648 = vpow2.f32 %v2963_v52 }
 0x381   :  { %v3647_v63 = vpop.eup %3646 }
 0x382   :  { %v1610_v55 = vadd.f32 1.0, %v3647_v63  ;;  %v3649_v61 = vpop.eup %3648  ;;  %v4772_v63 = vld [vmem:[#allocation9] ss:$12 sps:$4 sm:$0xff]  }
 0x383   :  { %v1617_v7 = vadd.f32 1.0, %v3649_v61  ;;  %v4778_v61 = vld [vmem:[#allocation9 + $0x1c] ss:$12 sps:$4 sm:$0xff]  }
 0x384   :  { %3650 = vrcp.f32 %v1610_v55  ;;  %v4775_v55 = vld [vmem:[#allocation9 + $0x8] ss:$12 sps:$4 sm:$0xff]  }
 0x385   :  { %3652 = vrcp.f32 %v1617_v7  ;;  %v4785_v7 = vld [vmem:[#allocation9 + $0x18] ss:$12 sps:$4 sm:$0xff]  }
 0x38e   :  { %v3651_v4 = vpop.eup %3650 }
 0x38f   :  { %v1621_v17 = vmul.f32 %v3651_v4, %v1620_v11  ;;  %v3653_v46 = vpop.eup %3652  ;;  %v4788_v11 = vld [vmem:[#allocation9 + $0x20] ss:$12 sps:$4 sm:$0xff]  }
 0x390   :  { %v1624_v58 = vsub.f32 1.0, %v3653_v46  ;;  %v1626_v49 = vmul.f32 %v3653_v46, %v4637_v14  ;;  %v4827_v46 = vld [vmem:[#allocation9 + $0x78] ss:$12 sps:$4 sm:$0xff]  }
 0x391   :  { %v1622_v38 = vadd.f32 %v1621_v17, %v5385_v8  ;;  %v4791_v17 = vld [vmem:[#allocation9 + $0x34] ss:$12 sps:$4 sm:$0xff]  }
 0x392   :  { %v1670_v10 = vpop.f32.mrb[36].mxu1  ;;  %v1711_v48 = vpop.f32.mrb[52].mxu0 }
 0x393   :  { %3654 = vtanh.f32 %v1622_v38  ;;  %v1717_v12 = vadd.f32 %v1670_v10, %v5386_v50  ;;  %v1672_v13 = vpop.f32.mrb[37].mxu1  ;;  %v3248_v40 = vpop.f32.mrb[53].mxu0  ;;  %v1731_v8 = vadd.f32 %v4537_v6, %v1711_v48  ;;  %v4796_v10 = vld [vmem:[#allocation9 + $0x30] ss:$12 sps:$4 sm:$0xff]   ;;  %v4799_v50 = vld [vmem:[#allocation9 + $0x38] ss:$12 sps:$4 sm:$0xff]  }
 0x394   :  { %v1724_v16 = vadd.f32 %v1672_v13, %v5387_v15  ;;  %v1674_v20 = vpop.f32.mrb[38].mxu1  ;;  %v1714_v24 = vpop.f32.mrb[54].mxu0  ;;  %v4802_v13 = vld [vmem:[#allocation9 + $0x4c] ss:$12 sps:$4 sm:$0xff]   ;;  %v5389_v40 = vld [vmem:[#allocation60_spill] sm:$0xff] }
 0x395   :  { %v2964_v28 = vmul.f32 -1.442695, %v1717_v12  ;;  %v1675_v1 = vpop.f32.mrb[39].mxu1  ;;  %v3249_v60 = vpop.f32.mrb[55].mxu0  ;;  %v4807_v48 = vld [vmem:[#allocation9 + $0x48] ss:$12 sps:$4 sm:$0xff]  }
 0x396   :  { %v2965_v26 = vmul.f32 -1.442695, %v1724_v16  ;;  %v4810_v16 = vld [vmem:[#allocation9 + $0x50] ss:$12 sps:$4 sm:$0xff]   ;;  %v4817_v24 = vld [vmem:[#allocation9 + $0x60] ss:$12 sps:$4 sm:$0xff]  }
 0x397   :  { %3656 = vpow2.f32 %v2964_v28  ;;  %v4813_v20 = vld [vmem:[#allocation9 + $0x64] ss:$12 sps:$4 sm:$0xff]   ;;  %v4820_v28 = vld [vmem:[#allocation9 + $0x68] ss:$12 sps:$4 sm:$0xff]  }
 0x398   :  { %3658 = vpow2.f32 %v2965_v26  ;;  %v4823_v1 = vld [vmem:[#allocation9 + $0x7c] ss:$12 sps:$4 sm:$0xff]   ;;  %v4830_v26 = vld [vmem:[#allocation9 + $0x80] ss:$12 sps:$4 sm:$0xff]  }
 0x39d   :  { %v3655_v59 = vpop.eup %3654 }
 0x39e   :  { %v1625_v51 = vmul.f32 %v3655_v59, %v1624_v58  ;;  %v4833_v58 = vld [vmem:[#allocation9 + $0x94] ss:$12 sps:$4 sm:$0xff]  }
 0x3a0   :  { %v1627_v2 = vadd.f32 %v1626_v49, %v1625_v51 }
 0x3a1   :  { %v3657_v0 = vpop.eup %3656 }
 0x3a2   :  { %v1721_v18 = vadd.f32 1.0, %v3657_v0  ;;  %v4768_v54 = vsel %vm1632_vm15, %v1627_v2, %v4637_v14  ;;  %v3659_v14 = vpop.eup %3658  ;;  %v4838_v2 = vld [vmem:[#allocation9 + $0x90] ss:$12 sps:$4 sm:$0xff]   ;;  %v4841_v0 = vld [vmem:[#allocation9 + $0x98] ss:$12 sps:$4 sm:$0xff]  }
 0x3a3   :  { %v1760_v52 = vpack.c.bf16 %v4768_v54, %v4768_v54  ;;  %v1728_v4 = vadd.f32 1.0, %v3659_v14  ;;  %v4848_v14 = vpop.permute.xlu1 %1741 }
 0x3a4   :  { %3660 = vrcp.f32 %v1721_v18  ;;  %5390 = vst [vmem:[#allocation62_spill] sm:$0xff] %v4848_v14  ;;  %vm1743_vm0 = vcmp.eq.s32.totalorder %v4848_v14, 1 }
 0x3a5   :  { %1794 = vmatmul.mubr.bf16.vlgmr.msra.gmra.mrb[40].mxu1 %v1760_v52  ;;  %3267 = vmatmul.mubr.bf16.vlgmr.msra.gmra.mrb[56].mxu0 %v1760_v52  ;;  %3662 = vrcp.f32 %v1728_v4  ;;  %v4844_v52 = vld [vmem:[#allocation9 + $0xac] ss:$12 sps:$4 sm:$0xff]  }
 0x3a6   :  { %1873 = vmatpush1.bf16.msra.mxu1 %v4772_v63  ;;  %3271 = vmatpush3.bf16.msra.mxu0 %v4775_v55 }
 0x3a7   :  { %1874 = vmatprep.subr.bf16.mxu1 %v4778_v61  ;;  %3272 = vmatprep.subr.bf16.mxu0 %v5360_v31 }
 0x3a8   :  { %1904 = vmatprep.mubr.bf16.mxu1 %v5361_v22  ;;  %3286 = vmatprep.mubr.msk.bf16.mxu0 %vm3989_vm4, %v5360_v31 }
 0x3aa   :  { %1875 = vmatpush1.bf16.msra.mxu1 %v4785_v7  ;;  %3273 = vmatpush3.bf16.msra.mxu0 %v4788_v11 }
 0x3ab   :  { %1876 = vmatprep.subr.bf16.mxu1 %v4791_v17  ;;  %3274 = vmatprep.subr.bf16.mxu0 %v5360_v31 }
 0x3ae   :  { %v3661_v38 = vpop.eup %3660  ;;  %1877 = vmatpush1.bf16.msra.mxu1 %v4796_v10  ;;  %3275 = vmatpush3.bf16.msra.mxu0 %v4799_v50 }
 0x3af   :  { %v1732_v12 = vmul.f32 %v3661_v38, %v1731_v8  ;;  %1878 = vmatprep.subr.bf16.mxu1 %v4802_v13  ;;  %3276 = vmatprep.subr.bf16.mxu0 %v5360_v31  ;;  %v3663_v60 = vpop.eup %3662  ;;  %v4851_v8 = vld [vmem:[#allocation9 + $0xa8] ss:$12 sps:$4 sm:$0xff]   ;;  %v4854_v38 = vld [vmem:[#allocation9 + $0xb0] ss:$12 sps:$4 sm:$0xff]  }
 0x3b0   :  { %v1735_v59 = vsub.f32 1.0, %v3663_v60  ;;  %v1737_v51 = vmul.f32 %v3663_v60, %v4682_v25  ;;  %v4894_v60 = vld [vmem:[#allocation8 + $0x80] ss:$12 sps:$4 sm:$0xff]  }
 0x3b1   :  { %v1733_v15 = vadd.f32 %v1732_v12, %v5389_v40  ;;  %5391 = vst [vmem:[#allocation26_spill] sm:$0xff] %v4894_v60 }
 0x3b2   :  { %1879 = vmatpush1.bf16.msra.mxu1 %v4807_v48  ;;  %3277 = vmatpush3.bf16.msra.mxu0 %v4810_v16 }
 0x3b3   :  { %3664 = vtanh.f32 %v1733_v15  ;;  %1880 = vmatprep.subr.bf16.mxu1 %v4813_v20  ;;  %3278 = vmatprep.subr.bf16.mxu0 %v5360_v31  ;;  %v4888_v15 = vld [vmem:[#allocation8 + $0x68] ss:$12 sps:$4 sm:$0xff]  }
 0x3b6   :  { %1881 = vmatpush1.bf16.msra.mxu1 %v4817_v24  ;;  %3279 = vmatpush3.bf16.msra.mxu0 %v4820_v28 }
 0x3b7   :  { %1882 = vmatprep.subr.bf16.mxu1 %v4823_v1  ;;  %3280 = vmatprep.subr.bf16.mxu0 %v5360_v31 }
 0x3ba   :  { %1883 = vmatpush1.bf16.msra.mxu1 %v4827_v46  ;;  %3281 = vmatpush3.bf16.msra.mxu0 %v4830_v26 }
 0x3bb   :  { %1884 = vmatprep.subr.bf16.mxu1 %v4833_v58  ;;  %3282 = vmatprep.subr.bf16.mxu0 %v5360_v31 }
 0x3bd   :  { %v3665_v49 = vpop.eup %3664 }
 0x3be   :  { %1885 = vmatpush1.bf16.msra.mxu1 %v4838_v2  ;;  %3283 = vmatpush3.bf16.msra.mxu0 %v4841_v0  ;;  %v1736_v18 = vmul.f32 %v3665_v49, %v1735_v59  ;;  %v4900_v59 = vld [vmem:[#allocation8 + $0x98] ss:$12 sps:$4 sm:$0xff]   ;;  %v4906_v49 = vld [vmem:[#allocation8 + $0xb0] ss:$12 sps:$4 sm:$0xff]  }
 0x3bf   :  { %1886 = vmatprep.subr.bf16.mxu1 %v4844_v52  ;;  %3284 = vmatprep.subr.bf16.mxu0 %v5360_v31  ;;  %5392 = vst [vmem:[#allocation28_spill] sm:$0xff] %v4900_v59  ;;  %5393 = vst [vmem:[#allocation27_spill] sm:$0xff] %v4906_v49 }
 0x3c0   :  { %v1738_v4 = vadd.f32 %v1737_v51, %v1736_v18 }
 0x3c2   :  { %1887 = vmatpush1.bf16.msra.mxu1 %v4851_v8  ;;  %3285 = vmatpush3.bf16.msra.mxu0 %v4854_v38  ;;  %v4860_v12 = vsel %vm1743_vm0, %v1738_v4, %v4682_v25  ;;  %v4882_v25 = vld [vmem:[#allocation8 + $0x50] ss:$12 sps:$4 sm:$0xff]   ;;  %v5394_v4 = vld [vmem:[#allocation30_spill] sm:$0xff] }
 0x3c3   :  { %v1871_v40 = vpack.c.bf16 %v4860_v12, %v4860_v12  ;;  %1982 = vmatprep.subr.bf16.mxu1 %v4573_v3  ;;  %3290 = vmatprep.subr.bf16.mxu0 %v5360_v31 }
 0x3c5   :  { %1905 = vmatmul.mubr.bf16.vlgmr.msra.gmra.mrb[44].mxu1 %v1871_v40  ;;  %3287 = vmatmul.mubr.bf16.vlgmr.msra.gmra.mrb[60].mxu0 %v1871_v40 }
 0x3c6   :  { %1983 = vmatpush1.bf16.msra.mxu1 %v4580_v35  ;;  %3291 = vmatpush3.bf16.msra.mxu0 %v4691_v29 }
 0x3c7   :  { %1984 = vmatprep.subr.bf16.mxu1 %v4584_v62  ;;  %3292 = vmatprep.subr.bf16.mxu0 %v5360_v31 }
 0x3c8   :  { %2014 = vmatprep.mubr.bf16.mxu1 %v5361_v22  ;;  %3306 = vmatprep.mubr.msk.bf16.mxu0 %vm3989_vm4, %v5360_v31 }
 0x3ca   :  { %1985 = vmatpush1.bf16.msra.mxu1 %v4591_v47  ;;  %3293 = vmatpush3.bf16.msra.mxu0 %v4700_v32 }
 0x3cb   :  { %1986 = vmatprep.subr.bf16.mxu1 %v4595_v56  ;;  %3294 = vmatprep.subr.bf16.mxu0 %v5360_v31 }
 0x3ce   :  { %1987 = vmatpush1.bf16.msra.mxu1 %v4705_v33  ;;  %3295 = vmatpush3.bf16.msra.mxu0 %v4708_v36 }
 0x3cf   :  { %1988 = vmatprep.subr.bf16.mxu1 %v4711_v34  ;;  %3296 = vmatprep.subr.bf16.mxu0 %v5360_v31 }
 0x3d2   :  { %1989 = vmatpush1.bf16.msra.mxu1 %v4715_v42  ;;  %3297 = vmatpush3.bf16.msra.mxu0 %v4882_v25 }
 0x3d3   :  { %1990 = vmatprep.subr.bf16.mxu1 %v4719_v37  ;;  %3298 = vmatprep.subr.bf16.mxu0 %v5360_v31 }
 0x3d6   :  { %1991 = vmatpush1.bf16.msra.mxu1 %v4723_v39  ;;  %3299 = vmatpush3.bf16.msra.mxu0 %v4888_v15 }
 0x3d7   :  { %1992 = vmatprep.subr.bf16.mxu1 %v4727_v41  ;;  %3300 = vmatprep.subr.bf16.mxu0 %v5360_v31 }
 0x3da   :  { %1993 = vmatpush1.bf16.msra.mxu1 %v4731_v43  ;;  %3301 = vmatpush3.bf16.msra.mxu0 %v4894_v60 }
 0x3db   :  { %1994 = vmatprep.subr.bf16.mxu1 %v4735_v19  ;;  %3302 = vmatprep.subr.bf16.mxu0 %v5360_v31 }
 0x3de   :  { %1995 = vmatpush1.bf16.msra.mxu1 %v4739_v53  ;;  %3303 = vmatpush3.bf16.msra.mxu0 %v4900_v59 }
 0x3df   :  { %1996 = vmatprep.subr.bf16.mxu1 %v4743_v23  ;;  %3304 = vmatprep.subr.bf16.mxu0 %v5360_v31 }
 0x3e2   :  { %1997 = vmatpush1.bf16.msra.mxu1 %v4747_v57  ;;  %3305 = vmatpush3.bf16.msra.mxu0 %v4906_v49 }
 0x3e3   :  { %2087 = vmatprep.subr.bf16.mxu1 %v4751_v27  ;;  %3310 = vmatprep.subr.bf16.mxu0 %v5360_v31 }
 0x478   :  { %v1795_v51 = vpop.f32.mrb[40].mxu1  ;;  %v1836_v18 = vpop.f32.mrb[56].mxu0 }
 0x479   :  { %v1842_v40 = vadd.f32 %v1795_v51, %v5394_v4  ;;  %v1797_v5 = vpop.f32.mrb[41].mxu1  ;;  %v3268_v30 = vpop.f32.mrb[57].mxu0  ;;  %v1856_v43 = vadd.f32 %v4509_v9, %v1836_v18 }
 0x47a   :  { %v1849_v21 = vadd.f32 %v1797_v5, %v5395_v45  ;;  %v1799_v44 = vpop.f32.mrb[42].mxu1  ;;  %v1839_v14 = vpop.f32.mrb[58].mxu0  ;;  %v5396_v30 = vld [vmem:[#allocation31_spill] sm:$0xff] }
 0x47b   :  { %v2966_v23 = vmul.f32 -1.442695, %v1842_v40  ;;  %v1800_v57 = vpop.f32.mrb[43].mxu1  ;;  %v3269_v59 = vpop.f32.mrb[59].mxu0 }
 0x47c   :  { %v2967_v53 = vmul.f32 -1.442695, %v1849_v21  ;;  %v5397_v57 = vld [vmem:[#allocation37_spill] sm:$0xff] }
 0x47d   :  { %3666 = vpow2.f32 %v2966_v23 }
 0x47e   :  { %3668 = vpow2.f32 %v2967_v53  ;;  %v5398_v53 = vld [vmem:[#allocation57_spill] sm:$0xff] }
 0x487   :  { %v3667_v49 = vpop.eup %3666 }
 0x488   :  { %v1846_v27 = vadd.f32 1.0, %v3667_v49  ;;  %v3669_v19 = vpop.eup %3668 }
 0x489   :  { %v1853_v60 = vadd.f32 1.0, %v3669_v19 }
 0x48a   :  { %3670 = vrcp.f32 %v1846_v27 }
 0x48b   :  { %3672 = vrcp.f32 %v1853_v60 }
 0x494   :  { %v3671_v51 = vpop.eup %3670 }
 0x495   :  { %v1857_v4 = vmul.f32 %v3671_v51, %v1856_v43  ;;  %v3673_v9 = vpop.eup %3672  ;;  %v4917_v51 = vpop.permute.xlu0 %1866 }
 0x496   :  { %v1860_v60 = vsub.f32 1.0, %v3673_v9  ;;  %vm1868_vm1 = vcmp.eq.s32.totalorder %v4917_v51, 1  ;;  %v5086_v51 = vld [vmem:[#allocation8 + $0x1c] ss:$12 sps:$4 sm:$0xff]  }
 0x497   :  { %v1858_v5 = vadd.f32 %v1857_v4, %v5396_v30  ;;  %v1862_v4 = vmul.f32 %v3673_v9, %v4768_v54 }
 0x498   :  { %v1906_v45 = vpop.f32.mrb[44].mxu1  ;;  %v1947_v44 = vpop.f32.mrb[60].mxu0 }
 0x499   :  { %3674 = vtanh.f32 %v1858_v5  ;;  %v1953_v14 = vadd.f32 %v1906_v45, %v5397_v57  ;;  %v1908_v23 = vpop.f32.mrb[45].mxu1  ;;  %v3288_v21 = vpop.f32.mrb[61].mxu0 }
 0x49a   :  { %v1960_v59 = vadd.f32 %v1908_v23, %v5398_v53  ;;  %v1910_v49 = vpop.f32.mrb[46].mxu1  ;;  %v1950_v27 = vpop.f32.mrb[62].mxu0  ;;  %v1967_v21 = vadd.f32 %v4537_v6, %v1947_v44 }
 0x49b   :  { %v2968_v40 = vmul.f32 -1.442695, %v1953_v14  ;;  %v1911_v19 = vpop.f32.mrb[47].mxu1  ;;  %v3289_v41 = vpop.f32.mrb[63].mxu0  ;;  %v5399_v49 = vld [vmem:[#allocation58_spill] sm:$0xff] }
 0x49c   :  { %v2969_v43 = vmul.f32 -1.442695, %v1960_v59  ;;  %v4957_v19 = vpop.permute.xlu1 %1977 }
 0x49d   :  { %3676 = vpow2.f32 %v2968_v40  ;;  %vm1979_vm2 = vcmp.eq.s32.totalorder %v4957_v19, 1  ;;  %v5044_v19 = vld [vmem:[%s5273_s7] ss:$0 sm:$0xff]  ;;  %s3990_s7 = smov [#allocation11]  }
 0x49e   :  { %3678 = vpow2.f32 %v2969_v43  ;;  %s2829_s19 = sshll.u32 %s3990_s7, 4  ;;  %s2830_s19 = int_to_ptr.vmem [resolvable:$true] %s2829_s19 }
 0x49f   :  { %s3947_s0 = scalar_lea.vmem %s2830_s19, 256  ;;  %p3952_p5 = scmp.lt.s32.totalorder %s2830_s19, %s2830_s19 }
 0x4a0   :  { %p3948_p4 = scmp.ne.s32.totalorder %s2830_s19, %s3947_s0  ;;  %p3953_p6 = scmp.lt.s32.totalorder %s3947_s0, %s3947_s0 }
 0x4a2   :  { %p3954_p7 = por %p3953_p6, %p3952_p5 }
 0x4a3   :  { %v3675_v18 = vpop.eup %3674 }
 0x4a4   :  { %v1861_v30 = vmul.f32 %v3675_v18, %v1860_v60  ;;  %p3955_p8 = pnand %p3954_p7, %p3948_p4 }
 0x4a6   :  { %v1863_v5 = vadd.f32 %v1862_v4, %v1861_v30  ;;  %v5406_v30 = vld [vmem:[#allocation24_spill] sm:$0xff] }
 0x4a7   :  { %v3677_v45 = vpop.eup %3676 }
 0x4a8   :  { %v1957_v57 = vadd.f32 1.0, %v3677_v45  ;;  %v4924_v41 = vsel %vm1868_vm1, %v1863_v5, %v4768_v54  ;;  %v3679_v23 = vpop.eup %3678  ;;  %v5407_v5 = vld [vmem:[#allocation23_spill] sm:$0xff] }
 0x4a9   :  { %v1981_v14 = vpack.c.bf16 %v4924_v41, %v4924_v41  ;;  %v1964_v54 = vadd.f32 1.0, %v3679_v23  ;;  %v5408_v45 = vld [vmem:[#allocation27_spill] sm:$0xff] }
 0x4aa   :  { %3680 = vrcp.f32 %v1957_v57  ;;  %v5409_v57 = vld [vmem:[#allocation45_spill] sm:$0xff] }
 0x4ab   :  { %2015 = vmatmul.mubr.bf16.vlgmr.msra.gmra.mrb[48].mxu1 %v1981_v14  ;;  %3307 = vmatmul.mubr.bf16.vlgmr.msra.gmra.mrb[64].mxu0 %v1981_v14  ;;  %3682 = vrcp.f32 %v1964_v54  ;;  %v5410_v54 = vld [vmem:[#allocation34_spill] sm:$0xff] }
 0x4ac   :  { %2088 = vmatpush1.bf16.msra.mxu1 %v4772_v63  ;;  %3311 = vmatpush3.bf16.msra.mxu0 %v4775_v55 }
 0x4ad   :  { %2089 = vmatprep.subr.bf16.mxu1 %v4778_v61  ;;  %3312 = vmatprep.subr.bf16.mxu0 %v5360_v31 }
 0x4ae   :  { %2119 = vmatprep.mubr.bf16.mxu1 %v5361_v22  ;;  %3326 = vmatprep.mubr.msk.bf16.mxu0 %vm3989_vm4, %v5360_v31 }
 0x4b0   :  { %2090 = vmatpush1.bf16.msra.mxu1 %v4785_v7  ;;  %3313 = vmatpush3.bf16.msra.mxu0 %v4788_v11 }
 0x4b1   :  { %2091 = vmatprep.subr.bf16.mxu1 %v4791_v17  ;;  %3314 = vmatprep.subr.bf16.mxu0 %v5360_v31 }
 0x4b4   :  { %v3681_v53 = vpop.eup %3680  ;;  %2092 = vmatpush1.bf16.msra.mxu1 %v4796_v10  ;;  %3315 = vmatpush3.bf16.msra.mxu0 %v4799_v50 }
 0x4b5   :  { %v1968_v59 = vmul.f32 %v3681_v53, %v1967_v21  ;;  %2093 = vmatprep.subr.bf16.mxu1 %v4802_v13  ;;  %3316 = vmatprep.subr.bf16.mxu0 %v5360_v31  ;;  %v3683_v6 = vpop.eup %3682 }
 0x4b6   :  { %v1971_v44 = vsub.f32 1.0, %v3683_v6  ;;  %v1973_v9 = vmul.f32 %v3683_v6, %v4860_v12 }
 0x4b7   :  { %v1969_v27 = vadd.f32 %v1968_v59, %v5399_v49  ;;  %v5411_v49 = vld [vmem:[#allocation36_spill] sm:$0xff] }
 0x4b8   :  { %2094 = vmatpush1.bf16.msra.mxu1 %v4807_v48  ;;  %3317 = vmatpush3.bf16.msra.mxu0 %v4810_v16 }
 0x4b9   :  { %3684 = vtanh.f32 %v1969_v27  ;;  %2095 = vmatprep.subr.bf16.mxu1 %v4813_v20  ;;  %3318 = vmatprep.subr.bf16.mxu0 %v5360_v31 }
 0x4bc   :  { %2096 = vmatpush1.bf16.msra.mxu1 %v4817_v24  ;;  %3319 = vmatpush3.bf16.msra.mxu0 %v4820_v28 }
 0x4bd   :  { %2097 = vmatprep.subr.bf16.mxu1 %v4823_v1  ;;  %3320 = vmatprep.subr.bf16.mxu0 %v5360_v31 }
 0x4c0   :  { %2098 = vmatpush1.bf16.msra.mxu1 %v4827_v46  ;;  %3321 = vmatpush3.bf16.msra.mxu0 %v4830_v26 }
 0x4c1   :  { %2099 = vmatprep.subr.bf16.mxu1 %v4833_v58  ;;  %3322 = vmatprep.subr.bf16.mxu0 %v5360_v31 }
 0x4c3   :  { %v3685_v40 = vpop.eup %3684 }
 0x4c4   :  { %2100 = vmatpush1.bf16.msra.mxu1 %v4838_v2  ;;  %3323 = vmatpush3.bf16.msra.mxu0 %v4841_v0  ;;  %v1972_v43 = vmul.f32 %v3685_v40, %v1971_v44 }
 0x4c5   :  { %2101 = vmatprep.subr.bf16.mxu1 %v4844_v52  ;;  %3324 = vmatprep.subr.bf16.mxu0 %v5360_v31 }
 0x4c6   :  { %v1974_v60 = vadd.f32 %v1973_v9, %v1972_v43 }
 0x4c8   :  { %2102 = vmatpush1.bf16.msra.mxu1 %v4851_v8  ;;  %3325 = vmatpush3.bf16.msra.mxu0 %v4854_v38  ;;  %v4970_v18 = vsel %vm1979_vm2, %v1974_v60, %v4860_v12  ;;  %v5405_v12 = vld [vmem:[#allocation28_spill] sm:$0xff] }
 0x4c9   :  { %v2086_v4 = vpack.c.bf16 %v4970_v18, %v4970_v18  ;;  %2192 = vmatprep.subr.bf16.mxu1 %v4573_v3  ;;  %3330 = vmatprep.subr.bf16.mxu0 %v5360_v31  ;;  %v5400_v3 = vld [vmem:[#allocation17_spill] sm:$0xff] }
 0x4cb   :  { %2120 = vmatmul.mubr.bf16.vlgmr.msra.gmra.mrb[52].mxu1 %v2086_v4  ;;  %3327 = vmatmul.mubr.bf16.vlgmr.msra.gmra.mrb[68].mxu0 %v2086_v4 }
 0x4cc   :  { %2193 = vmatpush1.bf16.msra.mxu1 %v4580_v35  ;;  %3331 = vmatpush3.bf16.msra.mxu0 %v4691_v29  ;;  %v5401_v35 = vld [vmem:[#allocation20_spill] sm:$0xff] }
 0x4cd   :  { %2194 = vmatprep.subr.bf16.mxu1 %v4584_v62  ;;  %3332 = vmatprep.subr.bf16.mxu0 %v5360_v31  ;;  %v5402_v62 = vld [vmem:[#allocation26_spill] sm:$0xff] }
 0x4ce   :  { %2224 = vmatprep.mubr.bf16.mxu1 %v5361_v22  ;;  %3346 = vmatprep.mubr.msk.bf16.mxu0 %vm3989_vm4, %v5360_v31 }
 0x4d0   :  { %2195 = vmatpush1.bf16.msra.mxu1 %v4591_v47  ;;  %3333 = vmatpush3.bf16.msra.mxu0 %v4700_v32  ;;  %v5403_v47 = vld [vmem:[#allocation18_spill] sm:$0xff] }
 0x4d1   :  { %2196 = vmatprep.subr.bf16.mxu1 %v4595_v56  ;;  %3334 = vmatprep.subr.bf16.mxu0 %v5360_v31  ;;  %v5404_v56 = vld [vmem:[#allocation22_spill] sm:$0xff] }
 0x4d4   :  { %2197 = vmatpush1.bf16.msra.mxu1 %v4705_v33  ;;  %3335 = vmatpush3.bf16.msra.mxu0 %v4708_v36 }
 0x4d5   :  { %2198 = vmatprep.subr.bf16.mxu1 %v4711_v34  ;;  %3336 = vmatprep.subr.bf16.mxu0 %v5360_v31 }
 0x4d8   :  { %2199 = vmatpush1.bf16.msra.mxu1 %v4715_v42  ;;  %3337 = vmatpush3.bf16.msra.mxu0 %v4882_v25 }
 0x4d9   :  { %2200 = vmatprep.subr.bf16.mxu1 %v4719_v37  ;;  %3338 = vmatprep.subr.bf16.mxu0 %v5360_v31 }
 0x4dc   :  { %2201 = vmatpush1.bf16.msra.mxu1 %v4723_v39  ;;  %3339 = vmatpush3.bf16.msra.mxu0 %v4888_v15 }
 0x4dd   :  { %2202 = vmatprep.subr.bf16.mxu1 %v5400_v3  ;;  %3340 = vmatprep.subr.bf16.mxu0 %v5360_v31 }
 0x4e0   :  { %2203 = vmatpush1.bf16.msra.mxu1 %v5401_v35  ;;  %3341 = vmatpush3.bf16.msra.mxu0 %v5402_v62 }
 0x4e1   :  { %2204 = vmatprep.subr.bf16.mxu1 %v5403_v47  ;;  %3342 = vmatprep.subr.bf16.mxu0 %v5360_v31 }
 0x4e4   :  { %2205 = vmatpush1.bf16.msra.mxu1 %v5404_v56  ;;  %3343 = vmatpush3.bf16.msra.mxu0 %v5405_v12 }
 0x4e5   :  { %2206 = vmatprep.subr.bf16.mxu1 %v5406_v30  ;;  %3344 = vmatprep.subr.bf16.mxu0 %v5360_v31 }
 0x4e8   :  { %2207 = vmatpush1.bf16.msra.mxu1 %v5407_v5  ;;  %3345 = vmatpush3.bf16.msra.mxu0 %v5408_v45 }
 0x4e9   :  { %2297 = vmatprep.subr.bf16.mxu1 %v5409_v57  ;;  %3350 = vmatprep.subr.bf16.mxu0 %v5360_v31 }
 0x57e   :  { %v2016_v14 = vpop.f32.mrb[48].mxu1  ;;  %v2057_v23 = vpop.f32.mrb[64].mxu0 }
 0x57f   :  { %v2063_v21 = vadd.f32 %v2016_v14, %v5410_v54  ;;  %v2018_v53 = vpop.f32.mrb[49].mxu1  ;;  %v3308_v59 = vpop.f32.mrb[65].mxu0  ;;  %v5016_v14 = vld [vmem:[%s5272_s6] ss:$0 sm:$0xff] }
 0x580   :  { %v2070_v27 = vadd.f32 %v2018_v53, %v5411_v49  ;;  %v2020_v6 = vpop.f32.mrb[50].mxu1  ;;  %v2060_v44 = vpop.f32.mrb[66].mxu0  ;;  %v2077_v54 = vadd.f32 %v5016_v14, %v2057_v23 }
 0x581   :  { %v2970_v40 = vmul.f32 -1.442695, %v2063_v21  ;;  %v2021_v9 = vpop.f32.mrb[51].mxu1  ;;  %v3309_v43 = vpop.f32.mrb[67].mxu0  ;;  %v5412_v21 = vld [vmem:[#allocation35_spill] sm:$0xff]  ;;  %v5413_v44 = vld [vmem:[#allocation33_spill] sm:$0xff] }
 0x582   :  { %v2971_v60 = vmul.f32 -1.442695, %v2070_v27 }
 0x583   :  { %3686 = vpow2.f32 %v2970_v40 }
 0x584   :  { %3688 = vpow2.f32 %v2971_v60 }
 0x58d   :  { %v3687_v4 = vpop.eup %3686 }
 0x58e   :  { %v2067_v57 = vadd.f32 1.0, %v3687_v4  ;;  %v3689_v45 = vpop.eup %3688 }
 0x58f   :  { %v2074_v5 = vadd.f32 1.0, %v3689_v45  ;;  %v5414_v45 = vld [vmem:[#allocation55_spill] sm:$0xff] }
 0x590   :  { %3690 = vrcp.f32 %v2067_v57 }
 0x591   :  { %3692 = vrcp.f32 %v2074_v5 }
 0x59a   :  { %v3691_v53 = vpop.eup %3690 }
 0x59b   :  { %v2078_v59 = vmul.f32 %v3691_v53, %v2077_v54  ;;  %v3693_v23 = vpop.eup %3692 }
 0x59c   :  { %v2081_v5 = vsub.f32 1.0, %v3693_v23 }
 0x59d   :  { %v2079_v49 = vadd.f32 %v2078_v59, %v5412_v21  ;;  %v2083_v59 = vmul.f32 %v3693_v23, %v4924_v41 }
 0x59e   :  { %v2121_v6 = vpop.f32.mrb[52].mxu1  ;;  %v2162_v27 = vpop.f32.mrb[68].mxu0 }
 0x59f   :  { %3694 = vtanh.f32 %v2079_v49  ;;  %v2168_v40 = vadd.f32 %v2121_v6, %v5413_v44  ;;  %v2123_v57 = vpop.f32.mrb[53].mxu1  ;;  %v3328_v9 = vpop.f32.mrb[69].mxu0 }
 0x5a0   :  { %v2175_v43 = vadd.f32 %v2123_v57, %v5414_v45  ;;  %v2125_v60 = vpop.f32.mrb[54].mxu1  ;;  %v2165_v4 = vpop.f32.mrb[70].mxu0  ;;  %v5415_v45 = vld [vmem:[#allocation56_spill] sm:$0xff] }
 0x5a1   :  { %v2972_v30 = vmul.f32 -1.442695, %v2168_v40  ;;  %v2126_v12 = vpop.f32.mrb[55].mxu1  ;;  %v3329_v56 = vpop.f32.mrb[71].mxu0 }
 0x5a2   :  { %v2973_v54 = vmul.f32 -1.442695, %v2175_v43 }
 0x5a3   :  { %3696 = vpow2.f32 %v2972_v30  ;;  %v2182_v30 = vadd.f32 %v5044_v19, %v2162_v27 }
 0x5a4   :  { %3698 = vpow2.f32 %v2973_v54 }
 0x5a9   :  { %v3695_v53 = vpop.eup %3694 }
 0x5aa   :  { %v2082_v21 = vmul.f32 %v3695_v53, %v2081_v5 }
 0x5ac   :  { %v2084_v49 = vadd.f32 %v2083_v59, %v2082_v21  ;;  %v5078_v21 = vld [vmem:[#allocation8 + $0x4] ss:$12 sps:$4 sm:$0xff]  }
 0x5ad   :  { %v3697_v6 = vpop.eup %3696 }
 0x5ae   :  { %v2172_v44 = vadd.f32 1.0, %v3697_v6  ;;  %v5026_v57 = vsel %vm1979_vm2, %v2084_v49, %v4924_v41  ;;  %v3699_v12 = vpop.eup %3698  ;;  %v5082_v49 = vld [vmem:[#allocation8] ss:$12 sps:$4 sm:$0xff]  }
 0x5af   :  { %v2191_v56 = vpack.c.bf16 %v5026_v57, %v5026_v57  ;;  %v2179_v41 = vadd.f32 1.0, %v3699_v12  ;;  %v5097_v6 = vld [vmem:[#allocation8 + $0x34] ss:$12 sps:$4 sm:$0xff]  }
 0x5b0   :  { %3700 = vrcp.f32 %v2172_v44 }
 0x5b1   :  { %2225 = vmatmul.mubr.bf16.vlgmr.msra.gmra.mrb[56].mxu1 %v2191_v56  ;;  %3347 = vmatmul.mubr.bf16.vlgmr.msra.gmra.mrb[72].mxu0 %v2191_v56  ;;  %3702 = vrcp.f32 %v2179_v41  ;;  %v5423_v56 = vld [vmem:[#allocation40_spill] sm:$0xff] }
 0x5b2   :  { %2298 = vmatpush1.bf16.msra.mxu1 %v4772_v63  ;;  %3351 = vmatpush3.bf16.msra.mxu0 %v4775_v55 }
 0x5b3   :  { %2299 = vmatprep.subr.bf16.mxu1 %v4778_v61  ;;  %3352 = vmatprep.subr.bf16.mxu0 %v5360_v31 }
 0x5b4   :  { %2329 = vmatprep.mubr.bf16.mxu1 %v5361_v22  ;;  %3366 = vmatprep.mubr.msk.bf16.mxu0 %vm3989_vm4, %v5360_v31 }
 0x5b6   :  { %2300 = vmatpush1.bf16.msra.mxu1 %v4785_v7  ;;  %3353 = vmatpush3.bf16.msra.mxu0 %v4788_v11 }
 0x5b7   :  { %2301 = vmatprep.subr.bf16.mxu1 %v4791_v17  ;;  %3354 = vmatprep.subr.bf16.mxu0 %v5360_v31 }
 0x5ba   :  { %v3701_v40 = vpop.eup %3700  ;;  %2302 = vmatpush1.bf16.msra.mxu1 %v4796_v10  ;;  %3355 = vmatpush3.bf16.msra.mxu0 %v4799_v50 }
 0x5bb   :  { %v2183_v9 = vmul.f32 %v3701_v40, %v2182_v30  ;;  %2303 = vmatprep.subr.bf16.mxu1 %v4802_v13  ;;  %3356 = vmatprep.subr.bf16.mxu0 %v5360_v31  ;;  %v3703_v27 = vpop.eup %3702 }
 0x5bc   :  { %v2186_v60 = vsub.f32 1.0, %v3703_v27  ;;  %v2188_v23 = vmul.f32 %v3703_v27, %v4970_v18 }
 0x5bd   :  { %v2184_v43 = vadd.f32 %v2183_v9, %v5415_v45 }
 0x5be   :  { %2304 = vmatpush1.bf16.msra.mxu1 %v4807_v48  ;;  %3357 = vmatpush3.bf16.msra.mxu0 %v4810_v16 }
 0x5bf   :  { %3704 = vtanh.f32 %v2184_v43  ;;  %2305 = vmatprep.subr.bf16.mxu1 %v4813_v20  ;;  %3358 = vmatprep.subr.bf16.mxu0 %v5360_v31 }
 0x5c2   :  { %2306 = vmatpush1.bf16.msra.mxu1 %v4817_v24  ;;  %3359 = vmatpush3.bf16.msra.mxu0 %v4820_v28 }
 0x5c3   :  { %2307 = vmatprep.subr.bf16.mxu1 %v4823_v1  ;;  %3360 = vmatprep.subr.bf16.mxu0 %v5360_v31 }
 0x5c6   :  { %2308 = vmatpush1.bf16.msra.mxu1 %v4827_v46  ;;  %3361 = vmatpush3.bf16.msra.mxu0 %v4830_v26 }
 0x5c7   :  { %2309 = vmatprep.subr.bf16.mxu1 %v4833_v58  ;;  %3362 = vmatprep.subr.bf16.mxu0 %v5360_v31 }
 0x5c9   :  { %v3705_v4 = vpop.eup %3704 }
 0x5ca   :  { %2310 = vmatpush1.bf16.msra.mxu1 %v4838_v2  ;;  %3363 = vmatpush3.bf16.msra.mxu0 %v4841_v0  ;;  %v2187_v54 = vmul.f32 %v3705_v4, %v2186_v60 }
 0x5cb   :  { %2311 = vmatprep.subr.bf16.mxu1 %v4844_v52  ;;  %3364 = vmatprep.subr.bf16.mxu0 %v5360_v31 }
 0x5cc   :  { %v2189_v5 = vadd.f32 %v2188_v23, %v2187_v54 }
 0x5ce   :  { %2312 = vmatpush1.bf16.msra.mxu1 %v4851_v8  ;;  %3365 = vmatpush3.bf16.msra.mxu0 %v4854_v38  ;;  %v5074_v53 = vsel %vm1868_vm1, %v2189_v5, %v4970_v18  ;;  %v5093_v18 = vld [vmem:[#allocation8 + $0x18] ss:$12 sps:$4 sm:$0xff]  }
 0x5cf   :  { %v2296_v59 = vpack.c.bf16 %v5074_v53, %v5074_v53  ;;  %2402 = vmatprep.subr.bf16.mxu1 %v5078_v21  ;;  %3370 = vmatprep.subr.bf16.mxu0 %v5360_v31 }
 0x5d1   :  { %2330 = vmatmul.mubr.bf16.vlgmr.msra.gmra.mrb[60].mxu1 %v2296_v59  ;;  %3367 = vmatmul.mubr.bf16.vlgmr.msra.gmra.mrb[76].mxu0 %v2296_v59 }
 0x5d2   :  { %2403 = vmatpush1.bf16.msra.mxu1 %v5082_v49  ;;  %3371 = vmatpush3.bf16.msra.mxu0 %v4691_v29  ;;  %v5416_v29 = vld [vmem:[#allocation22_spill] sm:$0xff] }
 0x5d3   :  { %2404 = vmatprep.subr.bf16.mxu1 %v5086_v51  ;;  %3372 = vmatprep.subr.bf16.mxu0 %v5360_v31 }
 0x5d4   :  { %2434 = vmatprep.mubr.bf16.mxu1 %v5361_v22  ;;  %3386 = vmatprep.mubr.msk.bf16.mxu0 %vm3989_vm4, %v5360_v31 }
 0x5d6   :  { %2405 = vmatpush1.bf16.msra.mxu1 %v5093_v18  ;;  %3373 = vmatpush3.bf16.msra.mxu0 %v4700_v32  ;;  %v5417_v32 = vld [vmem:[#allocation28_spill] sm:$0xff] }
 0x5d7   :  { %2406 = vmatprep.subr.bf16.mxu1 %v5097_v6  ;;  %3374 = vmatprep.subr.bf16.mxu0 %v5360_v31 }
 0x5da   :  { %2407 = vmatpush1.bf16.msra.mxu1 %v4705_v33  ;;  %3375 = vmatpush3.bf16.msra.mxu0 %v4708_v36  ;;  %v5418_v33 = vld [vmem:[#allocation24_spill] sm:$0xff]  ;;  %v5419_v36 = vld [vmem:[#allocation23_spill] sm:$0xff] }
 0x5db   :  { %2408 = vmatprep.subr.bf16.mxu1 %v4711_v34  ;;  %3376 = vmatprep.subr.bf16.mxu0 %v5360_v31  ;;  %v5420_v34 = vld [vmem:[#allocation27_spill] sm:$0xff] }
 0x5de   :  { %2409 = vmatpush1.bf16.msra.mxu1 %v4715_v42  ;;  %3377 = vmatpush3.bf16.msra.mxu0 %v4882_v25  ;;  %v5421_v42 = vld [vmem:[#allocation45_spill] sm:$0xff] }
 0x5df   :  { %2410 = vmatprep.subr.bf16.mxu1 %v4719_v37  ;;  %3378 = vmatprep.subr.bf16.mxu0 %v5360_v31 }
 0x5e2   :  { %2411 = vmatpush1.bf16.msra.mxu1 %v4723_v39  ;;  %3379 = vmatpush3.bf16.msra.mxu0 %v4888_v15 }
 0x5e3   :  { %2412 = vmatprep.subr.bf16.mxu1 %v5400_v3  ;;  %3380 = vmatprep.subr.bf16.mxu0 %v5360_v31  ;;  %v5422_v3 = vld [vmem:[#allocation38_spill] sm:$0xff] }
 0x5e6   :  { %2413 = vmatpush1.bf16.msra.mxu1 %v5401_v35  ;;  %3381 = vmatpush3.bf16.msra.mxu0 %v5402_v62 }
 0x5e7   :  { %2414 = vmatprep.subr.bf16.mxu1 %v5403_v47  ;;  %3382 = vmatprep.subr.bf16.mxu0 %v5360_v31 }
 0x5ea   :  { %2415 = vmatpush1.bf16.msra.mxu1 %v5416_v29  ;;  %3383 = vmatpush3.bf16.msra.mxu0 %v5417_v32  ;;  %v5424_v29 = vld [vmem:[#allocation39_spill] sm:$0xff] }
 0x5eb   :  { %2416 = vmatprep.subr.bf16.mxu1 %v5418_v33  ;;  %3384 = vmatprep.subr.bf16.mxu0 %v5360_v31 }
 0x5ee   :  { %2417 = vmatpush1.bf16.msra.mxu1 %v5419_v36  ;;  %3385 = vmatpush3.bf16.msra.mxu0 %v5420_v34 }
 0x5ef   :  { %2507 = vmatprep.subr.bf16.mxu1 %v5421_v42  ;;  %3390 = vmatprep.subr.bf16.mxu0 %v5360_v31 }
 0x684   :  { %v2226_v37 = vpop.f32.mrb[56].mxu1  ;;  %v2267_v39 = vpop.f32.mrb[72].mxu0 }
 0x685   :  { %v2273_v35 = vadd.f32 %v2226_v37, %v5422_v3  ;;  %v2228_v47 = vpop.f32.mrb[57].mxu1  ;;  %v3348_v44 = vpop.f32.mrb[73].mxu0  ;;  %v2287_v54 = vadd.f32 %v5016_v14, %v2267_v39  ;;  %v5425_v37 = vld [vmem:[#allocation29_spill] sm:$0xff] }
 0x686   :  { %v2280_v12 = vadd.f32 %v2228_v47, %v5423_v56  ;;  %v2230_v41 = vpop.f32.mrb[58].mxu1  ;;  %v2270_v30 = vpop.f32.mrb[74].mxu0  ;;  %v5426_v44 = vld [vmem:[#allocation53_spill] sm:$0xff] }
 0x687   :  { %v2974_v40 = vmul.f32 -1.442695, %v2273_v35  ;;  %v2231_v9 = vpop.f32.mrb[59].mxu1  ;;  %v3349_v45 = vpop.f32.mrb[75].mxu0 }
 0x688   :  { %v2975_v43 = vmul.f32 -1.442695, %v2280_v12 }
 0x689   :  { %3706 = vpow2.f32 %v2974_v40 }
 0x68a   :  { %3708 = vpow2.f32 %v2975_v43 }
 0x693   :  { %v3707_v27 = vpop.eup %3706 }
 0x694   :  { %v2277_v60 = vadd.f32 1.0, %v3707_v27  ;;  %v3709_v4 = vpop.eup %3708 }
 0x695   :  { %v2284_v23 = vadd.f32 1.0, %v3709_v4 }
 0x696   :  { %3710 = vrcp.f32 %v2277_v60 }
 0x697   :  { %3712 = vrcp.f32 %v2284_v23 }
 0x6a0   :  { %v3711_v5 = vpop.eup %3710 }
 0x6a1   :  { %v2288_v59 = vmul.f32 %v3711_v5, %v2287_v54  ;;  %v3713_v39 = vpop.eup %3712 }
 0x6a2   :  { %v2291_v43 = vsub.f32 1.0, %v3713_v39  ;;  %v2293_v60 = vmul.f32 %v3713_v39, %v5026_v57 }
 0x6a3   :  { %v2289_v33 = vadd.f32 %v2288_v59, %v5424_v29 }
 0x6a4   :  { %v2331_v36 = vpop.f32.mrb[60].mxu1  ;;  %v2372_v42 = vpop.f32.mrb[76].mxu0 }
 0x6a5   :  { %3714 = vtanh.f32 %v2289_v33  ;;  %v2378_v3 = vadd.f32 %v2331_v36, %v5425_v37  ;;  %v2333_v35 = vpop.f32.mrb[61].mxu1  ;;  %v3368_v47 = vpop.f32.mrb[77].mxu0 }
 0x6a6   :  { %v2385_v56 = vadd.f32 %v2333_v35, %v5426_v44  ;;  %v2335_v12 = vpop.f32.mrb[62].mxu1  ;;  %v2375_v41 = vpop.f32.mrb[78].mxu0  ;;  %v5431_v35 = vld [vmem:[#allocation44_spill] sm:$0xff] }
 0x6a7   :  { %v2976_v30 = vmul.f32 -1.442695, %v2378_v3  ;;  %v2336_v40 = vpop.f32.mrb[63].mxu1  ;;  %v3369_v9 = vpop.f32.mrb[79].mxu0 }
 0x6a8   :  { %v2977_v45 = vmul.f32 -1.442695, %v2385_v56 }
 0x6a9   :  { %3716 = vpow2.f32 %v2976_v30 }
 0x6aa   :  { %3718 = vpow2.f32 %v2977_v45 }
 0x6af   :  { %v3715_v27 = vpop.eup %3714 }
 0x6b0   :  { %v2292_v4 = vmul.f32 %v3715_v27, %v2291_v43 }
 0x6b2   :  { %v2294_v23 = vadd.f32 %v2293_v60, %v2292_v4  ;;  %v5432_v60 = vld [vmem:[#allocation43_spill] sm:$0xff] }
 0x6b3   :  { %v3717_v54 = vpop.eup %3716 }
 0x6b4   :  { %v2382_v5 = vadd.f32 1.0, %v3717_v54  ;;  %v5135_v29 = vsel %vm1743_vm0, %v2294_v23, %v5026_v57  ;;  %v3719_v36 = vpop.eup %3718 }
 0x6b5   :  { %v2401_v33 = vpack.c.bf16 %v5135_v29, %v5135_v29  ;;  %v2389_v57 = vadd.f32 1.0, %v3719_v36 }
 0x6b6   :  { %3720 = vrcp.f32 %v2382_v5  ;;  %v5433_v5 = vld [vmem:[#allocation25_spill] sm:$0xff] }
 0x6b7   :  { %2435 = vmatmul.mubr.bf16.vlgmr.msra.gmra.mrb[64].mxu1 %v2401_v33  ;;  %3387 = vmatmul.mubr.bf16.vlgmr.msra.gmra.mrb[80].mxu0 %v2401_v33  ;;  %3722 = vrcp.f32 %v2389_v57  ;;  %v5434_v57 = vld [vmem:[#allocation51_spill] sm:$0xff] }
 0x6b8   :  { %2508 = vmatpush1.bf16.msra.mxu1 %v4772_v63  ;;  %3391 = vmatpush3.bf16.msra.mxu0 %v4775_v55  ;;  %v2392_v63 = vadd.f32 %v5044_v19, %v2372_v42 }
 0x6b9   :  { %2509 = vmatprep.subr.bf16.mxu1 %v4778_v61  ;;  %3392 = vmatprep.subr.bf16.mxu0 %v5360_v31 }
 0x6ba   :  { %2539 = vmatprep.mubr.bf16.mxu1 %v5361_v22  ;;  %3406 = vmatprep.mubr.msk.bf16.mxu0 %vm3989_vm4, %v5360_v31 }
 0x6bc   :  { %2510 = vmatpush1.bf16.msra.mxu1 %v4785_v7  ;;  %3393 = vmatpush3.bf16.msra.mxu0 %v4788_v11  ;;  %v5428_v7 = vld [vmem:[#allocation54_spill] sm:$0xff] }
 0x6bd   :  { %2511 = vmatprep.subr.bf16.mxu1 %v4791_v17  ;;  %3394 = vmatprep.subr.bf16.mxu0 %v5360_v31 }
 0x6c0   :  { %v3721_v55 = vpop.eup %3720  ;;  %2512 = vmatpush1.bf16.msra.mxu1 %v4796_v10  ;;  %3395 = vmatpush3.bf16.msra.mxu0 %v4799_v50 }
 0x6c1   :  { %v2393_v61 = vmul.f32 %v3721_v55, %v2392_v63  ;;  %2513 = vmatprep.subr.bf16.mxu1 %v4802_v13  ;;  %3396 = vmatprep.subr.bf16.mxu0 %v5360_v31  ;;  %v3723_v17 = vpop.eup %3722 }
 0x6c2   :  { %v2396_v10 = vsub.f32 1.0, %v3723_v17  ;;  %v2398_v13 = vmul.f32 %v3723_v17, %v5074_v53 }
 0x6c3   :  { %v2394_v11 = vadd.f32 %v2393_v61, %v5428_v7 }
 0x6c4   :  { %2514 = vmatpush1.bf16.msra.mxu1 %v4807_v48  ;;  %3397 = vmatpush3.bf16.msra.mxu0 %v4810_v16 }
 0x6c5   :  { %3724 = vtanh.f32 %v2394_v11  ;;  %2515 = vmatprep.subr.bf16.mxu1 %v4813_v20  ;;  %3398 = vmatprep.subr.bf16.mxu0 %v5360_v31 }
 0x6c8   :  { %2516 = vmatpush1.bf16.msra.mxu1 %v4817_v24  ;;  %3399 = vmatpush3.bf16.msra.mxu0 %v4820_v28 }
 0x6c9   :  { %2517 = vmatprep.subr.bf16.mxu1 %v4823_v1  ;;  %3400 = vmatprep.subr.bf16.mxu0 %v5360_v31  ;;  %v3821_v1 = vld [vmem:[#allocation8 + $0x8] ss:$12 sps:$4 sm:$0xff]  }
 0x6cc   :  { %2518 = vmatpush1.bf16.msra.mxu1 %v4827_v46  ;;  %3401 = vmatpush3.bf16.msra.mxu0 %v4830_v26  ;;  %v3822_v46 = vld [vmem:[#allocation8 + $0x20] ss:$12 sps:$4 sm:$0xff]   ;;  %v3823_v26 = vld [vmem:[#allocation8 + $0x30] ss:$12 sps:$4 sm:$0xff]  }
 0x6cd   :  { %2519 = vmatprep.subr.bf16.mxu1 %v4833_v58  ;;  %3402 = vmatprep.subr.bf16.mxu0 %v5360_v31  ;;  %v3824_v58 = vld [vmem:[#allocation8 + $0x38] ss:$12 sps:$4 sm:$0xff]  }
 0x6cf   :  { %v3725_v50 = vpop.eup %3724 }
 0x6d0   :  { %2520 = vmatpush1.bf16.msra.mxu1 %v4838_v2  ;;  %3403 = vmatpush3.bf16.msra.mxu0 %v4841_v0  ;;  %v2397_v48 = vmul.f32 %v3725_v50, %v2396_v10  ;;  %v3825_v2 = vld [vmem:[#allocation8 + $0x4c] ss:$12 sps:$4 sm:$0xff]   ;;  %v3826_v0 = vld [vmem:[#allocation8 + $0x48] ss:$12 sps:$4 sm:$0xff]  }
 0x6d1   :  { %2521 = vmatprep.subr.bf16.mxu1 %v4844_v52  ;;  %3404 = vmatprep.subr.bf16.mxu0 %v5360_v31  ;;  %v3827_v52 = vld [vmem:[#allocation8 + $0x64] ss:$12 sps:$4 sm:$0xff]  }
 0x6d2   :  { %v2399_v16 = vadd.f32 %v2398_v13, %v2397_v48 }
 0x6d4   :  { %2522 = vmatpush1.bf16.msra.mxu1 %v4851_v8  ;;  %3405 = vmatpush3.bf16.msra.mxu0 %v4854_v38  ;;  %v5178_v24 = vsel %vm1632_vm15, %v2399_v16, %v5074_v53  ;;  %v3828_v8 = vld [vmem:[#allocation8 + $0x60] ss:$12 sps:$4 sm:$0xff]   ;;  %v3829_v38 = vld [vmem:[#allocation8 + $0x7c] ss:$12 sps:$4 sm:$0xff]   ;;  %v3830_v53 = vld [vmem:[#allocation8 + $0x78] ss:$12 sps:$4 sm:$0xff]  }
 0x6d5   :  { %v2506_v28 = vpack.c.bf16 %v5178_v24, %v5178_v24  ;;  %2612 = vmatprep.subr.bf16.mxu1 %v5078_v21  ;;  %3410 = vmatprep.subr.bf16.mxu0 %v5360_v31  ;;  %v3831_v21 = vld [vmem:[#allocation8 + $0x94] ss:$12 sps:$4 sm:$0xff]  }
 0x6d7   :  { %2540 = vmatmul.mubr.bf16.vlgmr.msra.gmra.mrb[68].mxu1 %v2506_v28  ;;  %3407 = vmatmul.mubr.bf16.vlgmr.msra.gmra.mrb[84].mxu0 %v2506_v28 }
 0x6d8   :  { %2613 = vmatpush1.bf16.msra.mxu1 %v5082_v49  ;;  %3411 = vmatpush3.bf16.msra.mxu0 %v3821_v1  ;;  %v3833_v49 = vld [vmem:[#allocation8 + $0xac] ss:$12 sps:$4 sm:$0xff]  }
 0x6d9   :  { %2614 = vmatprep.subr.bf16.mxu1 %v5086_v51  ;;  %3412 = vmatprep.subr.bf16.mxu0 %v5360_v31  ;;  %v3835_v51 = vld [vmem:[#allocation9 + $0x4] ss:$12 sps:$4 sm:$0xff]  }
 0x6da   :  { %2644 = vmatprep.mubr.bf16.mxu1 %v5361_v22  ;;  %3426 = vmatprep.mubr.msk.bf16.mxu0 %vm3989_vm4, %v5360_v31 }
 0x6dc   :  { %2615 = vmatpush1.bf16.msra.mxu1 %v5093_v18  ;;  %3413 = vmatpush3.bf16.msra.mxu0 %v3822_v46 }
 0x6dd   :  { %2616 = vmatprep.subr.bf16.mxu1 %v5097_v6  ;;  %3414 = vmatprep.subr.bf16.mxu0 %v5360_v31  ;;  %v5430_v6 = vld [vmem:[#allocation42_spill] sm:$0xff] }
 0x6e0   :  { %2617 = vmatpush1.bf16.msra.mxu1 %v3823_v26  ;;  %3415 = vmatpush3.bf16.msra.mxu0 %v3824_v58 }
 0x6e1   :  { %2618 = vmatprep.subr.bf16.mxu1 %v3825_v2  ;;  %3416 = vmatprep.subr.bf16.mxu0 %v5360_v31 }
 0x6e4   :  { %2619 = vmatpush1.bf16.msra.mxu1 %v3826_v0  ;;  %3417 = vmatpush3.bf16.msra.mxu0 %v4882_v25  ;;  %v3832_v25 = vld [vmem:[#allocation8 + $0x90] ss:$12 sps:$4 sm:$0xff]   ;;  %v3836_v0 = vld [vmem:[#allocation9] ss:$12 sps:$4 sm:$0xff]  }
 0x6e5   :  { %2620 = vmatprep.subr.bf16.mxu1 %v3827_v52  ;;  %3418 = vmatprep.subr.bf16.mxu0 %v5360_v31  ;;  %v3837_v52 = vld [vmem:[#allocation9 + $0x8] ss:$12 sps:$4 sm:$0xff]  }
 0x6e8   :  { %2621 = vmatpush1.bf16.msra.mxu1 %v3828_v8  ;;  %3419 = vmatpush3.bf16.msra.mxu0 %v4888_v15  ;;  %v3834_v15 = vld [vmem:[#allocation8 + $0xa8] ss:$12 sps:$4 sm:$0xff]  }
 0x6e9   :  { %2622 = vmatprep.subr.bf16.mxu1 %v3829_v38  ;;  %3420 = vmatprep.subr.bf16.mxu0 %v5360_v31  ;;  %v3838_v8 = vld [vmem:[#allocation9 + $0x1c] ss:$12 sps:$4 sm:$0xff]  }
 0x6ec   :  { %2623 = vmatpush1.bf16.msra.mxu1 %v3830_v53  ;;  %3421 = vmatpush3.bf16.msra.mxu0 %v5402_v62  ;;  %v3840_v53 = vld [vmem:[#allocation9 + $0x20] ss:$12 sps:$4 sm:$0xff]  }
 0x6ed   :  { %2624 = vmatprep.subr.bf16.mxu1 %v3831_v21  ;;  %3422 = vmatprep.subr.bf16.mxu0 %v5360_v31 }
 0x6f0   :  { %2625 = vmatpush1.bf16.msra.mxu1 %v3832_v25  ;;  %3423 = vmatpush3.bf16.msra.mxu0 %v5417_v32  ;;  %v3841_v25 = vld [vmem:[#allocation9 + $0x34] ss:$12 sps:$4 sm:$0xff]  }
 0x6f1   :  { %2626 = vmatprep.subr.bf16.mxu1 %v3833_v49  ;;  %3424 = vmatprep.subr.bf16.mxu0 %v5360_v31 }
 0x6f4   :  { %2627 = vmatpush1.bf16.msra.mxu1 %v3834_v15  ;;  %3425 = vmatpush3.bf16.msra.mxu0 %v5420_v34 }
 0x6f5   :  { %2717 = vmatprep.subr.bf16.mxu1 %v3835_v51  ;;  %3430 = vmatprep.subr.bf16.mxu0 %v5360_v31  ;;  %v3842_v51 = vld [vmem:[#allocation9 + $0x30] ss:$12 sps:$4 sm:$0xff]  }
 0x78a   :  { %v2436_v62 = vpop.f32.mrb[64].mxu1  ;;  %v2477_v18 = vpop.f32.mrb[80].mxu0 }
 0x78b   :  { %v2483_v42 = vadd.f32 %v2436_v62, %v5430_v6  ;;  %v2438_v37 = vpop.f32.mrb[65].mxu1  ;;  %v3388_v3 = vpop.f32.mrb[81].mxu0  ;;  %v2497_v45 = vadd.f32 %v5016_v14, %v2477_v18  ;;  %v3843_v62 = vld [vmem:[#allocation9 + $0x38] ss:$12 sps:$4 sm:$0xff]   ;;  %v5436_v6 = vld [vmem:[#allocation52_spill] sm:$0xff] }
 0x78c   :  { %v2490_v32 = vadd.f32 %v2438_v37, %v5431_v35  ;;  %v2440_v47 = vpop.f32.mrb[66].mxu1  ;;  %v2480_v44 = vpop.f32.mrb[82].mxu0  ;;  %v3844_v18 = vld [vmem:[#allocation9 + $0x4c] ss:$12 sps:$4 sm:$0xff]   ;;  %v3845_v37 = vld [vmem:[#allocation9 + $0x48] ss:$12 sps:$4 sm:$0xff]  }
 0x78d   :  { %v2978_v56 = vmul.f32 -1.442695, %v2483_v42  ;;  %v2441_v12 = vpop.f32.mrb[67].mxu1  ;;  %v3389_v41 = vpop.f32.mrb[83].mxu0  ;;  %v3846_v3 = vld [vmem:[#allocation9 + $0x50] ss:$12 sps:$4 sm:$0xff]  }
 0x78e   :  { %v2979_v30 = vmul.f32 -1.442695, %v2490_v32  ;;  %v3847_v35 = vld [vmem:[#allocation9 + $0x64] ss:$12 sps:$4 sm:$0xff]   ;;  %v3848_v32 = vld [vmem:[#allocation9 + $0x60] ss:$12 sps:$4 sm:$0xff]  }
 0x78f   :  { %3726 = vpow2.f32 %v2978_v56  ;;  %v3849_v47 = vld [vmem:[#allocation9 + $0x68] ss:$12 sps:$4 sm:$0xff]   ;;  %v3851_v12 = vld [vmem:[#allocation9 + $0x78] ss:$12 sps:$4 sm:$0xff]   ;;  %v3852_v41 = vld [vmem:[#allocation9 + $0x80] ss:$12 sps:$4 sm:$0xff]  }
 0x790   :  { %3728 = vpow2.f32 %v2979_v30  ;;  %v3850_v44 = vld [vmem:[#allocation9 + $0x7c] ss:$12 sps:$4 sm:$0xff]   ;;  %v3853_v30 = vld [vmem:[#allocation9 + $0x94] ss:$12 sps:$4 sm:$0xff]  }
 0x799   :  { %v3727_v34 = vpop.eup %3726 }
 0x79a   :  { %v2487_v40 = vadd.f32 1.0, %v3727_v34  ;;  %v3729_v9 = vpop.eup %3728 }
 0x79b   :  { %v2494_v39 = vadd.f32 1.0, %v3729_v9 }
 0x79c   :  { %3730 = vrcp.f32 %v2487_v40 }
 0x79d   :  { %3732 = vrcp.f32 %v2494_v39  ;;  %v3854_v39 = vld [vmem:[#allocation9 + $0x90] ss:$12 sps:$4 sm:$0xff]  }
 0x7a6   :  { %v3731_v43 = vpop.eup %3730 }
 0x7a7   :  { %v2498_v27 = vmul.f32 %v3731_v43, %v2497_v45  ;;  %v3733_v10 = vpop.eup %3732  ;;  %v3855_v45 = vld [vmem:[#allocation9 + $0x98] ss:$12 sps:$4 sm:$0xff]  }
 0x7a8   :  { %v2501_v13 = vsub.f32 1.0, %v3733_v10  ;;  %v2503_v16 = vmul.f32 %v3733_v10, %v5135_v29 }
 0x7a9   :  { %v2499_v4 = vadd.f32 %v2498_v27, %v5432_v60  ;;  %v3856_v27 = vld [vmem:[#allocation9 + $0xac] ss:$12 sps:$4 sm:$0xff]  }
 0x7aa   :  { %v2541_v23 = vpop.f32.mrb[68].mxu1  ;;  %v2582_v54 = vpop.f32.mrb[84].mxu0 }
 0x7ab   :  { %3734 = vtanh.f32 %v2499_v4  ;;  %v2588_v59 = vadd.f32 %v2541_v23, %v5433_v5  ;;  %v2543_v33 = vpop.f32.mrb[69].mxu1  ;;  %v3408_v36 = vpop.f32.mrb[85].mxu0  ;;  %v2602_v49 = vadd.f32 %v5044_v19, %v2582_v54  ;;  %v3857_v4 = vld [vmem:[#allocation9 + $0xa8] ss:$12 sps:$4 sm:$0xff]   ;;  %v3858_v23 = vld [vmem:[#allocation9 + $0xb0] ss:$12 sps:$4 sm:$0xff]  }
 0x7ac   :  { %v2595_v63 = vadd.f32 %v2543_v33, %v5434_v57  ;;  %v2545_v55 = vpop.f32.mrb[70].mxu1  ;;  %v2585_v61 = vpop.f32.mrb[86].mxu0  ;;  %v5438_v57 = vld [vmem:[#allocation46_spill] sm:$0xff] }
 0x7ad   :  { %v2980_v7 = vmul.f32 -1.442695, %v2588_v59  ;;  %v2546_v11 = vpop.f32.mrb[71].mxu1  ;;  %v3409_v17 = vpop.f32.mrb[87].mxu0  ;;  %v5439_v61 = vld [vmem:[#allocation48_spill] sm:$0xff] }
 0x7ae   :  { %v2981_v50 = vmul.f32 -1.442695, %v2595_v63 }
 0x7af   :  { %3736 = vpow2.f32 %v2980_v7 }
 0x7b0   :  { %3738 = vpow2.f32 %v2981_v50 }
 0x7b5   :  { %v3735_v48 = vpop.eup %3734 }
 0x7b6   :  { %v2502_v20 = vmul.f32 %v3735_v48, %v2501_v13 }
 0x7b8   :  { %v2504_v28 = vadd.f32 %v2503_v16, %v2502_v20 }
 0x7b9   :  { %v3737_v1 = vpop.eup %3736 }
 0x7ba   :  { %v2592_v46 = vadd.f32 1.0, %v3737_v1  ;;  %v5214_v58 = vsel %vm1507_vm14, %v2504_v28, %v5135_v29  ;;  %v3739_v38 = vpop.eup %3738  ;;  %v3839_v29 = vld [vmem:[#allocation9 + $0x18] ss:$12 sps:$4 sm:$0xff]  }
 0x7bb   :  { %v2611_v2 = vpack.c.bf16 %v5214_v58, %v5214_v58  ;;  %v2599_v21 = vadd.f32 1.0, %v3739_v38  ;;  %v5441_v38 = vld [vmem:[#allocation21_spill] sm:$0xff] }
 0x7bc   :  { %3740 = vrcp.f32 %v2592_v46 }
 0x7bd   :  { %2645 = vmatmul.mubr.bf16.vlgmr.msra.gmra.mrb[72].mxu1 %v2611_v2  ;;  %3427 = vmatmul.mubr.bf16.vlgmr.msra.gmra.mrb[88].mxu0 %v2611_v2  ;;  %3742 = vrcp.f32 %v2599_v21  ;;  %v5440_v2 = vld [vmem:[#allocation47_spill] sm:$0xff] }
 0x7be   :  { %2718 = vmatpush1.bf16.msra.mxu1 %v3836_v0  ;;  %3431 = vmatpush3.bf16.msra.mxu0 %v3837_v52 }
 0x7bf   :  { %2719 = vmatprep.subr.bf16.mxu1 %v3838_v8  ;;  %3432 = vmatprep.subr.bf16.mxu0 %v5360_v31 }
 0x7c0   :  { %2749 = vmatprep.mubr.bf16.mxu1 %v5361_v22  ;;  %3446 = vmatprep.mubr.msk.bf16.mxu0 %vm3989_vm4, %v5360_v31 }
 0x7c2   :  { %2720 = vmatpush1.bf16.msra.mxu1 %v3839_v29  ;;  %3433 = vmatpush3.bf16.msra.mxu0 %v3840_v53 }
 0x7c3   :  { %2721 = vmatprep.subr.bf16.mxu1 %v3841_v25  ;;  %3434 = vmatprep.subr.bf16.mxu0 %v5360_v31  ;;  %v5442_v25 = vld [vmem:[#allocation49_spill] sm:$0xff] }
 0x7c6   :  { %v3741_v15 = vpop.eup %3740  ;;  %2722 = vmatpush1.bf16.msra.mxu1 %v3842_v51  ;;  %3435 = vmatpush3.bf16.msra.mxu0 %v3843_v62 }
 0x7c7   :  { %v2603_v22 = vmul.f32 %v3741_v15, %v2602_v49  ;;  %2723 = vmatprep.subr.bf16.mxu1 %v3844_v18  ;;  %3436 = vmatprep.subr.bf16.mxu0 %v5360_v31  ;;  %v3743_v56 = vpop.eup %3742 }
 0x7c8   :  { %v2606_v34 = vsub.f32 1.0, %v3743_v56  ;;  %v2608_v9 = vmul.f32 %v3743_v56, %v5178_v24 }
 0x7c9   :  { %v2604_v42 = vadd.f32 %v2603_v22, %v5436_v6 }
 0x7ca   :  { %2724 = vmatpush1.bf16.msra.mxu1 %v3845_v37  ;;  %3437 = vmatpush3.bf16.msra.mxu0 %v3846_v3 }
 0x7cb   :  { %3744 = vtanh.f32 %v2604_v42  ;;  %2725 = vmatprep.subr.bf16.mxu1 %v3847_v35  ;;  %3438 = vmatprep.subr.bf16.mxu0 %v5360_v31 }
 0x7ce   :  { %2726 = vmatpush1.bf16.msra.mxu1 %v3848_v32  ;;  %3439 = vmatpush3.bf16.msra.mxu0 %v3849_v47 }
 0x7cf   :  { %2727 = vmatprep.subr.bf16.mxu1 %v3850_v44  ;;  %3440 = vmatprep.subr.bf16.mxu0 %v5360_v31 }
 0x7d2   :  { %2728 = vmatpush1.bf16.msra.mxu1 %v3851_v12  ;;  %3441 = vmatpush3.bf16.msra.mxu0 %v3852_v41 }
 0x7d3   :  { %2729 = vmatprep.subr.bf16.mxu1 %v3853_v30  ;;  %3442 = vmatprep.subr.bf16.mxu0 %v5360_v31 }
 0x7d5   :  { %v3745_v40 = vpop.eup %3744 }
 0x7d6   :  { %2730 = vmatpush1.bf16.msra.mxu1 %v3854_v39  ;;  %3443 = vmatpush3.bf16.msra.mxu0 %v3855_v45  ;;  %v2607_v43 = vmul.f32 %v3745_v40, %v2606_v34  ;;  %v5444_v39 = vld [vmem:[#allocation50_spill] sm:$0xff] }
 0x7d7   :  { %2731 = vmatprep.subr.bf16.mxu1 %v3856_v27  ;;  %3444 = vmatprep.subr.bf16.mxu0 %v5360_v31 }
 0x7d8   :  { %v2609_v60 = vadd.f32 %v2608_v9, %v2607_v43 }
 0x7da   :  { %2732 = vmatpush1.bf16.msra.mxu1 %v3857_v4  ;;  %3445 = vmatpush3.bf16.msra.mxu0 %v3858_v23  ;;  %v5234_v5 = vsel %vm1396_vm13, %v2609_v60, %v5178_v24 }
 0x7db   :  { %v2716_v59 = vpack.c.bf16 %v5234_v5, %v5234_v5 }
 0x7dd   :  { %2750 = vmatmul.mubr.bf16.vlgmr.msra.gmra.mrb[76].mxu1 %v2716_v59  ;;  %3447 = vmatmul.mubr.bf16.vlgmr.msra.gmra.mrb[92].mxu0 %v2716_v59 }
 0x890   :  { %v2646_v33 = vpop.f32.mrb[72].mxu1  ;;  %v2687_v36 = vpop.f32.mrb[88].mxu0 }
 0x891   :  { %v2693_v63 = vadd.f32 %v2646_v33, %v5438_v57  ;;  %v2648_v31 = vpop.f32.mrb[73].mxu1  ;;  %v3428_v55 = vpop.f32.mrb[89].mxu0  ;;  %v2707_v1 = vadd.f32 %v5016_v14, %v2687_v36 }
 0x892   :  { %v2700_v7 = vadd.f32 %v2648_v31, %v5439_v61  ;;  %v2650_v11 = vpop.f32.mrb[74].mxu1  ;;  %v2690_v17 = vpop.f32.mrb[90].mxu0 }
 0x893   :  { %v2982_v10 = vmul.f32 -1.442695, %v2693_v63  ;;  %v2651_v50 = vpop.f32.mrb[75].mxu1  ;;  %v3429_v13 = vpop.f32.mrb[91].mxu0 }
 0x894   :  { %v2983_v24 = vmul.f32 -1.442695, %v2700_v7 }
 0x895   :  { %3746 = vpow2.f32 %v2982_v10 }
 0x896   :  { %3748 = vpow2.f32 %v2983_v24 }
 0x89f   :  { %v3747_v48 = vpop.eup %3746 }
 0x8a0   :  { %v2697_v16 = vadd.f32 1.0, %v3747_v48  ;;  %v3749_v20 = vpop.eup %3748 }
 0x8a1   :  { %v2704_v28 = vadd.f32 1.0, %v3749_v20 }
 0x8a2   :  { %3750 = vrcp.f32 %v2697_v16 }
 0x8a3   :  { %3752 = vrcp.f32 %v2704_v28 }
 0x8ac   :  { %v3751_v46 = vpop.eup %3750 }
 0x8ad   :  { %v2708_v26 = vmul.f32 %v3751_v46, %v2707_v1  ;;  %v3753_v14 = vpop.eup %3752 }
 0x8ae   :  { %v2711_v42 = vsub.f32 1.0, %v3753_v14  ;;  %v2713_v35 = vmul.f32 %v3753_v14, %v5214_v58 }
 0x8af   :  { %v2709_v0 = vadd.f32 %v2708_v26, %v5440_v2 }
 0x8b0   :  { %v2751_v52 = vpop.f32.mrb[76].mxu1  ;;  %v2792_v8 = vpop.f32.mrb[92].mxu0 }
 0x8b1   :  { %3754 = vtanh.f32 %v2709_v0  ;;  %v2798_v29 = vadd.f32 %v2751_v52, %v5441_v38  ;;  %v2753_v53 = vpop.f32.mrb[77].mxu1  ;;  %v3448_v21 = vpop.f32.mrb[93].mxu0  ;;  %v2812_v34 = vadd.f32 %v5044_v19, %v2792_v8 }
 0x8b2   :  { %v2805_v49 = vadd.f32 %v2753_v53, %v5442_v25  ;;  %v2755_v15 = vpop.f32.mrb[78].mxu1  ;;  %v2795_v51 = vpop.f32.mrb[94].mxu0 }
 0x8b3   :  { %v2984_v62 = vmul.f32 -1.442695, %v2798_v29  ;;  %v2756_v22 = vpop.f32.mrb[79].mxu1  ;;  %v3449_v18 = vpop.f32.mrb[95].mxu0 }
 0x8b4   :  { %v2985_v6 = vmul.f32 -1.442695, %v2805_v49 }
 0x8b5   :  { %3756 = vpow2.f32 %v2984_v62 }
 0x8b6   :  { %3758 = vpow2.f32 %v2985_v6 }
 0x8bb   :  { %v3755_v37 = vpop.eup %3754 }
 0x8bc   :  { %v2712_v3 = vmul.f32 %v3755_v37, %v2711_v42 }
 0x8be   :  { %v2714_v32 = vadd.f32 %v2713_v35, %v2712_v3 }
 0x8bf   :  { %v3757_v47 = vpop.eup %3756 }
 0x8c0   :  { %v2802_v44 = vadd.f32 1.0, %v3757_v47  ;;  %v2715_v12 = vsel %vm1271_vm11, %v2714_v32, %v5214_v58  ;;  %v3759_v41 = vpop.eup %3758 }
 0x8c1   :  { %2821 = vst [vmem:[#allocation11] sm:$0xff] %v2715_v12  ;;  %v2809_v30 = vadd.f32 1.0, %v3759_v41 }
 0x8c2   :  { %3760 = vrcp.f32 %v2802_v44 }
 0x8c3   :  { %3762 = vrcp.f32 %v2809_v30 }
 0x8cc   :  { %v3761_v40 = vpop.eup %3760 }
 0x8cd   :  { %v2813_v9 = vmul.f32 %v3761_v40, %v2812_v34  ;;  %v3763_v43 = vpop.eup %3762 }
 0x8ce   :  { %v2816_v27 = vsub.f32 1.0, %v3763_v43  ;;  %v2818_v23 = vmul.f32 %v3763_v43, %v5234_v5 }
 0x8cf   :  { %v2814_v45 = vadd.f32 %v2813_v9, %v5444_v39 }
 0x8d1   :  { %3764 = vtanh.f32 %v2814_v45 }
 0x8db   :  { %v3765_v60 = vpop.eup %3764 }
 0x8dc   :  { %v2817_v4 = vmul.f32 %v3765_v60, %v2816_v27 }
 0x8de   :  { %v2819_v58 = vadd.f32 %v2818_v23, %v2817_v4 }
 0x8e0   :  { %v2820_v19 = vsel %vm1033_vm9, %v2819_v58, %v5234_v5 }
 0x8e1   :  { %2822 = vst [vmem:[#allocation11 + $0x8] sm:$0xff] %v2820_v19 }
 0x8e2   :  { %3958 = shalt.err (!%p3955_p8)
}
 0x8e3   :  { %s3959_s22 = scalar_lea.hbm %s5274_s8, 256 }
 0x8e4   :  { %p3960_p9 = scmp.ne.s32.totalorder %s5274_s8, %s3959_s22  ;;  %p3963_p10 = scmp.lt.u32.totalorder %s3959_s22, %s5274_s8 }
 0x8e6   :  { %p3965_p11 = pnand %p3963_p10, %p3960_p9 }
 0x8e8   :  { %3968 = shalt.err (!%p3965_p11)
}
 0x8e9   :  { %2832 = dma.vmem_to_hbm [thread:$0]  %s2830_s19, 256, %s5274_s8, [#allocation5]  }
 0x8ea   :  { %3975 = dma.done.wait [#allocation5], 256  }
 0x8eb   :  { %3976 = vsyncadd [#allocation5], 4294967040 }
 0x8ec   :  { %2836 = vsyncpa [#allocation4], 1 }
 0x8ed   :  { %2837 = vsyncpa [#allocation7], 1 }
 0x8ee   :  { %2838 = vsyncpa [#allocation10], 1 }
 0x8ef   :  { %2839 = vsyncpa [#allocation5], 1 }

</bundles_post_ra>
